<compile_context>
chip_gen: v7x
topology: tpu7x:2x2x1
jax: 0.10.0
libtpu: 0.0.40
codegen_flags: <defaults>
</compile_context>

<pallas_src>
import math
from functools import partial

import jax
import jax.numpy as jnp
from jax.experimental import pallas as pl
from jax.experimental.pallas import tpu as pltpu

LN_EPS = 1e-5
MAX_TILE_M = 512  # 512-row tiles reach ~85% of HBM roofline and fit v7x VMEM


def ffn_layer_kernel(x_ref, w1_ref, b1_ref, w2_ref, b2_ref, gamma_ref, beta_ref,
                     out_ref):
    """One row tile: (TM, D) in -> (TM, D) out. Weights are whole-array resident."""
    x_f32 = x_ref[...].astype(jnp.float32)                    # residual copy, f32

    # linear1 (bf16 MXU inputs, f32 accumulate) -> ReLU in f32
    h = jnp.dot(x_f32.astype(jnp.bfloat16), w1_ref[...],
                preferred_element_type=jnp.float32) + b1_ref[...]       # (TM, FF)
    h = jnp.maximum(h, 0.0)
    # TODO(synk): only 'relu' is implemented; 'gelu'/'glu' variants not plumbed.
    # TODO(synk): dropout omitted (p=0.0 / eval mode), matching the test config.

    # linear2 — cast the large (TM, FF) intermediate to bf16 for the MXU
    y2 = jnp.dot(h.astype(jnp.bfloat16), w2_ref[...],
                 preferred_element_type=jnp.float32) + b2_ref[...]      # (TM, D)

    # residual + LayerNorm (PyTorch: biased variance, eps inside rsqrt), all f32
    y = x_f32 + y2
    mu = jnp.mean(y, axis=-1, keepdims=True)
    yc = y - mu
    var = jnp.mean(yc * yc, axis=-1, keepdims=True)
    out = yc * jax.lax.rsqrt(var + LN_EPS) * gamma_ref[...] + beta_ref[...]

    out_ref[...] = out.astype(out_ref.dtype)


def _pick_tile_m(n, max_tile=MAX_TILE_M):
    """Largest multiple-of-8 divisor of n that is <= max_tile; whole slab if n is small."""
    if n <= max_tile:
        return n
    for t in range(max_tile, 7, -8):
        if n % t == 0:
            return t
    return n  # fall back: single step over the full slab


@jax.jit
def ffn_layer(tgt, params):
    """tgt: (L, B, D) float32, PyTorch seq-first layout. Returns (L, B, D)."""
    Lq, Bq, D = tgt.shape
    FF = params["w1"].shape[1]
    n = Lq * Bq

    # Position-wise op: flatten to a contiguous, lane-dense (N, D) slab.
    x2d = tgt.reshape(n, D)

    tile_m = _pick_tile_m(n)
    grid = (n // tile_m,)

    # Explicit VMEM budget: resident weights/biases + double-buffered x/out tiles
    # + f32/bf16 hidden intermediates, with margin; clamped to v7x's 64 MiB.
    f32b, bf16b = 4, 2
    weight_bytes = 2 * ((D * FF + FF * D) * bf16b + (FF + 3 * D) * f32b)
    tile_io_bytes = 2 * 2 * tile_m * D * f32b
    inter_bytes = tile_m * FF * (f32b + bf16b) + 3 * tile_m * D * f32b
    vmem_limit = int(min(max(weight_bytes + tile_io_bytes + inter_bytes + (8 << 20),
                             32 << 20), 64 << 20))

    cost = pl.CostEstimate(
        flops=4 * n * D * FF + 10 * n * D,
        transcendentals=n,                       # one rsqrt per row
        bytes_accessed=2 * n * D * f32b + 2 * D * FF * bf16b + (FF + 3 * D) * f32b,
    )

    out2d = pl.pallas_call(
        ffn_layer_kernel,
        out_shape=jax.ShapeDtypeStruct((n, D), tgt.dtype),
        grid=grid,
        in_specs=[
            pl.BlockSpec((tile_m, D), lambda i: (i, 0)),   # x tile: moves per step
            pl.BlockSpec((D, FF), lambda i: (0, 0)),       # w1: resident
            pl.BlockSpec((1, FF), lambda i: (0, 0)),       # b1: resident
            pl.BlockSpec((FF, D), lambda i: (0, 0)),       # w2: resident
            pl.BlockSpec((1, D), lambda i: (0, 0)),        # b2: resident
            pl.BlockSpec((1, D), lambda i: (0, 0)),        # gamma: resident
            pl.BlockSpec((1, D), lambda i: (0, 0)),        # beta: resident
        ],
        out_specs=pl.BlockSpec((tile_m, D), lambda i: (i, 0)),
        input_output_aliases={0: 0},               # write result over the x2d slab
        compiler_params=pltpu.CompilerParams(
            dimension_semantics=("parallel",),     # row tiles shard across TCs on v7x
            vmem_limit_bytes=vmem_limit,
        ),
        cost_estimate=cost,
    )(
        x2d,
        params["w1"], params["b1"],
        params["w2"], params["b2"],
        params["gamma"], params["beta"],
    )
    return out2d.reshape(Lq, Bq, D)


# ---- parameter init matching the PyTorch module ------------------------------
def xavier_uniform(key, shape):
    # shape = (out_features, in_features), matching PyTorch nn.Linear.weight
    fan_out, fan_in = shape
    a = math.sqrt(6.0 / (fan_in + fan_out))
    return jax.random.uniform(key, shape, jnp.float32, -a, a)


def init_params(key, d_model, dim_ff):
    # _reset_parameters: xavier_uniform on weights (dim > 1); biases keep the
    # nn.Linear default uniform(-1/sqrt(fan_in), 1/sqrt(fan_in)); LayerNorm
    # gamma=1, beta=0.  Weights are stored pre-transposed (in, out) and in bf16
    # for the MXU; biases / LN params stay f32.
    k1, k2, k3, k4 = jax.random.split(key, 4)
    w1 = xavier_uniform(k1, (dim_ff, d_model)).T.astype(jnp.bfloat16)   # (D, FF)
    w2 = xavier_uniform(k2, (d_model, dim_ff)).T.astype(jnp.bfloat16)   # (FF, D)
    b1_bound = 1.0 / math.sqrt(d_model)
    b2_bound = 1.0 / math.sqrt(dim_ff)
    b1 = jax.random.uniform(k3, (1, dim_ff), jnp.float32, -b1_bound, b1_bound)
    b2 = jax.random.uniform(k4, (1, d_model), jnp.float32, -b2_bound, b2_bound)
    return {
        "w1": w1, "b1": b1,
        "w2": w2, "b2": b2,
        "gamma": jnp.ones((1, d_model), jnp.float32),
        "beta": jnp.zeros((1, d_model), jnp.float32),
    }


if __name__ == "__main__":
    # Small but lane-dense shapes consistent with the decoder FFN:
    # L=64 queries, B=16, d_model=128, dim_feedforward=512 -> N=1024 rows,
    # tile_m=512, grid=(2,) (exercises the tiled/parallel path).
    L, B, D_MODEL, DIM_FF = 64, 16, 128, 512
    key = jax.random.PRNGKey(0)
    k_tgt, k_par = jax.random.split(key)
    tgt = jax.random.normal(k_tgt, (L, B, D_MODEL), jnp.float32)
    params = init_params(k_par, D_MODEL, DIM_FF)

    out = ffn_layer(tgt, params)
    jax.block_until_ready(out)
    assert out.shape == (L, B, D_MODEL)
    assert bool(jnp.all(jnp.isfinite(out)))
    print("KERNEL_OK")
</pallas_src>

<mosaic_0001>
module attributes {stable_mosaic.version = 11 : i64} {
  func.func @ffn_layer_kernel(%arg0: i32, %arg1: memref<512x128xf32, #tpu.memory_space<vmem>>, %arg2: memref<128x512xbf16, #tpu.memory_space<vmem>>, %arg3: memref<1x512xf32, #tpu.memory_space<vmem>>, %arg4: memref<512x128xbf16, #tpu.memory_space<vmem>>, %arg5: memref<1x128xf32, #tpu.memory_space<vmem>>, %arg6: memref<1x128xf32, #tpu.memory_space<vmem>>, %arg7: memref<1x128xf32, #tpu.memory_space<vmem>>, %arg8: memref<512x128xf32, #tpu.memory_space<vmem>>) attributes {dimension_semantics = [#tpu.dimension_semantics<parallel>], iteration_bounds = array<i64: 2>, scalar_prefetch = 0 : i64, scratch_operands = 0 : i64, tpu.core_type = #tpu.core_type<tc>, window_params = [{transform_indices = @transform_0, window_bounds = array<i64: 512, 128>}, {pipeline_mode = #tpu.pipeline_mode<synchronous>, transform_indices = @transform_1, window_bounds = array<i64: 128, 512>}, {pipeline_mode = #tpu.pipeline_mode<synchronous>, transform_indices = @transform_2, window_bounds = array<i64: 1, 512>}, {pipeline_mode = #tpu.pipeline_mode<synchronous>, transform_indices = @transform_3, window_bounds = array<i64: 512, 128>}, {pipeline_mode = #tpu.pipeline_mode<synchronous>, transform_indices = @transform_4, window_bounds = array<i64: 1, 128>}, {pipeline_mode = #tpu.pipeline_mode<synchronous>, transform_indices = @transform_5, window_bounds = array<i64: 1, 128>}, {pipeline_mode = #tpu.pipeline_mode<synchronous>, transform_indices = @transform_6, window_bounds = array<i64: 1, 128>}, {transform_indices = @transform_7, window_bounds = array<i64: 512, 128>}]} {
    %c0 = arith.constant 0 : index
    %c0_0 = arith.constant 0 : index
    %0 = vector.load %arg1[%c0, %c0_0] : memref<512x128xf32, #tpu.memory_space<vmem>>, vector<512x128xf32>
    %1 = arith.truncf %0 : vector<512x128xf32> to vector<512x128xbf16>
    %c0_1 = arith.constant 0 : index
    %c0_2 = arith.constant 0 : index
    %2 = vector.load %arg2[%c0_1, %c0_2] : memref<128x512xbf16, #tpu.memory_space<vmem>>, vector<128x512xbf16>
    %cst = arith.constant dense<0.000000e+00> : vector<512x512xf32>
    %3 = tpu.matmul %1, %2, %cst {dimension_numbers = #tpu.dot_dimension_numbers<[1], [0], [0], [1], [0, 0, 1, 1], [], []>} : vector<512x128xbf16>, vector<128x512xbf16>, vector<512x512xf32> -> vector<512x512xf32>
    %c0_3 = arith.constant 0 : index
    %c0_4 = arith.constant 0 : index
    %4 = vector.load %arg3[%c0_3, %c0_4] : memref<1x512xf32, #tpu.memory_space<vmem>>, vector<1x512xf32>
    %5 = vector.broadcast %4 : vector<1x512xf32> to vector<512x512xf32>
    %6 = arith.addf %3, %5 : vector<512x512xf32>
    %cst_5 = arith.constant 0.000000e+00 : f32
    %7 = vector.broadcast %cst_5 : f32 to vector<512x512xf32>
    %8 = arith.maximumf %6, %7 : vector<512x512xf32>
    %9 = arith.truncf %8 : vector<512x512xf32> to vector<512x512xbf16>
    %c0_6 = arith.constant 0 : index
    %c0_7 = arith.constant 0 : index
    %10 = vector.load %arg4[%c0_6, %c0_7] : memref<512x128xbf16, #tpu.memory_space<vmem>>, vector<512x128xbf16>
    %cst_8 = arith.constant dense<0.000000e+00> : vector<512x128xf32>
    %11 = tpu.matmul %9, %10, %cst_8 {dimension_numbers = #tpu.dot_dimension_numbers<[1], [0], [0], [1], [0, 0, 1, 1], [], []>} : vector<512x512xbf16>, vector<512x128xbf16>, vector<512x128xf32> -> vector<512x128xf32>
    %c0_9 = arith.constant 0 : index
    %c0_10 = arith.constant 0 : index
    %12 = vector.load %arg5[%c0_9, %c0_10] : memref<1x128xf32, #tpu.memory_space<vmem>>, vector<1x128xf32>
    %13 = vector.broadcast %12 : vector<1x128xf32> to vector<512x128xf32>
    %14 = arith.addf %11, %13 : vector<512x128xf32>
    %15 = arith.addf %0, %14 : vector<512x128xf32>
    %cst_11 = arith.constant dense<0.000000e+00> : vector<512xf32>
    %16 = vector.multi_reduction <add>, %15, %cst_11 [1] : vector<512x128xf32> to vector<512xf32>
    %17 = vector.shape_cast %16 : vector<512xf32> to vector<512x1xf32>
    %cst_12 = arith.constant 1.280000e+02 : f32
    %18 = vector.broadcast %cst_12 : f32 to vector<512x1xf32>
    %19 = arith.divf %17, %18 : vector<512x1xf32>
    %20 = vector.broadcast %19 : vector<512x1xf32> to vector<512x128xf32>
    %21 = arith.subf %15, %20 : vector<512x128xf32>
    %22 = arith.mulf %21, %21 : vector<512x128xf32>
    %cst_13 = arith.constant dense<0.000000e+00> : vector<512xf32>
    %23 = vector.multi_reduction <add>, %22, %cst_13 [1] : vector<512x128xf32> to vector<512xf32>
    %24 = vector.shape_cast %23 : vector<512xf32> to vector<512x1xf32>
    %cst_14 = arith.constant 1.280000e+02 : f32
    %25 = vector.broadcast %cst_14 : f32 to vector<512x1xf32>
    %26 = arith.divf %24, %25 : vector<512x1xf32>
    %cst_15 = arith.constant 9.99999974E-6 : f32
    %27 = vector.broadcast %cst_15 : f32 to vector<512x1xf32>
    %28 = arith.addf %26, %27 : vector<512x1xf32>
    %29 = math.rsqrt %28 : vector<512x1xf32>
    %30 = vector.broadcast %29 : vector<512x1xf32> to vector<512x128xf32>
    %31 = arith.mulf %21, %30 : vector<512x128xf32>
    %c0_16 = arith.constant 0 : index
    %c0_17 = arith.constant 0 : index
    %32 = vector.load %arg6[%c0_16, %c0_17] : memref<1x128xf32, #tpu.memory_space<vmem>>, vector<1x128xf32>
    %33 = vector.broadcast %32 : vector<1x128xf32> to vector<512x128xf32>
    %34 = arith.mulf %31, %33 : vector<512x128xf32>
    %c0_18 = arith.constant 0 : index
    %c0_19 = arith.constant 0 : index
    %35 = vector.load %arg7[%c0_18, %c0_19] : memref<1x128xf32, #tpu.memory_space<vmem>>, vector<1x128xf32>
    %36 = vector.broadcast %35 : vector<1x128xf32> to vector<512x128xf32>
    %37 = arith.addf %34, %36 : vector<512x128xf32>
    %c0_20 = arith.constant 0 : index
    %c0_21 = arith.constant 0 : index
    %38 = vector.load %arg8[%c0_20, %c0_21] : memref<512x128xf32, #tpu.memory_space<vmem>>, vector<512x128xf32>
    tpu.vector_store %arg8[%c0_20, %c0_21], %37 {strides = array<i32>} : memref<512x128xf32, #tpu.memory_space<vmem>>, vector<512x128xf32>,
    return
  }
  func.func @transform_0(%arg0: i32) -> (i32, i32) {
    %c0_i32 = arith.constant 0 : i32
    %c0_i32_0 = arith.constant 0 : i32
    return %arg0, %c0_i32 : i32, i32
  }
  func.func @transform_1(%arg0: i32) -> (i32, i32) {
    %c0_i32 = arith.constant 0 : i32
    %c0_i32_0 = arith.constant 0 : i32
    %c0_i32_1 = arith.constant 0 : i32
    return %c0_i32, %c0_i32_0 : i32, i32
  }
  func.func @transform_2(%arg0: i32) -> (i32, i32) {
    %c0_i32 = arith.constant 0 : i32
    %c0_i32_0 = arith.constant 0 : i32
    %c0_i32_1 = arith.constant 0 : i32
    return %c0_i32, %c0_i32_0 : i32, i32
  }
  func.func @transform_3(%arg0: i32) -> (i32, i32) {
    %c0_i32 = arith.constant 0 : i32
    %c0_i32_0 = arith.constant 0 : i32
    %c0_i32_1 = arith.constant 0 : i32
    return %c0_i32, %c0_i32_0 : i32, i32
  }
  func.func @transform_4(%arg0: i32) -> (i32, i32) {
    %c0_i32 = arith.constant 0 : i32
    %c0_i32_0 = arith.constant 0 : i32
    %c0_i32_1 = arith.constant 0 : i32
    return %c0_i32, %c0_i32_0 : i32, i32
  }
  func.func @transform_5(%arg0: i32) -> (i32, i32) {
    %c0_i32 = arith.constant 0 : i32
    %c0_i32_0 = arith.constant 0 : i32
    %c0_i32_1 = arith.constant 0 : i32
    return %c0_i32, %c0_i32_0 : i32, i32
  }
  func.func @transform_6(%arg0: i32) -> (i32, i32) {
    %c0_i32 = arith.constant 0 : i32
    %c0_i32_0 = arith.constant 0 : i32
    %c0_i32_1 = arith.constant 0 : i32
    return %c0_i32, %c0_i32_0 : i32, i32
  }
  func.func @transform_7(%arg0: i32) -> (i32, i32) {
    %c0_i32 = arith.constant 0 : i32
    %c0_i32_0 = arith.constant 0 : i32
    return %arg0, %c0_i32 : i32, i32
  }
}

</mosaic_0001>

<bundles_post_ra>
// kernel: ffn_layer.1
= control target key start
LH: loop header
LB: loop body
LE: loop exit
PB: predicated region body
PF: predicated region fallthrough
CT: control target
= control target key end

     0   :  { %s3966_s24 = smov 0   ;;  %s5925_s0 = inlined_call_operand.vmem [shape: f32[1024,128], index: 0, kind: input, shape index: {}, may-alias: {0,7}]   ;;  %s5926_s1 = inlined_call_operand.vmem [shape: bf16[128,512], index: 1, kind: input, shape index: {}]   ;;  %s5927_s2 = inlined_call_operand.vmem [shape: f32[1,512], index: 2, kind: input, shape index: {}]   ;;  %s5928_s3 = inlined_call_operand.vmem [shape: bf16[512,128], index: 3, kind: input, shape index: {}]   ;;  %s5929_s4 = inlined_call_operand.vmem [shape: f32[1,128], index: 4, kind: input, shape index: {}]   ;;  %s5930_s5 = inlined_call_operand.vmem [shape: f32[1,128], index: 5, kind: input, shape index: {}]   ;;  %s5931_s6 = inlined_call_operand.vmem [shape: f32[1,128], index: 6, kind: input, shape index: {}]   ;;  %s5932_s7 = inlined_call_operand.vmem [shape: f32[1024,128], index: 7, kind: output, shape index: {}, may-alias: {0,7}]  }
   0x1 LB: > { %s3555_s25 = sadd.s32 4294967295, %s3923_s24   ;;  %p3559_p0 = scmp.ge.s32.totalorder %s3923_s24, 1  ;;  %s3923_s24 = sphi %s3966_s24, %s17_s24  }
   0x2   : > { %p238_p1 = scmp.lt.s32.totalorder %s3923_s24, 3 }
   0x4   : > { %p239_p2 = pnand %p3559_p0, %p238_p1 }
   0x6   : > { %242 = sbr.rel (%p239_p2) target bundleno = 1083 (0x43b), region = 48 }
   0xd   : > { %v3642_v0 = vld [vmem:[%s5926_s1 + $0x4] ss:$16 sps:$4 sm:$0xff]   ;;  %v3644_v1 = vld [vmem:[%s5926_s1 + $0xc] ss:$16 sps:$4 sm:$0xff]   ;;  %v3925_v2 = vmov 0   ;;  %s3560_s12 = sshll.u32 %s3555_s25, 6 }
   0xe   : > { %625 = vmatprep.mubr.bf16.mxu0 %v3925_v2  ;;  %978 = vmatprep.mubr.bf16.mxu1 %v3925_v2  ;;  %v3646_v3 = vld [vmem:[%s5926_s1] ss:$16 sps:$4 sm:$0xff]   ;;  %v3647_v4 = vld [vmem:[%s5926_s1 + $0x8] ss:$16 sps:$4 sm:$0xff]   ;;  %v3648_v5 = vld [vmem:[%s5926_s1 + $0x24] ss:$16 sps:$4 sm:$0xff]  }
   0xf   : > { %593 = vmatprep.subr.bf16.mxu0 %v3642_v0  ;;  %946 = vmatprep.subr.bf16.mxu1 %v3644_v1  ;;  %v3650_v6 = vld [vmem:[%s5926_s1 + $0x2c] ss:$16 sps:$4 sm:$0xff]   ;;  %v3652_v7 = vld [vmem:[%s5926_s1 + $0x20] ss:$16 sps:$4 sm:$0xff]   ;;  %v3653_v8 = vld [vmem:[%s5926_s1 + $0x28] ss:$16 sps:$4 sm:$0xff]  }
  0x10   : > { %594 = vmatpush1.bf16.msra.mxu0 %v3646_v3  ;;  %947 = vmatpush1.bf16.msra.mxu1 %v3647_v4  ;;  %v3654_v9 = vld [vmem:[%s5926_s1 + $0x44] ss:$16 sps:$4 sm:$0xff]   ;;  %v3656_v10 = vld [vmem:[%s5926_s1 + $0x4c] ss:$16 sps:$4 sm:$0xff]   ;;  %v3658_v11 = vld [vmem:[%s5926_s1 + $0x40] ss:$16 sps:$4 sm:$0xff]  }
  0x11   : > { %595 = vmatprep.subr.bf16.mxu0 %v3648_v5  ;;  %948 = vmatprep.subr.bf16.mxu1 %v3650_v6  ;;  %v3659_v12 = vld [vmem:[%s5926_s1 + $0x48] ss:$16 sps:$4 sm:$0xff]   ;;  %v3660_v13 = vld [vmem:[%s5926_s1 + $0x64] ss:$16 sps:$4 sm:$0xff]   ;;  %v3662_v14 = vld [vmem:[%s5926_s1 + $0x6c] ss:$16 sps:$4 sm:$0xff]  }
  0x12   : > { %v3664_v15 = vld [vmem:[%s5926_s1 + $0x60] ss:$16 sps:$4 sm:$0xff]   ;;  %v3665_v16 = vld [vmem:[%s5926_s1 + $0x68] ss:$16 sps:$4 sm:$0xff]   ;;  %v3666_v17 = vld [vmem:[%s5926_s1 + $0x84] ss:$16 sps:$4 sm:$0xff]  }
  0x13   : > { %v3668_v18 = vld [vmem:[%s5926_s1 + $0x8c] ss:$16 sps:$4 sm:$0xff]   ;;  %p271_p3 = scmp.lt.s32.totalorder %s3560_s12, 127  ;;  %v3670_v19 = vld [vmem:[%s5926_s1 + $0x80] ss:$16 sps:$4 sm:$0xff]  }
  0x14   : > { %596 = vmatpush1.bf16.msra.mxu0 %v3652_v7  ;;  %949 = vmatpush1.bf16.msra.mxu1 %v3653_v8  ;;  %v3671_v20 = vld [vmem:[%s5926_s1 + $0x88] ss:$16 sps:$4 sm:$0xff]   ;;  %v3672_v21 = vld [vmem:[%s5926_s1 + $0xa4] ss:$16 sps:$4 sm:$0xff]   ;;  %v3674_v22 = vld [vmem:[%s5926_s1 + $0xac] ss:$16 sps:$4 sm:$0xff]  }
  0x15   : > { %597 = vmatprep.subr.bf16.mxu0 %v3654_v9  ;;  %950 = vmatprep.subr.bf16.mxu1 %v3656_v10  ;;  %s5988_s12 = smov (!%p271_p3, %s3560_s12), 127  ;;  %v3676_v23 = vld [vmem:[%s5926_s1 + $0xa0] ss:$16 sps:$4 sm:$0xff]   ;;  %v3677_v24 = vld [vmem:[%s5926_s1 + $0xa8] ss:$16 sps:$4 sm:$0xff]  }
  0x16   : > { %v3678_v25 = vld [vmem:[%s5926_s1 + $0xc4] ss:$16 sps:$4 sm:$0xff]   ;;  %v3680_v26 = vld [vmem:[%s5926_s1 + $0xcc] ss:$16 sps:$4 sm:$0xff]   ;;  %s3561_s14 = sshll.u32 %s5988_s12, 3 }
  0x17   : > { %v3682_v27 = vld [vmem:[%s5926_s1 + $0xc0] ss:$16 sps:$4 sm:$0xff]   ;;  %v3683_v28 = vld [vmem:[%s5926_s1 + $0xc8] ss:$16 sps:$4 sm:$0xff]   ;;  %v3684_v29 = vld [vmem:[%s5926_s1 + $0xe4] ss:$16 sps:$4 sm:$0xff]   ;;  %s4076_s26 = scalar_lea.vmem %s5925_s0, %s3561_s14  ;;  %s5541_s30 = scalar_lea.vmem %s5932_s7, %s3561_s14 }
  0x18   : > { %598 = vmatpush1.bf16.msra.mxu0 %v3658_v11  ;;  %951 = vmatpush1.bf16.msra.mxu1 %v3659_v12  ;;  %v3686_v30 = vld [vmem:[%s5926_s1 + $0xec] ss:$16 sps:$4 sm:$0xff]   ;;  %v3688_v31 = vld [vmem:[%s5926_s1 + $0xe0] ss:$16 sps:$4 sm:$0xff]   ;;  %v3689_v32 = vld [vmem:[%s5926_s1 + $0xe8] ss:$16 sps:$4 sm:$0xff]  }
  0x19   : > { %599 = vmatprep.subr.bf16.mxu0 %v3660_v13  ;;  %952 = vmatprep.subr.bf16.mxu1 %v3662_v14  ;;  %v283_v33 = vld [vmem:[%s4076_s26] sm:$0xff]  ;;  %v284_v34 = vld [vmem:[%s4076_s26 + $0x8] sm:$0xff]  ;;  %v285_v38 = vld [vmem:[%s4076_s26 + $0x10] sm:$0xff] }
  0x1a   : > { %v347_v35 = vpack.c.bf16 %v284_v34, %v283_v33  ;;  %v3690_v36 = vld [vmem:[%s5928_s3] sm:$0xff]   ;;  %v286_v39 = vld [vmem:[%s4076_s26 + $0x18] sm:$0xff]  ;;  %v3692_v40 = vld [vmem:[%s5928_s3 + $0x8] sm:$0xff]  }
  0x1b   : > { %v3691_v37 = vld [vmem:[%s5928_s3 + $0x80] sm:$0xff]   ;;  %v3693_v41 = vld [vmem:[%s5928_s3 + $0x88] sm:$0xff]   ;;  %v348_v42 = vpack.c.bf16 %v286_v39, %v285_v38  ;;  %v3694_v43 = vld [vmem:[%s5928_s3 + $0x10] sm:$0xff]  }
  0x1c   : > { %600 = vmatpush1.bf16.msra.mxu0 %v3664_v15  ;;  %953 = vmatpush1.bf16.msra.mxu1 %v3665_v16  ;;  %v3695_v44 = vld [vmem:[%s5928_s3 + $0x90] sm:$0xff]   ;;  %v287_v45 = vld [vmem:[%s4076_s26 + $0x20] sm:$0xff]  ;;  %v288_v46 = vld [vmem:[%s4076_s26 + $0x28] sm:$0xff] }
  0x1d   : > { %601 = vmatprep.subr.bf16.mxu0 %v3666_v17  ;;  %954 = vmatprep.subr.bf16.mxu1 %v3668_v18  ;;  %v3696_v47 = vld [vmem:[%s5928_s3 + $0x18] sm:$0xff]   ;;  %v349_v49 = vpack.c.bf16 %v288_v46, %v287_v45  ;;  %v3698_v50 = vld [vmem:[%s5928_s3 + $0x20] sm:$0xff]   ;;  %v289_v52 = vld [vmem:[%s4076_s26 + $0x30] sm:$0xff] }
  0x1e   : > { %v3697_v48 = vld [vmem:[%s5928_s3 + $0x98] sm:$0xff]   ;;  %v3699_v51 = vld [vmem:[%s5928_s3 + $0xa0] sm:$0xff]   ;;  %v3700_v54 = vld [vmem:[%s5928_s3 + $0x28] sm:$0xff]  }
  0x1f   : > { %v290_v53 = vld [vmem:[%s4076_s26 + $0x38] sm:$0xff]  ;;  %v3701_v55 = vld [vmem:[%s5928_s3 + $0xa8] sm:$0xff]   ;;  %v3702_v57 = vld [vmem:[%s5928_s3 + $0x30] sm:$0xff]  }
  0x20   : > { %602 = vmatpush1.bf16.msra.mxu0 %v3670_v19  ;;  %955 = vmatpush1.bf16.msra.mxu1 %v3671_v20  ;;  %v350_v56 = vpack.c.bf16 %v290_v53, %v289_v52  ;;  %v3703_v58 = vld [vmem:[%s5928_s3 + $0xb0] sm:$0xff]   ;;  %v291_v59 = vld [vmem:[%s4076_s26 + $0x40] sm:$0xff]  ;;  %v292_v60 = vld [vmem:[%s4076_s26 + $0x48] sm:$0xff] }
  0x21   : > { %603 = vmatprep.subr.bf16.mxu0 %v3672_v21  ;;  %956 = vmatprep.subr.bf16.mxu1 %v3674_v22  ;;  %v3704_v61 = vld [vmem:[%s5928_s3 + $0x38] sm:$0xff]   ;;  %v351_v63 = vpack.c.bf16 %v292_v60, %v291_v59  ;;  %v3706_v0 = vld [vmem:[%s5928_s3 + $0x40] sm:$0xff]   ;;  %v293_v3 = vld [vmem:[%s4076_s26 + $0x50] sm:$0xff] }
  0x22   : > { %v3705_v62 = vld [vmem:[%s5928_s3 + $0xb8] sm:$0xff]   ;;  %v3707_v1 = vld [vmem:[%s5928_s3 + $0xc0] sm:$0xff]   ;;  %v3708_v5 = vld [vmem:[%s5928_s3 + $0x48] sm:$0xff]  }
  0x23   : > { %v294_v4 = vld [vmem:[%s4076_s26 + $0x58] sm:$0xff]  ;;  %v3709_v6 = vld [vmem:[%s5928_s3 + $0xc8] sm:$0xff]   ;;  %v3710_v8 = vld [vmem:[%s5928_s3 + $0x50] sm:$0xff]  }
  0x24   : > { %604 = vmatpush1.bf16.msra.mxu0 %v3676_v23  ;;  %957 = vmatpush1.bf16.msra.mxu1 %v3677_v24  ;;  %v352_v7 = vpack.c.bf16 %v294_v4, %v293_v3  ;;  %v3711_v9 = vld [vmem:[%s5928_s3 + $0xd0] sm:$0xff]   ;;  %v295_v10 = vld [vmem:[%s4076_s26 + $0x60] sm:$0xff]  ;;  %v296_v11 = vld [vmem:[%s4076_s26 + $0x68] sm:$0xff] }
  0x25   : > { %605 = vmatprep.subr.bf16.mxu0 %v3678_v25  ;;  %958 = vmatprep.subr.bf16.mxu1 %v3680_v26  ;;  %v353_v12 = vpack.c.bf16 %v296_v11, %v295_v10  ;;  %v3712_v13 = vld [vmem:[%s5928_s3 + $0x58] sm:$0xff]   ;;  %v297_v15 = vld [vmem:[%s4076_s26 + $0x70] sm:$0xff]  ;;  %v299_v18 = vld [vmem:[%s4076_s26 + $0x80] sm:$0xff] }
  0x26   : > { %v3713_v14 = vld [vmem:[%s5928_s3 + $0xd8] sm:$0xff]   ;;  %v300_v19 = vld [vmem:[%s4076_s26 + $0x88] sm:$0xff]  ;;  %v3714_v21 = vld [vmem:[%s5928_s3 + $0x60] sm:$0xff]  }
  0x27   : > { %v298_v16 = vld [vmem:[%s4076_s26 + $0x78] sm:$0xff]  ;;  %v355_v20 = vpack.c.bf16 %v300_v19, %v299_v18  ;;  %v3715_v22 = vld [vmem:[%s5928_s3 + $0xe0] sm:$0xff]   ;;  %v301_v23 = vld [vmem:[%s4076_s26 + $0x90] sm:$0xff] }
  0x28   : > { %606 = vmatpush1.bf16.msra.mxu0 %v3682_v27  ;;  %959 = vmatpush1.bf16.msra.mxu1 %v3683_v28  ;;  %v354_v17 = vpack.c.bf16 %v298_v16, %v297_v15  ;;  %v302_v24 = vld [vmem:[%s4076_s26 + $0x98] sm:$0xff]  ;;  %v303_v26 = vld [vmem:[%s4076_s26 + $0xa0] sm:$0xff]  ;;  %v304_v27 = vld [vmem:[%s4076_s26 + $0xa8] sm:$0xff] }
  0x29   : > { %607 = vmatprep.subr.bf16.mxu0 %v3684_v29  ;;  %960 = vmatprep.subr.bf16.mxu1 %v3686_v30  ;;  %v356_v25 = vpack.c.bf16 %v302_v24, %v301_v23  ;;  %v357_v28 = vpack.c.bf16 %v304_v27, %v303_v26  ;;  %v3716_v29 = vld [vmem:[%s5928_s3 + $0x68] sm:$0xff]   ;;  %v305_v30 = vld [vmem:[%s4076_s26 + $0xb0] sm:$0xff]  ;;  %v307_v34 = vld [vmem:[%s4076_s26 + $0xc0] sm:$0xff] }
  0x2a   : > { %v3717_v33 = vld [vmem:[%s5928_s3 + $0xe8] sm:$0xff]   ;;  %v310_v38 = vld [vmem:[%s4076_s26 + $0xd8] sm:$0xff]  ;;  %v3718_v39 = vld [vmem:[%s5928_s3 + $0x70] sm:$0xff]  }
  0x2b   : > { %v313_v45 = vld [vmem:[%s4076_s26 + $0xf0] sm:$0xff]  ;;  %v314_v46 = vld [vmem:[%s4076_s26 + $0xf8] sm:$0xff]  ;;  %v331_v11 = vld [vmem:[%s4076_s26 + $0x180] sm:$0xff] }
  0x2c   : > { %608 = vmatpush1.bf16.msra.mxu0 %v3688_v31  ;;  %961 = vmatpush1.bf16.msra.mxu1 %v3689_v32  ;;  %v306_v31 = vld [vmem:[%s4076_s26 + $0xb8] sm:$0xff]  ;;  %v317_v53 = vld [vmem:[%s4076_s26 + $0x110] sm:$0xff]  ;;  %v335_v19 = vld [vmem:[%s4076_s26 + $0x1a0] sm:$0xff] }
  0x2d   : > { %1946 = vmatprep.subr.bf16.mxu0 %v3925_v2  ;;  %2235 = vmatprep.subr.bf16.mxu1 %v3925_v2  ;;  %v358_v32 = vpack.c.bf16 %v306_v31, %v305_v30  ;;  %v321_v59 = vld [vmem:[%s4076_s26 + $0x130] sm:$0xff]  ;;  %v322_v60 = vld [vmem:[%s4076_s26 + $0x138] sm:$0xff]  ;;  %v411_v24 = vld [vmem:[%s5927_s2] sm:$0xf] }
  0x2e   : > { %v326_v3 = vld [vmem:[%s4076_s26 + $0x158] sm:$0xff]  ;;  %v337_v31 = vld [vmem:[%s4076_s26 + $0x1b0] sm:$0xff] }
  0x2f   : > { %626 = vmatmul.mubr.bf16.vlgmr.msra.gmra.mrb[0].mxu0 %v347_v35  ;;  %979 = vmatmul.mubr.bf16.vlgmr.msra.gmra.mrb[0].mxu1 %v347_v35  ;;  %v308_v35 = vld [vmem:[%s4076_s26 + $0xc8] sm:$0xff]  ;;  %v334_v15 = vld [vmem:[%s4076_s26 + $0x198] sm:$0xff] }
  0x30   : > { %1947 = vmatpush1.bf16.msra.mxu0 %v3690_v36  ;;  %2236 = vmatpush1.bf16.msra.mxu1 %v3691_v37  ;;  %v359_v36 = vpack.c.bf16 %v308_v35, %v307_v34  ;;  %v309_v37 = vld [vmem:[%s4076_s26 + $0xd0] sm:$0xff] }
  0x31   : > { %635 = vmatprep.mubr.bf16.mxu0 %v3925_v2  ;;  %988 = vmatprep.mubr.bf16.mxu1 %v3925_v2 }
  0x32   : > { %1948 = vmatprep.subr.bf16.mxu0 %v3925_v2  ;;  %2237 = vmatprep.subr.bf16.mxu1 %v3925_v2 }
  0x34   : > { %1949 = vmatpush1.bf16.msra.mxu0 %v3692_v40  ;;  %2238 = vmatpush1.bf16.msra.mxu1 %v3693_v41  ;;  %v360_v40 = vpack.c.bf16 %v310_v38, %v309_v37  ;;  %v3719_v41 = vld [vmem:[%s5928_s3 + $0xf0] sm:$0xff]  }
  0x35   : > { %1950 = vmatprep.subr.bf16.mxu0 %v3925_v2  ;;  %2239 = vmatprep.subr.bf16.mxu1 %v3925_v2 }
  0x37   : > { %636 = vmatmul.mubr.bf16.gmra.mrb[4].mxu0 %v348_v42  ;;  %989 = vmatmul.mubr.bf16.gmra.mrb[4].mxu1 %v348_v42  ;;  %v311_v42 = vld [vmem:[%s4076_s26 + $0xe0] sm:$0xff] }
  0x38   : > { %645 = vmatprep.mubr.bf16.mxu0 %v3925_v2  ;;  %998 = vmatprep.mubr.bf16.mxu1 %v3925_v2 }
  0x39   : > { %1951 = vmatpush1.bf16.msra.mxu0 %v3694_v43  ;;  %2240 = vmatpush1.bf16.msra.mxu1 %v3695_v44  ;;  %v312_v43 = vld [vmem:[%s4076_s26 + $0xe8] sm:$0xff] }
  0x3a   : > { %1952 = vmatprep.subr.bf16.mxu0 %v3925_v2  ;;  %2241 = vmatprep.subr.bf16.mxu1 %v3925_v2  ;;  %v361_v44 = vpack.c.bf16 %v312_v43, %v311_v42 }
  0x3d   : > { %1953 = vmatpush1.bf16.msra.mxu0 %v3696_v47  ;;  %2242 = vmatpush1.bf16.msra.mxu1 %v3697_v48  ;;  %v3720_v47 = vld [vmem:[%s5928_s3 + $0x78] sm:$0xff]   ;;  %v362_v48 = vpack.c.bf16 %v314_v46, %v313_v45 }
  0x3e   : > { %1954 = vmatprep.subr.bf16.mxu0 %v3925_v2  ;;  %2243 = vmatprep.subr.bf16.mxu1 %v3925_v2 }
  0x3f   : > { %646 = vmatmul.mubr.bf16.gmra.mrb[8].mxu0 %v349_v49  ;;  %999 = vmatmul.mubr.bf16.gmra.mrb[8].mxu1 %v349_v49  ;;  %v3721_v49 = vld [vmem:[%s5928_s3 + $0xf8] sm:$0xff]  }
  0x40   : > { %655 = vmatprep.mubr.bf16.mxu0 %v3925_v2  ;;  %1008 = vmatprep.mubr.bf16.mxu1 %v3925_v2 }
  0x41   : > { %1955 = vmatpush1.bf16.msra.mxu0 %v3698_v50  ;;  %2244 = vmatpush1.bf16.msra.mxu1 %v3699_v51  ;;  %v315_v50 = vld [vmem:[%s4076_s26 + $0x100] sm:$0xff]  ;;  %v316_v51 = vld [vmem:[%s4076_s26 + $0x108] sm:$0xff] }
  0x42   : > { %1956 = vmatprep.subr.bf16.mxu0 %v3925_v2  ;;  %2245 = vmatprep.subr.bf16.mxu1 %v3925_v2  ;;  %v363_v52 = vpack.c.bf16 %v316_v51, %v315_v50 }
  0x45   : > { %1957 = vmatpush1.bf16.msra.mxu0 %v3700_v54  ;;  %2246 = vmatpush1.bf16.msra.mxu1 %v3701_v55  ;;  %v318_v54 = vld [vmem:[%s4076_s26 + $0x118] sm:$0xff] }
  0x46   : > { %1958 = vmatprep.subr.bf16.mxu0 %v3925_v2  ;;  %2247 = vmatprep.subr.bf16.mxu1 %v3925_v2  ;;  %v364_v55 = vpack.c.bf16 %v318_v54, %v317_v53 }
  0x47   : > { %656 = vmatmul.mubr.bf16.gmra.mrb[12].mxu0 %v350_v56  ;;  %1009 = vmatmul.mubr.bf16.gmra.mrb[12].mxu1 %v350_v56  ;;  %v319_v56 = vld [vmem:[%s4076_s26 + $0x120] sm:$0xff] }
  0x48   : > { %665 = vmatprep.mubr.bf16.mxu0 %v3925_v2  ;;  %1018 = vmatprep.mubr.bf16.mxu1 %v3925_v2 }
  0x49   : > { %1959 = vmatpush1.bf16.msra.mxu0 %v3702_v57  ;;  %2248 = vmatpush1.bf16.msra.mxu1 %v3703_v58  ;;  %v320_v57 = vld [vmem:[%s4076_s26 + $0x128] sm:$0xff] }
  0x4a   : > { %1960 = vmatprep.subr.bf16.mxu0 %v3925_v2  ;;  %2249 = vmatprep.subr.bf16.mxu1 %v3925_v2  ;;  %v365_v58 = vpack.c.bf16 %v320_v57, %v319_v56 }
  0x4d   : > { %1961 = vmatpush1.bf16.msra.mxu0 %v3704_v61  ;;  %2250 = vmatpush1.bf16.msra.mxu1 %v3705_v62  ;;  %v366_v61 = vpack.c.bf16 %v322_v60, %v321_v59  ;;  %v323_v62 = vld [vmem:[%s4076_s26 + $0x140] sm:$0xff]  ;;  %v340_v59 = vld [vmem:[%s4076_s26 + $0x1c8] sm:$0xff] }
  0x4e   : > { %1962 = vmatprep.subr.bf16.mxu0 %v3925_v2  ;;  %2251 = vmatprep.subr.bf16.mxu1 %v3925_v2 }
  0x4f   : > { %666 = vmatmul.mubr.bf16.gmra.mrb[16].mxu0 %v351_v63  ;;  %1019 = vmatmul.mubr.bf16.gmra.mrb[16].mxu1 %v351_v63  ;;  %v324_v63 = vld [vmem:[%s4076_s26 + $0x148] sm:$0xff] }
  0x50   : > { %675 = vmatprep.mubr.bf16.mxu0 %v3925_v2  ;;  %1028 = vmatprep.mubr.bf16.mxu1 %v3925_v2 }
  0x51   : > { %1963 = vmatpush1.bf16.msra.mxu0 %v3706_v0  ;;  %2252 = vmatpush1.bf16.msra.mxu1 %v3707_v1  ;;  %v367_v0 = vpack.c.bf16 %v324_v63, %v323_v62  ;;  %v325_v1 = vld [vmem:[%s4076_s26 + $0x150] sm:$0xff] }
  0x52   : > { %1964 = vmatprep.subr.bf16.mxu0 %v3925_v2  ;;  %2253 = vmatprep.subr.bf16.mxu1 %v3925_v2  ;;  %v368_v4 = vpack.c.bf16 %v326_v3, %v325_v1 }
  0x55   : > { %1965 = vmatpush1.bf16.msra.mxu0 %v3708_v5  ;;  %2254 = vmatpush1.bf16.msra.mxu1 %v3709_v6  ;;  %v327_v5 = vld [vmem:[%s4076_s26 + $0x160] sm:$0xff]  ;;  %v328_v6 = vld [vmem:[%s4076_s26 + $0x168] sm:$0xff] }
  0x56   : > { %1966 = vmatprep.subr.bf16.mxu0 %v3925_v2  ;;  %2255 = vmatprep.subr.bf16.mxu1 %v3925_v2 }
  0x57   : > { %676 = vmatmul.mubr.bf16.gmra.mrb[20].mxu0 %v352_v7  ;;  %1029 = vmatmul.mubr.bf16.gmra.mrb[20].mxu1 %v352_v7  ;;  %v369_v7 = vpack.c.bf16 %v328_v6, %v327_v5 }
  0x58   : > { %685 = vmatprep.mubr.bf16.mxu0 %v3925_v2  ;;  %1038 = vmatprep.mubr.bf16.mxu1 %v3925_v2 }
  0x59   : > { %1967 = vmatpush1.bf16.msra.mxu0 %v3710_v8  ;;  %2256 = vmatpush1.bf16.msra.mxu1 %v3711_v9  ;;  %v329_v8 = vld [vmem:[%s4076_s26 + $0x170] sm:$0xff]  ;;  %v330_v9 = vld [vmem:[%s4076_s26 + $0x178] sm:$0xff] }
  0x5a   : > { %1968 = vmatprep.subr.bf16.mxu0 %v3925_v2  ;;  %2257 = vmatprep.subr.bf16.mxu1 %v3925_v2  ;;  %v370_v10 = vpack.c.bf16 %v330_v9, %v329_v8 }
  0x5d   : > { %1969 = vmatpush1.bf16.msra.mxu0 %v3712_v13  ;;  %2258 = vmatpush1.bf16.msra.mxu1 %v3713_v14  ;;  %v333_v14 = vld [vmem:[%s4076_s26 + $0x190] sm:$0xff] }
  0x5e   : > { %1970 = vmatprep.subr.bf16.mxu0 %v3925_v2  ;;  %2259 = vmatprep.subr.bf16.mxu1 %v3925_v2  ;;  %v372_v16 = vpack.c.bf16 %v334_v15, %v333_v14 }
  0x5f   : > { %686 = vmatmul.mubr.bf16.gmra.mrb[24].mxu0 %v353_v12  ;;  %1039 = vmatmul.mubr.bf16.gmra.mrb[24].mxu1 %v353_v12  ;;  %v332_v12 = vld [vmem:[%s4076_s26 + $0x188] sm:$0xff] }
  0x60   : > { %695 = vmatprep.mubr.bf16.mxu0 %v3925_v2  ;;  %1048 = vmatprep.mubr.bf16.mxu1 %v3925_v2  ;;  %v371_v13 = vpack.c.bf16 %v332_v12, %v331_v11 }
  0x61   : > { %1971 = vmatpush1.bf16.msra.mxu0 %v3714_v21  ;;  %2260 = vmatpush1.bf16.msra.mxu1 %v3715_v22 }
  0x62   : > { %1972 = vmatprep.subr.bf16.mxu0 %v3925_v2  ;;  %2261 = vmatprep.subr.bf16.mxu1 %v3925_v2 }
  0x65   : > { %1973 = vmatpush1.bf16.msra.mxu0 %v3716_v29  ;;  %2262 = vmatpush1.bf16.msra.mxu1 %v3717_v33 }
  0x66   : > { %1974 = vmatprep.subr.bf16.mxu0 %v3925_v2  ;;  %2263 = vmatprep.subr.bf16.mxu1 %v3925_v2 }
  0x67   : > { %696 = vmatmul.mubr.bf16.gmra.mrb[28].mxu0 %v354_v17  ;;  %1049 = vmatmul.mubr.bf16.gmra.mrb[28].mxu1 %v354_v17  ;;  %v413_v17 = vlaneseq }
  0x68   : > { %705 = vmatprep.mubr.bf16.mxu0 %v3925_v2  ;;  %1058 = vmatprep.mubr.bf16.mxu1 %v3925_v2 }
  0x69   : > { %1975 = vmatpush1.bf16.msra.mxu0 %v3718_v39  ;;  %2264 = vmatpush1.bf16.msra.mxu1 %v3719_v41  ;;  %v414_v18 = vshrl.u32 %v413_v17, 7 }
  0x6a   : > { %1976 = vmatprep.subr.bf16.mxu0 %v3925_v2  ;;  %2265 = vmatprep.subr.bf16.mxu1 %v3925_v2 }
  0x6b   : > { %v415_v22 = vsub.s32 0, %v414_v18  ;;  %v423_v23 = vsub.s32 2, %v414_v18  ;;  %v427_v26 = vsub.s32 3, %v414_v18 }
  0x6d   : > { %1977 = vmatpush1.bf16.msra.mxu0 %v3720_v47  ;;  %2266 = vmatpush1.bf16.msra.mxu1 %v3721_v49  ;;  %v4321_v27 = vrot.slane %v411_v24, %v415_v22  ;;  %v4327_v30 = vrot.slane %v411_v24, %v427_v26  ;;  %v341_v26 = vld [vmem:[%s4076_s26 + $0x1d0] sm:$0xff] }
  0x6f   : > { %706 = vmatmul.mubr.bf16.gmra.mrb[32].mxu0 %v355_v20  ;;  %1059 = vmatmul.mubr.bf16.gmra.mrb[32].mxu1 %v355_v20  ;;  %v336_v20 = vld [vmem:[%s4076_s26 + $0x1a8] sm:$0xff] }
  0x70   : > { %715 = vmatprep.mubr.bf16.mxu0 %v3925_v2  ;;  %1068 = vmatprep.mubr.bf16.mxu1 %v3925_v2  ;;  %v373_v21 = vpack.c.bf16 %v336_v20, %v335_v19 }
  0x77   : > { %716 = vmatmul.mubr.bf16.gmra.mrb[36].mxu0 %v356_v25  ;;  %1069 = vmatmul.mubr.bf16.gmra.mrb[36].mxu1 %v356_v25  ;;  %v419_v25 = vsub.s32 1, %v414_v18 }
  0x78   : > { %725 = vmatprep.mubr.bf16.mxu0 %v3925_v2  ;;  %1078 = vmatprep.mubr.bf16.mxu1 %v3925_v2 }
  0x79   : > { %v4325_v29 = vrot.slane %v411_v24, %v419_v25 }
  0x7f   : > { %726 = vmatmul.mubr.bf16.gmra.mrb[40].mxu0 %v357_v28  ;;  %1079 = vmatmul.mubr.bf16.gmra.mrb[40].mxu1 %v357_v28  ;;  %v4323_v28 = vrot.slane %v411_v24, %v423_v23 }
  0x80   : > { %735 = vmatprep.mubr.bf16.mxu0 %v3925_v2  ;;  %1088 = vmatprep.mubr.bf16.mxu1 %v3925_v2 }
  0x87   : > { %736 = vmatmul.mubr.bf16.gmra.mrb[44].mxu0 %v358_v32  ;;  %1089 = vmatmul.mubr.bf16.gmra.mrb[44].mxu1 %v358_v32  ;;  %v338_v32 = vld [vmem:[%s4076_s26 + $0x1b8] sm:$0xff] }
  0x88   : > { %745 = vmatprep.mubr.bf16.mxu0 %v3925_v2  ;;  %1098 = vmatprep.mubr.bf16.mxu1 %v3925_v2  ;;  %v374_v39 = vpack.c.bf16 %v338_v32, %v337_v31  ;;  %v342_v31 = vld [vmem:[%s4076_s26 + $0x1d8] sm:$0xff] }
  0x8f   : > { %746 = vmatmul.mubr.bf16.gmra.mrb[48].mxu0 %v359_v36  ;;  %1099 = vmatmul.mubr.bf16.gmra.mrb[48].mxu1 %v359_v36 }
  0x90   : > { %755 = vmatprep.mubr.bf16.mxu0 %v3925_v2  ;;  %1108 = vmatprep.mubr.bf16.mxu1 %v3925_v2 }
  0x97   : > { %756 = vmatmul.mubr.bf16.gmra.mrb[52].mxu0 %v360_v40  ;;  %1109 = vmatmul.mubr.bf16.gmra.mrb[52].mxu1 %v360_v40 }
  0x98   : > { %765 = vmatprep.mubr.bf16.mxu0 %v3925_v2  ;;  %1118 = vmatprep.mubr.bf16.mxu1 %v3925_v2 }
  0x9f   : > { %766 = vmatmul.mubr.bf16.gmra.mrb[56].mxu0 %v361_v44  ;;  %1119 = vmatmul.mubr.bf16.gmra.mrb[56].mxu1 %v361_v44 }
  0xa0   : > { %775 = vmatprep.mubr.bf16.mxu0 %v3925_v2  ;;  %1128 = vmatprep.mubr.bf16.mxu1 %v3925_v2 }
  0xa7   : > { %776 = vmatmul.mubr.bf16.gmra.mrb[60].mxu0 %v362_v48  ;;  %1129 = vmatmul.mubr.bf16.gmra.mrb[60].mxu1 %v362_v48 }
  0xa8   : > { %785 = vmatprep.mubr.bf16.mxu0 %v3925_v2  ;;  %1138 = vmatprep.mubr.bf16.mxu1 %v3925_v2 }
  0xaf   : > { %786 = vmatmul.mubr.bf16.gmra.mrb[64].mxu0 %v363_v52  ;;  %1139 = vmatmul.mubr.bf16.gmra.mrb[64].mxu1 %v363_v52 }
  0xb0   : > { %795 = vmatprep.mubr.bf16.mxu0 %v3925_v2  ;;  %1148 = vmatprep.mubr.bf16.mxu1 %v3925_v2 }
  0xb7   : > { %796 = vmatmul.mubr.bf16.gmra.mrb[68].mxu0 %v364_v55  ;;  %1149 = vmatmul.mubr.bf16.gmra.mrb[68].mxu1 %v364_v55 }
  0xb8   : > { %805 = vmatprep.mubr.bf16.mxu0 %v3925_v2  ;;  %1158 = vmatprep.mubr.bf16.mxu1 %v3925_v2 }
  0xbf   : > { %806 = vmatmul.mubr.bf16.gmra.mrb[72].mxu0 %v365_v58  ;;  %1159 = vmatmul.mubr.bf16.gmra.mrb[72].mxu1 %v365_v58  ;;  %v339_v58 = vld [vmem:[%s4076_s26 + $0x1c0] sm:$0xff] }
  0xc0   : > { %815 = vmatprep.mubr.bf16.mxu0 %v3925_v2  ;;  %1168 = vmatprep.mubr.bf16.mxu1 %v3925_v2 }
  0xc7   : > { %816 = vmatmul.mubr.bf16.gmra.mrb[76].mxu0 %v366_v61  ;;  %1169 = vmatmul.mubr.bf16.gmra.mrb[76].mxu1 %v366_v61 }
  0xc8   : > { %825 = vmatprep.mubr.bf16.mxu0 %v3925_v2  ;;  %1178 = vmatprep.mubr.bf16.mxu1 %v3925_v2 }
  0xcf   : > { %826 = vmatmul.mubr.bf16.gmra.mrb[80].mxu0 %v367_v0  ;;  %1179 = vmatmul.mubr.bf16.gmra.mrb[80].mxu1 %v367_v0 }
  0xd0   : > { %835 = vmatprep.mubr.bf16.mxu0 %v3925_v2  ;;  %1188 = vmatprep.mubr.bf16.mxu1 %v3925_v2 }
  0xd7   : > { %836 = vmatmul.mubr.bf16.gmra.mrb[84].mxu0 %v368_v4  ;;  %1189 = vmatmul.mubr.bf16.gmra.mrb[84].mxu1 %v368_v4 }
  0xd8   : > { %845 = vmatprep.mubr.bf16.mxu0 %v3925_v2  ;;  %1198 = vmatprep.mubr.bf16.mxu1 %v3925_v2 }
  0xdf   : > { %846 = vmatmul.mubr.bf16.gmra.mrb[88].mxu0 %v369_v7  ;;  %1199 = vmatmul.mubr.bf16.gmra.mrb[88].mxu1 %v369_v7  ;;  %v375_v7 = vpack.c.bf16 %v340_v59, %v339_v58 }
  0xe0   : > { %855 = vmatprep.mubr.bf16.mxu0 %v3925_v2  ;;  %1208 = vmatprep.mubr.bf16.mxu1 %v3925_v2 }
  0xe7   : > { %856 = vmatmul.mubr.bf16.gmra.mrb[92].mxu0 %v370_v10  ;;  %1209 = vmatmul.mubr.bf16.gmra.mrb[92].mxu1 %v370_v10 }
  0xe8   : > { %865 = vmatprep.mubr.bf16.mxu0 %v3925_v2  ;;  %1218 = vmatprep.mubr.bf16.mxu1 %v3925_v2 }
  0xef   : > { %866 = vmatmul.mubr.bf16.gmra.mrb[96].mxu0 %v371_v13  ;;  %1219 = vmatmul.mubr.bf16.gmra.mrb[96].mxu1 %v371_v13 }
  0xf0   : > { %875 = vmatprep.mubr.bf16.mxu0 %v3925_v2  ;;  %1228 = vmatprep.mubr.bf16.mxu1 %v3925_v2 }
  0xf7   : > { %876 = vmatmul.mubr.bf16.gmra.mrb[100].mxu0 %v372_v16  ;;  %1229 = vmatmul.mubr.bf16.gmra.mrb[100].mxu1 %v372_v16 }
  0xf8   : > { %885 = vmatprep.mubr.bf16.mxu0 %v3925_v2  ;;  %1238 = vmatprep.mubr.bf16.mxu1 %v3925_v2 }
  0xff   : > { %886 = vmatmul.mubr.bf16.gmra.mrb[104].mxu0 %v373_v21  ;;  %1239 = vmatmul.mubr.bf16.gmra.mrb[104].mxu1 %v373_v21 }
 0x100   : > { %895 = vmatprep.mubr.bf16.mxu0 %v3925_v2  ;;  %1248 = vmatprep.mubr.bf16.mxu1 %v3925_v2 }
 0x102   : > { %v627_v33 = vpop.f32.mrb[0].mxu0  ;;  %v980_v34 = vpop.f32.mrb[0].mxu1 }
 0x103   : > { %v628_v35 = vadd.f32 %v627_v33, %v4321_v27  ;;  %v981_v36 = vadd.f32 %v980_v34, %v4323_v28  ;;  %v629_v37 = vpop.f32.mrb[1].mxu0  ;;  %v982_v38 = vpop.f32.mrb[1].mxu1 }
 0x104   : > { %v630_v40 = vadd.f32 %v629_v37, %v4325_v29  ;;  %v983_v41 = vadd.f32 %v982_v38, %v4327_v30  ;;  %v631_v42 = vpop.f32.mrb[2].mxu0  ;;  %v984_v43 = vpop.f32.mrb[2].mxu1 }
 0x105   : > { %v1301_v44 = vmax.f32 %v981_v36, 0.0  ;;  %v632_v45 = vadd.f32 %v631_v42, %v4321_v27  ;;  %v985_v46 = vadd.f32 %v984_v43, %v4323_v28  ;;  %v633_v47 = vpop.f32.mrb[3].mxu0  ;;  %v986_v48 = vpop.f32.mrb[3].mxu1  ;;  %v1299_v52 = vmax.f32 %v628_v35, 0.0 }
 0x106   : > { %v1302_v49 = vmax.f32 %v983_v41, 0.0  ;;  %v634_v50 = vadd.f32 %v633_v47, %v4325_v29  ;;  %v987_v51 = vadd.f32 %v986_v48, %v4327_v30  ;;  %v1300_v55 = vmax.f32 %v630_v40, 0.0 }
 0x107   : > { %v1303_v53 = vmax.f32 %v632_v45, 0.0  ;;  %v1305_v54 = vmax.f32 %v985_v46, 0.0  ;;  %896 = vmatmul.mubr.bf16.gmra.mrb[108].mxu0 %v374_v39  ;;  %1249 = vmatmul.mubr.bf16.gmra.mrb[108].mxu1 %v374_v39  ;;  %v376_v42 = vpack.c.bf16 %v342_v31, %v341_v26 }
 0x108   : > { %v1304_v56 = vmax.f32 %v634_v50, 0.0  ;;  %v1306_v57 = vmax.f32 %v987_v51, 0.0  ;;  %905 = vmatprep.mubr.bf16.mxu0 %v3925_v2  ;;  %1258 = vmatprep.mubr.bf16.mxu1 %v3925_v2 }
 0x109   : > { %v4345_v60 = vpack.c.bf16 %v1303_v53, %v1299_v52  ;;  %v4347_v61 = vpack.c.bf16 %v1305_v54, %v1301_v44 }
 0x10a   : > { %v4349_v62 = vpack.c.bf16 %v1304_v56, %v1300_v55  ;;  %v4351_v63 = vpack.c.bf16 %v1306_v57, %v1302_v49  ;;  %v637_v0 = vpop.f32.mrb[4].mxu0  ;;  %v990_v1 = vpop.f32.mrb[4].mxu1 }
 0x10b   : > { %v638_v3 = vadd.f32 %v637_v0, %v4321_v27  ;;  %v991_v4 = vadd.f32 %v990_v1, %v4323_v28  ;;  %v639_v5 = vpop.f32.mrb[5].mxu0  ;;  %v992_v6 = vpop.f32.mrb[5].mxu1  ;;  %v343_v1 = vld [vmem:[%s4076_s26 + $0x1e0] sm:$0xff] }
 0x10c   : > { %v640_v8 = vadd.f32 %v639_v5, %v4325_v29  ;;  %v993_v9 = vadd.f32 %v992_v6, %v4327_v30  ;;  %v641_v10 = vpop.f32.mrb[6].mxu0  ;;  %v994_v11 = vpop.f32.mrb[6].mxu1 }
 0x10d   : > { %v1309_v12 = vmax.f32 %v991_v4, 0.0  ;;  %v642_v13 = vadd.f32 %v641_v10, %v4321_v27  ;;  %v995_v14 = vadd.f32 %v994_v11, %v4323_v28  ;;  %v643_v15 = vpop.f32.mrb[7].mxu0  ;;  %v996_v16 = vpop.f32.mrb[7].mxu1  ;;  %v1307_v20 = vmax.f32 %v638_v3, 0.0  ;;  %v344_v3 = vld [vmem:[%s4076_s26 + $0x1e8] sm:$0xff] }
 0x10e   : > { %v1310_v17 = vmax.f32 %v993_v9, 0.0  ;;  %v644_v18 = vadd.f32 %v643_v15, %v4325_v29  ;;  %v997_v19 = vadd.f32 %v996_v16, %v4327_v30  ;;  %v1308_v23 = vmax.f32 %v640_v8, 0.0 }
 0x10f   : > { %v1311_v21 = vmax.f32 %v642_v13, 0.0  ;;  %v1313_v22 = vmax.f32 %v995_v14, 0.0  ;;  %906 = vmatmul.mubr.bf16.gmra.mrb[112].mxu0 %v375_v7  ;;  %1259 = vmatmul.mubr.bf16.gmra.mrb[112].mxu1 %v375_v7  ;;  %v377_v14 = vpack.c.bf16 %v344_v3, %v343_v1 }
 0x110   : > { %v1312_v24 = vmax.f32 %v644_v18, 0.0  ;;  %v1314_v25 = vmax.f32 %v997_v19, 0.0  ;;  %915 = vmatprep.mubr.bf16.mxu0 %v3925_v2  ;;  %1268 = vmatprep.mubr.bf16.mxu1 %v3925_v2 }
 0x111   : > { %v4365_v32 = vpack.c.bf16 %v1311_v21, %v1307_v20  ;;  %v4367_v33 = vpack.c.bf16 %v1313_v22, %v1309_v12 }
 0x112   : > { %v4369_v34 = vpack.c.bf16 %v1312_v24, %v1308_v23  ;;  %v4371_v35 = vpack.c.bf16 %v1314_v25, %v1310_v17  ;;  %v647_v36 = vpop.f32.mrb[8].mxu0  ;;  %v1000_v37 = vpop.f32.mrb[8].mxu1 }
 0x113   : > { %v648_v38 = vadd.f32 %v647_v36, %v4321_v27  ;;  %v1001_v39 = vadd.f32 %v1000_v37, %v4323_v28  ;;  %v649_v40 = vpop.f32.mrb[9].mxu0  ;;  %v1002_v41 = vpop.f32.mrb[9].mxu1 }
 0x114   : > { %v650_v43 = vadd.f32 %v649_v40, %v4325_v29  ;;  %v1003_v44 = vadd.f32 %v1002_v41, %v4327_v30  ;;  %v651_v45 = vpop.f32.mrb[10].mxu0  ;;  %v1004_v46 = vpop.f32.mrb[10].mxu1  ;;  %v345_v41 = vld [vmem:[%s4076_s26 + $0x1f0] sm:$0xff] }
 0x115   : > { %v1317_v47 = vmax.f32 %v1001_v39, 0.0  ;;  %v652_v48 = vadd.f32 %v651_v45, %v4321_v27  ;;  %v1005_v49 = vadd.f32 %v1004_v46, %v4323_v28  ;;  %v653_v50 = vpop.f32.mrb[11].mxu0  ;;  %v1006_v51 = vpop.f32.mrb[11].mxu1  ;;  %v1315_v55 = vmax.f32 %v648_v38, 0.0 }
 0x116   : > { %v1318_v52 = vmax.f32 %v1003_v44, 0.0  ;;  %v654_v53 = vadd.f32 %v653_v50, %v4325_v29  ;;  %v1007_v54 = vadd.f32 %v1006_v51, %v4327_v30  ;;  %v1316_v58 = vmax.f32 %v650_v43, 0.0 }
 0x117   : > { %v1319_v56 = vmax.f32 %v652_v48, 0.0  ;;  %v1321_v57 = vmax.f32 %v1005_v49, 0.0  ;;  %916 = vmatmul.mubr.bf16.gmra.mrb[116].mxu0 %v376_v42  ;;  %1269 = vmatmul.mubr.bf16.gmra.mrb[116].mxu1 %v376_v42  ;;  %v346_v42 = vld [vmem:[%s4076_s26 + $0x1f8] sm:$0xff] }
 0x118   : > { %v1320_v59 = vmax.f32 %v654_v53, 0.0  ;;  %v1322_v0 = vmax.f32 %v1007_v54, 0.0  ;;  %925 = vmatprep.mubr.bf16.mxu0 %v3925_v2  ;;  %1278 = vmatprep.mubr.bf16.mxu1 %v3925_v2  ;;  %v378_v53 = vpack.c.bf16 %v346_v42, %v345_v41 }
 0x119   : > { %v4385_v4 = vpack.c.bf16 %v1319_v56, %v1315_v55  ;;  %v4387_v5 = vpack.c.bf16 %v1321_v57, %v1317_v47 }
 0x11a   : > { %v4389_v6 = vpack.c.bf16 %v1320_v59, %v1316_v58  ;;  %v4391_v7 = vpack.c.bf16 %v1322_v0, %v1318_v52  ;;  %v657_v8 = vpop.f32.mrb[12].mxu0  ;;  %v1010_v9 = vpop.f32.mrb[12].mxu1 }
 0x11b   : > { %v658_v10 = vadd.f32 %v657_v8, %v4321_v27  ;;  %v1011_v11 = vadd.f32 %v1010_v9, %v4323_v28  ;;  %v659_v12 = vpop.f32.mrb[13].mxu0  ;;  %v1012_v13 = vpop.f32.mrb[13].mxu1 }
 0x11c   : > { %v660_v15 = vadd.f32 %v659_v12, %v4325_v29  ;;  %v1013_v16 = vadd.f32 %v1012_v13, %v4327_v30  ;;  %v661_v17 = vpop.f32.mrb[14].mxu0  ;;  %v1014_v18 = vpop.f32.mrb[14].mxu1 }
 0x11d   : > { %v1325_v19 = vmax.f32 %v1011_v11, 0.0  ;;  %v662_v20 = vadd.f32 %v661_v17, %v4321_v27  ;;  %v1015_v21 = vadd.f32 %v1014_v18, %v4323_v28  ;;  %v663_v22 = vpop.f32.mrb[15].mxu0  ;;  %v1016_v23 = vpop.f32.mrb[15].mxu1  ;;  %v1323_v31 = vmax.f32 %v658_v10, 0.0 }
 0x11e   : > { %v1326_v24 = vmax.f32 %v1013_v16, 0.0  ;;  %v664_v25 = vadd.f32 %v663_v22, %v4325_v29  ;;  %v1017_v26 = vadd.f32 %v1016_v23, %v4327_v30  ;;  %v1324_v38 = vmax.f32 %v660_v15, 0.0 }
 0x11f   : > { %v1327_v36 = vmax.f32 %v662_v20, 0.0  ;;  %v1329_v37 = vmax.f32 %v1015_v21, 0.0  ;;  %926 = vmatmul.mubr.bf16.gmra.mrb[120].mxu0 %v377_v14  ;;  %1279 = vmatmul.mubr.bf16.gmra.mrb[120].mxu1 %v377_v14 }
 0x120   : > { %v1328_v39 = vmax.f32 %v664_v25, 0.0  ;;  %v1330_v40 = vmax.f32 %v1017_v26, 0.0  ;;  %935 = vmatprep.mubr.bf16.mxu0 %v3925_v2  ;;  %1288 = vmatprep.mubr.bf16.mxu1 %v3925_v2 }
 0x121   : > { %v4405_v43 = vpack.c.bf16 %v1327_v36, %v1323_v31  ;;  %v4407_v44 = vpack.c.bf16 %v1329_v37, %v1325_v19 }
 0x122   : > { %v4409_v45 = vpack.c.bf16 %v1328_v39, %v1324_v38  ;;  %v4411_v46 = vpack.c.bf16 %v1330_v40, %v1326_v24  ;;  %v667_v47 = vpop.f32.mrb[16].mxu0  ;;  %v1020_v48 = vpop.f32.mrb[16].mxu1 }
 0x123   : > { %v668_v49 = vadd.f32 %v667_v47, %v4321_v27  ;;  %v1021_v50 = vadd.f32 %v1020_v48, %v4323_v28  ;;  %v669_v51 = vpop.f32.mrb[17].mxu0  ;;  %v1022_v52 = vpop.f32.mrb[17].mxu1 }
 0x124   : > { %v670_v2 = vadd.f32 %v669_v51, %v4325_v29  ;;  %v1023_v54 = vadd.f32 %v1022_v52, %v4327_v30  ;;  %v671_v55 = vpop.f32.mrb[18].mxu0  ;;  %v1024_v56 = vpop.f32.mrb[18].mxu1 }
 0x125   : > { %v1333_v57 = vmax.f32 %v1021_v50, 0.0  ;;  %v672_v58 = vadd.f32 %v671_v55, %v4321_v27  ;;  %v1025_v59 = vadd.f32 %v1024_v56, %v4323_v28  ;;  %v673_v0 = vpop.f32.mrb[19].mxu0  ;;  %v1026_v1 = vpop.f32.mrb[19].mxu1  ;;  %v1331_v10 = vmax.f32 %v668_v49, 0.0 }
 0x126   : > { %v1334_v3 = vmax.f32 %v1023_v54, 0.0  ;;  %v674_v8 = vadd.f32 %v673_v0, %v4325_v29  ;;  %v1027_v9 = vadd.f32 %v1026_v1, %v4327_v30  ;;  %v1332_v13 = vmax.f32 %v670_v2, 0.0 }
 0x127   : > { %v1335_v11 = vmax.f32 %v672_v58, 0.0  ;;  %v1337_v12 = vmax.f32 %v1025_v59, 0.0  ;;  %936 = vmatmul.mubr.bf16.gmra.mrb[124].mxu0 %v378_v53  ;;  %1289 = vmatmul.mubr.bf16.gmra.mrb[124].mxu1 %v378_v53 }
 0x128   : > { %v1336_v14 = vmax.f32 %v674_v8, 0.0  ;;  %v1338_v15 = vmax.f32 %v1027_v9, 0.0  ;;  %1978 = vmatprep.mubr.bf16.mxu0 %v4349_v62  ;;  %2267 = vmatprep.mubr.bf16.mxu1 %v4351_v63 }
 0x129   : > { %v4423_v16 = vpack.c.bf16 %v1335_v11, %v1331_v10  ;;  %v4425_v17 = vpack.c.bf16 %v1337_v12, %v1333_v57 }
 0x12a   : > { %v4427_v18 = vpack.c.bf16 %v1336_v14, %v1332_v13  ;;  %v4429_v19 = vpack.c.bf16 %v1338_v15, %v1334_v3  ;;  %v677_v20 = vpop.f32.mrb[20].mxu0  ;;  %v1030_v21 = vpop.f32.mrb[20].mxu1 }
 0x12b   : > { %v678_v22 = vadd.f32 %v677_v20, %v4321_v27  ;;  %v1031_v23 = vadd.f32 %v1030_v21, %v4323_v28  ;;  %v679_v24 = vpop.f32.mrb[21].mxu0  ;;  %v1032_v25 = vpop.f32.mrb[21].mxu1 }
 0x12c   : > { %v680_v62 = vadd.f32 %v679_v24, %v4325_v29  ;;  %v1033_v63 = vadd.f32 %v1032_v25, %v4327_v30  ;;  %v681_v26 = vpop.f32.mrb[22].mxu0  ;;  %v1034_v31 = vpop.f32.mrb[22].mxu1 }
 0x12d   : > { %v1341_v36 = vmax.f32 %v1031_v23, 0.0  ;;  %v682_v37 = vadd.f32 %v681_v26, %v4321_v27  ;;  %v1035_v38 = vadd.f32 %v1034_v31, %v4323_v28  ;;  %v683_v39 = vpop.f32.mrb[23].mxu0  ;;  %v1036_v40 = vpop.f32.mrb[23].mxu1  ;;  %v1339_v48 = vmax.f32 %v678_v22, 0.0 }
 0x12e   : > { %v1342_v41 = vmax.f32 %v1033_v63, 0.0  ;;  %v684_v42 = vadd.f32 %v683_v39, %v4325_v29  ;;  %v1037_v47 = vadd.f32 %v1036_v40, %v4327_v30  ;;  %v1340_v51 = vmax.f32 %v680_v62, 0.0 }
 0x12f   : > { %v1343_v49 = vmax.f32 %v682_v37, 0.0  ;;  %v1345_v50 = vmax.f32 %v1035_v38, 0.0  ;;  %1979 = vmatmul.mubr.bf16.vlgmr.msra.gmra.mrb[128].mxu0 %v4345_v60  ;;  %2268 = vmatmul.mubr.bf16.vlgmr.msra.gmra.mrb[128].mxu1 %v4347_v61 }
 0x130   : > { %v1344_v52 = vmax.f32 %v684_v42, 0.0  ;;  %v1346_v53 = vmax.f32 %v1037_v47, 0.0  ;;  %1986 = vmatprep.mubr.bf16.mxu0 %v4369_v34  ;;  %2275 = vmatprep.mubr.bf16.mxu1 %v4371_v35 }
 0x131   : > { %v4443_v2 = vpack.c.bf16 %v1343_v49, %v1339_v48  ;;  %v4445_v54 = vpack.c.bf16 %v1345_v50, %v1341_v36 }
 0x132   : > { %v4447_v55 = vpack.c.bf16 %v1344_v52, %v1340_v51  ;;  %v4449_v56 = vpack.c.bf16 %v1346_v53, %v1342_v41  ;;  %v687_v57 = vpop.f32.mrb[24].mxu0  ;;  %v1040_v58 = vpop.f32.mrb[24].mxu1 }
 0x133   : > { %v688_v60 = vadd.f32 %v687_v57, %v4321_v27  ;;  %v1041_v61 = vadd.f32 %v1040_v58, %v4323_v28  ;;  %v689_v59 = vpop.f32.mrb[25].mxu0  ;;  %v1042_v0 = vpop.f32.mrb[25].mxu1 }
 0x134   : > { %v690_v34 = vadd.f32 %v689_v59, %v4325_v29  ;;  %v1043_v35 = vadd.f32 %v1042_v0, %v4327_v30  ;;  %v691_v1 = vpop.f32.mrb[26].mxu0  ;;  %v1044_v3 = vpop.f32.mrb[26].mxu1 }
 0x135   : > { %v1349_v8 = vmax.f32 %v1041_v61, 0.0  ;;  %v692_v9 = vadd.f32 %v691_v1, %v4321_v27  ;;  %v1045_v10 = vadd.f32 %v1044_v3, %v4323_v28  ;;  %v693_v11 = vpop.f32.mrb[27].mxu0  ;;  %v1046_v12 = vpop.f32.mrb[27].mxu1  ;;  %v1347_v20 = vmax.f32 %v688_v60, 0.0 }
 0x136   : > { %v1350_v13 = vmax.f32 %v1043_v35, 0.0  ;;  %v694_v14 = vadd.f32 %v693_v11, %v4325_v29  ;;  %v1047_v15 = vadd.f32 %v1046_v12, %v4327_v30  ;;  %v1348_v23 = vmax.f32 %v690_v34, 0.0 }
 0x137   : > { %v1351_v21 = vmax.f32 %v692_v9, 0.0  ;;  %v1353_v22 = vmax.f32 %v1045_v10, 0.0  ;;  %1987 = vmatmul.mubr.bf16.gmra.mrb[132].mxu0 %v4365_v32  ;;  %2276 = vmatmul.mubr.bf16.gmra.mrb[132].mxu1 %v4367_v33 }
 0x138   : > { %v1352_v24 = vmax.f32 %v694_v14, 0.0  ;;  %v1354_v25 = vmax.f32 %v1047_v15, 0.0  ;;  %1994 = vmatprep.mubr.bf16.mxu0 %v4389_v6  ;;  %2283 = vmatprep.mubr.bf16.mxu1 %v4391_v7 }
 0x139   : > { %v4463_v62 = vpack.c.bf16 %v1351_v21, %v1347_v20  ;;  %v4465_v63 = vpack.c.bf16 %v1353_v22, %v1349_v8 }
 0x13a   : > { %v4467_v26 = vpack.c.bf16 %v1352_v24, %v1348_v23  ;;  %v4469_v31 = vpack.c.bf16 %v1354_v25, %v1350_v13  ;;  %v697_v36 = vpop.f32.mrb[28].mxu0  ;;  %v1050_v37 = vpop.f32.mrb[28].mxu1 }
 0x13b   : > { %v698_v32 = vadd.f32 %v697_v36, %v4321_v27  ;;  %v1051_v33 = vadd.f32 %v1050_v37, %v4323_v28  ;;  %v699_v38 = vpop.f32.mrb[29].mxu0  ;;  %v1052_v39 = vpop.f32.mrb[29].mxu1 }
 0x13c   : > { %v700_v6 = vadd.f32 %v699_v38, %v4325_v29  ;;  %v1053_v7 = vadd.f32 %v1052_v39, %v4327_v30  ;;  %v701_v40 = vpop.f32.mrb[30].mxu0  ;;  %v1054_v41 = vpop.f32.mrb[30].mxu1 }
 0x13d   : > { %v1357_v42 = vmax.f32 %v1051_v33, 0.0  ;;  %v702_v47 = vadd.f32 %v701_v40, %v4321_v27  ;;  %v1055_v48 = vadd.f32 %v1054_v41, %v4323_v28  ;;  %v703_v49 = vpop.f32.mrb[31].mxu0  ;;  %v1056_v50 = vpop.f32.mrb[31].mxu1  ;;  %v1355_v57 = vmax.f32 %v698_v32, 0.0 }
 0x13e   : > { %v1358_v51 = vmax.f32 %v1053_v7, 0.0  ;;  %v704_v52 = vadd.f32 %v703_v49, %v4325_v29  ;;  %v1057_v53 = vadd.f32 %v1056_v50, %v4327_v30  ;;  %v1356_v61 = vmax.f32 %v700_v6, 0.0 }
 0x13f   : > { %v1359_v58 = vmax.f32 %v702_v47, 0.0  ;;  %v1361_v60 = vmax.f32 %v1055_v48, 0.0  ;;  %1995 = vmatmul.mubr.bf16.gmra.mrb[136].mxu0 %v4385_v4  ;;  %2284 = vmatmul.mubr.bf16.gmra.mrb[136].mxu1 %v4387_v5 }
 0x140   : > { %v1360_v59 = vmax.f32 %v704_v52, 0.0  ;;  %v1362_v0 = vmax.f32 %v1057_v53, 0.0  ;;  %2002 = vmatprep.mubr.bf16.mxu0 %v4409_v45  ;;  %2291 = vmatprep.mubr.bf16.mxu1 %v4411_v46 }
 0x141   : > { %v4483_v34 = vpack.c.bf16 %v1359_v58, %v1355_v57  ;;  %v4485_v35 = vpack.c.bf16 %v1361_v60, %v1357_v42 }
 0x142   : > { %v4487_v1 = vpack.c.bf16 %v1360_v59, %v1356_v61  ;;  %v4489_v3 = vpack.c.bf16 %v1362_v0, %v1358_v51  ;;  %v707_v8 = vpop.f32.mrb[32].mxu0  ;;  %v1060_v9 = vpop.f32.mrb[32].mxu1 }
 0x143   : > { %v708_v4 = vadd.f32 %v707_v8, %v4321_v27  ;;  %v1061_v5 = vadd.f32 %v1060_v9, %v4323_v28  ;;  %v709_v10 = vpop.f32.mrb[33].mxu0  ;;  %v1062_v11 = vpop.f32.mrb[33].mxu1 }
 0x144   : > { %v710_v45 = vadd.f32 %v709_v10, %v4325_v29  ;;  %v1063_v46 = vadd.f32 %v1062_v11, %v4327_v30  ;;  %v711_v12 = vpop.f32.mrb[34].mxu0  ;;  %v1064_v13 = vpop.f32.mrb[34].mxu1 }
 0x145   : > { %v1365_v14 = vmax.f32 %v1061_v5, 0.0  ;;  %v712_v15 = vadd.f32 %v711_v12, %v4321_v27  ;;  %v1065_v20 = vadd.f32 %v1064_v13, %v4323_v28  ;;  %v713_v21 = vpop.f32.mrb[35].mxu0  ;;  %v1066_v22 = vpop.f32.mrb[35].mxu1  ;;  %v1363_v36 = vmax.f32 %v708_v4, 0.0 }
 0x146   : > { %v1366_v23 = vmax.f32 %v1063_v46, 0.0  ;;  %v714_v24 = vadd.f32 %v713_v21, %v4325_v29  ;;  %v1067_v25 = vadd.f32 %v1066_v22, %v4327_v30  ;;  %v1364_v33 = vmax.f32 %v710_v45, 0.0 }
 0x147   : > { %v1367_v37 = vmax.f32 %v712_v15, 0.0  ;;  %v1369_v32 = vmax.f32 %v1065_v20, 0.0  ;;  %2003 = vmatmul.mubr.bf16.gmra.mrb[140].mxu0 %v4405_v43  ;;  %2292 = vmatmul.mubr.bf16.gmra.mrb[140].mxu1 %v4407_v44 }
 0x148   : > { %v1368_v38 = vmax.f32 %v714_v24, 0.0  ;;  %v1370_v39 = vmax.f32 %v1067_v25, 0.0  ;;  %2010 = vmatprep.mubr.bf16.mxu0 %v4427_v18  ;;  %2299 = vmatprep.mubr.bf16.mxu1 %v4429_v19 }
 0x149   : > { %v4503_v6 = vpack.c.bf16 %v1367_v37, %v1363_v36  ;;  %v4505_v7 = vpack.c.bf16 %v1369_v32, %v1365_v14 }
 0x14a   : > { %v4507_v40 = vpack.c.bf16 %v1368_v38, %v1364_v33  ;;  %v4509_v41 = vpack.c.bf16 %v1370_v39, %v1366_v23  ;;  %v717_v42 = vpop.f32.mrb[36].mxu0  ;;  %v1070_v47 = vpop.f32.mrb[36].mxu1 }
 0x14b   : > { %v718_v43 = vadd.f32 %v717_v42, %v4321_v27  ;;  %v1071_v44 = vadd.f32 %v1070_v47, %v4323_v28  ;;  %v719_v48 = vpop.f32.mrb[37].mxu0  ;;  %v1072_v49 = vpop.f32.mrb[37].mxu1 }
 0x14c   : > { %v720_v18 = vadd.f32 %v719_v48, %v4325_v29  ;;  %v1073_v19 = vadd.f32 %v1072_v49, %v4327_v30  ;;  %v721_v50 = vpop.f32.mrb[38].mxu0  ;;  %v1074_v51 = vpop.f32.mrb[38].mxu1 }
 0x14d   : > { %v1373_v52 = vmax.f32 %v1071_v44, 0.0  ;;  %v722_v53 = vadd.f32 %v721_v50, %v4321_v27  ;;  %v1075_v57 = vadd.f32 %v1074_v51, %v4323_v28  ;;  %v723_v58 = vpop.f32.mrb[39].mxu0  ;;  %v1076_v60 = vpop.f32.mrb[39].mxu1  ;;  %v1371_v8 = vmax.f32 %v718_v43, 0.0 }
 0x14e   : > { %v1374_v61 = vmax.f32 %v1073_v19, 0.0  ;;  %v724_v59 = vadd.f32 %v723_v58, %v4325_v29  ;;  %v1077_v0 = vadd.f32 %v1076_v60, %v4327_v30  ;;  %v1372_v5 = vmax.f32 %v720_v18, 0.0 }
 0x14f   : > { %v1375_v9 = vmax.f32 %v722_v53, 0.0  ;;  %v1377_v4 = vmax.f32 %v1075_v57, 0.0  ;;  %2011 = vmatmul.mubr.bf16.gmra.mrb[144].mxu0 %v4423_v16  ;;  %2300 = vmatmul.mubr.bf16.gmra.mrb[144].mxu1 %v4425_v17 }
 0x150   : > { %v1376_v10 = vmax.f32 %v724_v59, 0.0  ;;  %v1378_v11 = vmax.f32 %v1077_v0, 0.0  ;;  %2018 = vmatprep.mubr.bf16.mxu0 %v4447_v55  ;;  %2307 = vmatprep.mubr.bf16.mxu1 %v4449_v56 }
 0x151   : > { %v4523_v45 = vpack.c.bf16 %v1375_v9, %v1371_v8  ;;  %v4525_v46 = vpack.c.bf16 %v1377_v4, %v1373_v52 }
 0x152   : > { %v4527_v12 = vpack.c.bf16 %v1376_v10, %v1372_v5  ;;  %v4529_v13 = vpack.c.bf16 %v1378_v11, %v1374_v61  ;;  %v727_v14 = vpop.f32.mrb[40].mxu0  ;;  %v1080_v15 = vpop.f32.mrb[40].mxu1 }
 0x153   : > { %v728_v16 = vadd.f32 %v727_v14, %v4321_v27  ;;  %v1081_v17 = vadd.f32 %v1080_v15, %v4323_v28  ;;  %v729_v20 = vpop.f32.mrb[41].mxu0  ;;  %v1082_v21 = vpop.f32.mrb[41].mxu1 }
 0x154   : > { %v730_v55 = vadd.f32 %v729_v20, %v4325_v29  ;;  %v1083_v56 = vadd.f32 %v1082_v21, %v4327_v30  ;;  %v731_v22 = vpop.f32.mrb[42].mxu0  ;;  %v1084_v23 = vpop.f32.mrb[42].mxu1 }
 0x155   : > { %v1381_v24 = vmax.f32 %v1081_v17, 0.0  ;;  %v732_v25 = vadd.f32 %v731_v22, %v4321_v27  ;;  %v1085_v36 = vadd.f32 %v1084_v23, %v4323_v28  ;;  %v733_v37 = vpop.f32.mrb[43].mxu0  ;;  %v1086_v32 = vpop.f32.mrb[43].mxu1  ;;  %v1379_v42 = vmax.f32 %v728_v16, 0.0 }
 0x156   : > { %v1382_v33 = vmax.f32 %v1083_v56, 0.0  ;;  %v734_v38 = vadd.f32 %v733_v37, %v4325_v29  ;;  %v1087_v39 = vadd.f32 %v1086_v32, %v4327_v30  ;;  %v1380_v44 = vmax.f32 %v730_v55, 0.0 }
 0x157   : > { %v1383_v47 = vmax.f32 %v732_v25, 0.0  ;;  %v1385_v43 = vmax.f32 %v1085_v36, 0.0  ;;  %2019 = vmatmul.mubr.bf16.gmra.mrb[148].mxu0 %v4443_v2  ;;  %2308 = vmatmul.mubr.bf16.gmra.mrb[148].mxu1 %v4445_v54 }
 0x158   : > { %v1384_v48 = vmax.f32 %v734_v38, 0.0  ;;  %v1386_v49 = vmax.f32 %v1087_v39, 0.0  ;;  %2026 = vmatprep.mubr.bf16.mxu0 %v4467_v26  ;;  %2315 = vmatprep.mubr.bf16.mxu1 %v4469_v31 }
 0x159   : > { %v4543_v18 = vpack.c.bf16 %v1383_v47, %v1379_v42  ;;  %v4545_v19 = vpack.c.bf16 %v1385_v43, %v1381_v24 }
 0x15a   : > { %v4547_v50 = vpack.c.bf16 %v1384_v48, %v1380_v44  ;;  %v4549_v51 = vpack.c.bf16 %v1386_v49, %v1382_v33  ;;  %v737_v52 = vpop.f32.mrb[44].mxu0  ;;  %v1090_v53 = vpop.f32.mrb[44].mxu1 }
 0x15b   : > { %v738_v2 = vadd.f32 %v737_v52, %v4321_v27  ;;  %v1091_v54 = vadd.f32 %v1090_v53, %v4323_v28  ;;  %v739_v57 = vpop.f32.mrb[45].mxu0  ;;  %v1092_v58 = vpop.f32.mrb[45].mxu1 }
 0x15c   : > { %v740_v26 = vadd.f32 %v739_v57, %v4325_v29  ;;  %v1093_v31 = vadd.f32 %v1092_v58, %v4327_v30  ;;  %v741_v60 = vpop.f32.mrb[46].mxu0  ;;  %v1094_v61 = vpop.f32.mrb[46].mxu1 }
 0x15d   : > { %v1389_v59 = vmax.f32 %v1091_v54, 0.0  ;;  %v742_v0 = vadd.f32 %v741_v60, %v4321_v27  ;;  %v1095_v8 = vadd.f32 %v1094_v61, %v4323_v28  ;;  %v743_v9 = vpop.f32.mrb[47].mxu0  ;;  %v1096_v4 = vpop.f32.mrb[47].mxu1  ;;  %v1387_v14 = vmax.f32 %v738_v2, 0.0 }
 0x15e   : > { %v1390_v5 = vmax.f32 %v1093_v31, 0.0  ;;  %v744_v10 = vadd.f32 %v743_v9, %v4325_v29  ;;  %v1097_v11 = vadd.f32 %v1096_v4, %v4327_v30  ;;  %v1388_v17 = vmax.f32 %v740_v26, 0.0 }
 0x15f   : > { %v1391_v15 = vmax.f32 %v742_v0, 0.0  ;;  %v1393_v16 = vmax.f32 %v1095_v8, 0.0  ;;  %2027 = vmatmul.mubr.bf16.gmra.mrb[152].mxu0 %v4463_v62  ;;  %2316 = vmatmul.mubr.bf16.gmra.mrb[152].mxu1 %v4465_v63 }
 0x160   : > { %v1392_v20 = vmax.f32 %v744_v10, 0.0  ;;  %v1394_v21 = vmax.f32 %v1097_v11, 0.0  ;;  %2034 = vmatprep.mubr.bf16.mxu0 %v4487_v1  ;;  %2323 = vmatprep.mubr.bf16.mxu1 %v4489_v3 }
 0x161   : > { %v4563_v55 = vpack.c.bf16 %v1391_v15, %v1387_v14  ;;  %v4565_v56 = vpack.c.bf16 %v1393_v16, %v1389_v59 }
 0x162   : > { %v4567_v22 = vpack.c.bf16 %v1392_v20, %v1388_v17  ;;  %v4569_v23 = vpack.c.bf16 %v1394_v21, %v1390_v5  ;;  %v747_v24 = vpop.f32.mrb[48].mxu0  ;;  %v1100_v25 = vpop.f32.mrb[48].mxu1 }
 0x163   : > { %v748_v62 = vadd.f32 %v747_v24, %v4321_v27  ;;  %v1101_v63 = vadd.f32 %v1100_v25, %v4323_v28  ;;  %v749_v36 = vpop.f32.mrb[49].mxu0  ;;  %v1102_v37 = vpop.f32.mrb[49].mxu1 }
 0x164   : > { %v750_v1 = vadd.f32 %v749_v36, %v4325_v29  ;;  %v1103_v3 = vadd.f32 %v1102_v37, %v4327_v30  ;;  %v751_v32 = vpop.f32.mrb[50].mxu0  ;;  %v1104_v33 = vpop.f32.mrb[50].mxu1 }
 0x165   : > { %v1397_v38 = vmax.f32 %v1101_v63, 0.0  ;;  %v752_v39 = vadd.f32 %v751_v32, %v4321_v27  ;;  %v1105_v42 = vadd.f32 %v1104_v33, %v4323_v28  ;;  %v753_v47 = vpop.f32.mrb[51].mxu0  ;;  %v1106_v43 = vpop.f32.mrb[51].mxu1  ;;  %v1395_v52 = vmax.f32 %v748_v62, 0.0 }
 0x166   : > { %v1398_v44 = vmax.f32 %v1103_v3, 0.0  ;;  %v754_v48 = vadd.f32 %v753_v47, %v4325_v29  ;;  %v1107_v49 = vadd.f32 %v1106_v43, %v4327_v30  ;;  %v1396_v54 = vmax.f32 %v750_v1, 0.0 }
 0x167   : > { %v1399_v53 = vmax.f32 %v752_v39, 0.0  ;;  %v1401_v2 = vmax.f32 %v1105_v42, 0.0  ;;  %2035 = vmatmul.mubr.bf16.gmra.mrb[156].mxu0 %v4483_v34  ;;  %2324 = vmatmul.mubr.bf16.gmra.mrb[156].mxu1 %v4485_v35 }
 0x168   : > { %v1400_v57 = vmax.f32 %v754_v48, 0.0  ;;  %v1402_v58 = vmax.f32 %v1107_v49, 0.0  ;;  %2042 = vmatprep.mubr.bf16.mxu0 %v4507_v40  ;;  %2331 = vmatprep.mubr.bf16.mxu1 %v4509_v41 }
 0x169   : > { %v4583_v26 = vpack.c.bf16 %v1399_v53, %v1395_v52  ;;  %v4585_v31 = vpack.c.bf16 %v1401_v2, %v1397_v38 }
 0x16a   : > { %v4587_v60 = vpack.c.bf16 %v1400_v57, %v1396_v54  ;;  %v4589_v61 = vpack.c.bf16 %v1402_v58, %v1398_v44  ;;  %v757_v59 = vpop.f32.mrb[52].mxu0  ;;  %v1110_v0 = vpop.f32.mrb[52].mxu1 }
 0x16b   : > { %v758_v34 = vadd.f32 %v757_v59, %v4321_v27  ;;  %v1111_v35 = vadd.f32 %v1110_v0, %v4323_v28  ;;  %v759_v8 = vpop.f32.mrb[53].mxu0  ;;  %v1112_v9 = vpop.f32.mrb[53].mxu1 }
 0x16c   : > { %v760_v40 = vadd.f32 %v759_v8, %v4325_v29  ;;  %v1113_v41 = vadd.f32 %v1112_v9, %v4327_v30  ;;  %v761_v4 = vpop.f32.mrb[54].mxu0  ;;  %v1114_v5 = vpop.f32.mrb[54].mxu1 }
 0x16d   : > { %v1405_v10 = vmax.f32 %v1111_v35, 0.0  ;;  %v762_v11 = vadd.f32 %v761_v4, %v4321_v27  ;;  %v1115_v14 = vadd.f32 %v1114_v5, %v4323_v28  ;;  %v763_v15 = vpop.f32.mrb[55].mxu0  ;;  %v1116_v16 = vpop.f32.mrb[55].mxu1  ;;  %v1403_v24 = vmax.f32 %v758_v34, 0.0 }
 0x16e   : > { %v1406_v17 = vmax.f32 %v1113_v41, 0.0  ;;  %v764_v20 = vadd.f32 %v763_v15, %v4325_v29  ;;  %v1117_v21 = vadd.f32 %v1116_v16, %v4327_v30  ;;  %v1404_v63 = vmax.f32 %v760_v40, 0.0 }
 0x16f   : > { %v1407_v25 = vmax.f32 %v762_v11, 0.0  ;;  %v1409_v62 = vmax.f32 %v1115_v14, 0.0  ;;  %2043 = vmatmul.mubr.bf16.gmra.mrb[160].mxu0 %v4503_v6  ;;  %2332 = vmatmul.mubr.bf16.gmra.mrb[160].mxu1 %v4505_v7 }
 0x170   : > { %v1408_v36 = vmax.f32 %v764_v20, 0.0  ;;  %v1410_v37 = vmax.f32 %v1117_v21, 0.0  ;;  %2050 = vmatprep.mubr.bf16.mxu0 %v4527_v12  ;;  %2339 = vmatprep.mubr.bf16.mxu1 %v4529_v13 }
 0x171   : > { %v4603_v1 = vpack.c.bf16 %v1407_v25, %v1403_v24  ;;  %v4605_v3 = vpack.c.bf16 %v1409_v62, %v1405_v10 }
 0x172   : > { %v4607_v32 = vpack.c.bf16 %v1408_v36, %v1404_v63  ;;  %v4609_v33 = vpack.c.bf16 %v1410_v37, %v1406_v17  ;;  %v767_v38 = vpop.f32.mrb[56].mxu0  ;;  %v1120_v39 = vpop.f32.mrb[56].mxu1 }
 0x173   : > { %v768_v6 = vadd.f32 %v767_v38, %v4321_v27  ;;  %v1121_v7 = vadd.f32 %v1120_v39, %v4323_v28  ;;  %v769_v42 = vpop.f32.mrb[57].mxu0  ;;  %v1122_v47 = vpop.f32.mrb[57].mxu1 }
 0x174   : > { %v770_v12 = vadd.f32 %v769_v42, %v4325_v29  ;;  %v1123_v13 = vadd.f32 %v1122_v47, %v4327_v30  ;;  %v771_v43 = vpop.f32.mrb[58].mxu0  ;;  %v1124_v44 = vpop.f32.mrb[58].mxu1 }
 0x175   : > { %v1413_v48 = vmax.f32 %v1121_v7, 0.0  ;;  %v772_v49 = vadd.f32 %v771_v43, %v4321_v27  ;;  %v1125_v52 = vadd.f32 %v1124_v44, %v4323_v28  ;;  %v773_v53 = vpop.f32.mrb[59].mxu0  ;;  %v1126_v2 = vpop.f32.mrb[59].mxu1  ;;  %v1411_v59 = vmax.f32 %v768_v6, 0.0 }
 0x176   : > { %v1414_v54 = vmax.f32 %v1123_v13, 0.0  ;;  %v774_v57 = vadd.f32 %v773_v53, %v4325_v29  ;;  %v1127_v58 = vadd.f32 %v1126_v2, %v4327_v30  ;;  %v1412_v35 = vmax.f32 %v770_v12, 0.0 }
 0x177   : > { %v1415_v0 = vmax.f32 %v772_v49, 0.0  ;;  %v1417_v34 = vmax.f32 %v1125_v52, 0.0  ;;  %2051 = vmatmul.mubr.bf16.gmra.mrb[164].mxu0 %v4523_v45  ;;  %2340 = vmatmul.mubr.bf16.gmra.mrb[164].mxu1 %v4525_v46 }
 0x178   : > { %v1416_v8 = vmax.f32 %v774_v57, 0.0  ;;  %v1418_v9 = vmax.f32 %v1127_v58, 0.0  ;;  %2058 = vmatprep.mubr.bf16.mxu0 %v4547_v50  ;;  %2347 = vmatprep.mubr.bf16.mxu1 %v4549_v51 }
 0x179   : > { %v4623_v40 = vpack.c.bf16 %v1415_v0, %v1411_v59  ;;  %v4625_v41 = vpack.c.bf16 %v1417_v34, %v1413_v48 }
 0x17a   : > { %v4627_v4 = vpack.c.bf16 %v1416_v8, %v1412_v35  ;;  %v4629_v5 = vpack.c.bf16 %v1418_v9, %v1414_v54  ;;  %v777_v10 = vpop.f32.mrb[60].mxu0  ;;  %v1130_v11 = vpop.f32.mrb[60].mxu1 }
 0x17b   : > { %v778_v45 = vadd.f32 %v777_v10, %v4321_v27  ;;  %v1131_v46 = vadd.f32 %v1130_v11, %v4323_v28  ;;  %v779_v14 = vpop.f32.mrb[61].mxu0  ;;  %v1132_v15 = vpop.f32.mrb[61].mxu1 }
 0x17c   : > { %v780_v50 = vadd.f32 %v779_v14, %v4325_v29  ;;  %v1133_v51 = vadd.f32 %v1132_v15, %v4327_v30  ;;  %v781_v16 = vpop.f32.mrb[62].mxu0  ;;  %v1134_v17 = vpop.f32.mrb[62].mxu1 }
 0x17d   : > { %v1421_v20 = vmax.f32 %v1131_v46, 0.0  ;;  %v782_v21 = vadd.f32 %v781_v16, %v4321_v27  ;;  %v1135_v24 = vadd.f32 %v1134_v17, %v4323_v28  ;;  %v783_v25 = vpop.f32.mrb[63].mxu0  ;;  %v1136_v62 = vpop.f32.mrb[63].mxu1  ;;  %v1419_v38 = vmax.f32 %v778_v45, 0.0 }
 0x17e   : > { %v1422_v63 = vmax.f32 %v1133_v51, 0.0  ;;  %v784_v36 = vadd.f32 %v783_v25, %v4325_v29  ;;  %v1137_v37 = vadd.f32 %v1136_v62, %v4327_v30  ;;  %v1420_v7 = vmax.f32 %v780_v50, 0.0 }
 0x17f   : > { %v1423_v39 = vmax.f32 %v782_v21, 0.0  ;;  %v1425_v6 = vmax.f32 %v1135_v24, 0.0  ;;  %2059 = vmatmul.mubr.bf16.gmra.mrb[168].mxu0 %v4543_v18  ;;  %2348 = vmatmul.mubr.bf16.gmra.mrb[168].mxu1 %v4545_v19 }
 0x180   : > { %v1424_v42 = vmax.f32 %v784_v36, 0.0  ;;  %v1426_v47 = vmax.f32 %v1137_v37, 0.0  ;;  %2066 = vmatprep.mubr.bf16.mxu0 %v4567_v22  ;;  %2355 = vmatprep.mubr.bf16.mxu1 %v4569_v23 }
 0x181   : > { %v4643_v12 = vpack.c.bf16 %v1423_v39, %v1419_v38  ;;  %v4645_v13 = vpack.c.bf16 %v1425_v6, %v1421_v20 }
 0x182   : > { %v4647_v43 = vpack.c.bf16 %v1424_v42, %v1420_v7  ;;  %v4649_v44 = vpack.c.bf16 %v1426_v47, %v1422_v63  ;;  %v787_v48 = vpop.f32.mrb[64].mxu0  ;;  %v1140_v49 = vpop.f32.mrb[64].mxu1 }
 0x183   : > { %v788_v18 = vadd.f32 %v787_v48, %v4321_v27  ;;  %v1141_v19 = vadd.f32 %v1140_v49, %v4323_v28  ;;  %v789_v52 = vpop.f32.mrb[65].mxu0  ;;  %v1142_v53 = vpop.f32.mrb[65].mxu1 }
 0x184   : > { %v790_v22 = vadd.f32 %v789_v52, %v4325_v29  ;;  %v1143_v23 = vadd.f32 %v1142_v53, %v4327_v30  ;;  %v791_v2 = vpop.f32.mrb[66].mxu0  ;;  %v1144_v54 = vpop.f32.mrb[66].mxu1 }
 0x185   : > { %v1429_v57 = vmax.f32 %v1141_v19, 0.0  ;;  %v792_v58 = vadd.f32 %v791_v2, %v4321_v27  ;;  %v1145_v59 = vadd.f32 %v1144_v54, %v4323_v28  ;;  %v793_v0 = vpop.f32.mrb[67].mxu0  ;;  %v1146_v34 = vpop.f32.mrb[67].mxu1  ;;  %v1427_v10 = vmax.f32 %v788_v18, 0.0 }
 0x186   : > { %v1430_v35 = vmax.f32 %v1143_v23, 0.0  ;;  %v794_v8 = vadd.f32 %v793_v0, %v4325_v29  ;;  %v1147_v9 = vadd.f32 %v1146_v34, %v4327_v30  ;;  %v1428_v46 = vmax.f32 %v790_v22, 0.0 }
 0x187   : > { %v1431_v11 = vmax.f32 %v792_v58, 0.0  ;;  %v1433_v45 = vmax.f32 %v1145_v59, 0.0  ;;  %2067 = vmatmul.mubr.bf16.gmra.mrb[172].mxu0 %v4563_v55  ;;  %2356 = vmatmul.mubr.bf16.gmra.mrb[172].mxu1 %v4565_v56 }
 0x188   : > { %v1432_v14 = vmax.f32 %v794_v8, 0.0  ;;  %v1434_v15 = vmax.f32 %v1147_v9, 0.0  ;;  %2074 = vmatprep.mubr.bf16.mxu0 %v4587_v60  ;;  %2363 = vmatprep.mubr.bf16.mxu1 %v4589_v61 }
 0x189   : > { %v4663_v50 = vpack.c.bf16 %v1431_v11, %v1427_v10  ;;  %v4665_v51 = vpack.c.bf16 %v1433_v45, %v1429_v57 }
 0x18a   : > { %v4667_v16 = vpack.c.bf16 %v1432_v14, %v1428_v46  ;;  %v4669_v17 = vpack.c.bf16 %v1434_v15, %v1430_v35  ;;  %v797_v20 = vpop.f32.mrb[68].mxu0  ;;  %v1150_v21 = vpop.f32.mrb[68].mxu1 }
 0x18b   : > { %v798_v55 = vadd.f32 %v797_v20, %v4321_v27  ;;  %v1151_v56 = vadd.f32 %v1150_v21, %v4323_v28  ;;  %v799_v24 = vpop.f32.mrb[69].mxu0  ;;  %v1152_v25 = vpop.f32.mrb[69].mxu1 }
 0x18c   : > { %v800_v60 = vadd.f32 %v799_v24, %v4325_v29  ;;  %v1153_v61 = vadd.f32 %v1152_v25, %v4327_v30  ;;  %v801_v62 = vpop.f32.mrb[70].mxu0  ;;  %v1154_v63 = vpop.f32.mrb[70].mxu1 }
 0x18d   : > { %v1437_v36 = vmax.f32 %v1151_v56, 0.0  ;;  %v802_v37 = vadd.f32 %v801_v62, %v4321_v27  ;;  %v1155_v38 = vadd.f32 %v1154_v63, %v4323_v28  ;;  %v803_v39 = vpop.f32.mrb[71].mxu0  ;;  %v1156_v6 = vpop.f32.mrb[71].mxu1  ;;  %v1435_v48 = vmax.f32 %v798_v55, 0.0 }
 0x18e   : > { %v1438_v7 = vmax.f32 %v1153_v61, 0.0  ;;  %v804_v42 = vadd.f32 %v803_v39, %v4325_v29  ;;  %v1157_v47 = vadd.f32 %v1156_v6, %v4327_v30  ;;  %v1436_v19 = vmax.f32 %v800_v60, 0.0 }
 0x18f   : > { %v1439_v49 = vmax.f32 %v802_v37, 0.0  ;;  %v1441_v18 = vmax.f32 %v1155_v38, 0.0  ;;  %2075 = vmatmul.mubr.bf16.gmra.mrb[176].mxu0 %v4583_v26  ;;  %2364 = vmatmul.mubr.bf16.gmra.mrb[176].mxu1 %v4585_v31 }
 0x190   : > { %v1440_v52 = vmax.f32 %v804_v42, 0.0  ;;  %v1442_v53 = vmax.f32 %v1157_v47, 0.0  ;;  %2082 = vmatprep.mubr.bf16.mxu0 %v4607_v32  ;;  %2371 = vmatprep.mubr.bf16.mxu1 %v4609_v33 }
 0x191   : > { %v4683_v22 = vpack.c.bf16 %v1439_v49, %v1435_v48  ;;  %v4685_v23 = vpack.c.bf16 %v1441_v18, %v1437_v36 }
 0x192   : > { %v4687_v2 = vpack.c.bf16 %v1440_v52, %v1436_v19  ;;  %v4689_v54 = vpack.c.bf16 %v1442_v53, %v1438_v7  ;;  %v807_v57 = vpop.f32.mrb[72].mxu0  ;;  %v1160_v58 = vpop.f32.mrb[72].mxu1 }
 0x193   : > { %v808_v26 = vadd.f32 %v807_v57, %v4321_v27  ;;  %v1161_v31 = vadd.f32 %v1160_v58, %v4323_v28  ;;  %v809_v59 = vpop.f32.mrb[73].mxu0  ;;  %v1162_v0 = vpop.f32.mrb[73].mxu1 }
 0x194   : > { %v810_v32 = vadd.f32 %v809_v59, %v4325_v29  ;;  %v1163_v33 = vadd.f32 %v1162_v0, %v4327_v30  ;;  %v811_v34 = vpop.f32.mrb[74].mxu0  ;;  %v1164_v35 = vpop.f32.mrb[74].mxu1 }
 0x195   : > { %v1445_v8 = vmax.f32 %v1161_v31, 0.0  ;;  %v812_v9 = vadd.f32 %v811_v34, %v4321_v27  ;;  %v1165_v10 = vadd.f32 %v1164_v35, %v4323_v28  ;;  %v813_v11 = vpop.f32.mrb[75].mxu0  ;;  %v1166_v45 = vpop.f32.mrb[75].mxu1  ;;  %v1443_v20 = vmax.f32 %v808_v26, 0.0 }
 0x196   : > { %v1446_v46 = vmax.f32 %v1163_v33, 0.0  ;;  %v814_v14 = vadd.f32 %v813_v11, %v4325_v29  ;;  %v1167_v15 = vadd.f32 %v1166_v45, %v4327_v30  ;;  %v1444_v56 = vmax.f32 %v810_v32, 0.0 }
 0x197   : > { %v1447_v21 = vmax.f32 %v812_v9, 0.0  ;;  %v1449_v55 = vmax.f32 %v1165_v10, 0.0  ;;  %2083 = vmatmul.mubr.bf16.gmra.mrb[180].mxu0 %v4603_v1  ;;  %2372 = vmatmul.mubr.bf16.gmra.mrb[180].mxu1 %v4605_v3 }
 0x198   : > { %v1448_v24 = vmax.f32 %v814_v14, 0.0  ;;  %v1450_v25 = vmax.f32 %v1167_v15, 0.0  ;;  %2090 = vmatprep.mubr.bf16.mxu0 %v4627_v4  ;;  %2379 = vmatprep.mubr.bf16.mxu1 %v4629_v5 }
 0x199   : > { %v4703_v60 = vpack.c.bf16 %v1447_v21, %v1443_v20  ;;  %v4705_v61 = vpack.c.bf16 %v1449_v55, %v1445_v8 }
 0x19a   : > { %v4707_v62 = vpack.c.bf16 %v1448_v24, %v1444_v56  ;;  %v4709_v63 = vpack.c.bf16 %v1450_v25, %v1446_v46  ;;  %v817_v36 = vpop.f32.mrb[76].mxu0  ;;  %v1170_v37 = vpop.f32.mrb[76].mxu1 }
 0x19b   : > { %v818_v1 = vadd.f32 %v817_v36, %v4321_v27  ;;  %v1171_v3 = vadd.f32 %v1170_v37, %v4323_v28  ;;  %v819_v38 = vpop.f32.mrb[77].mxu0  ;;  %v1172_v39 = vpop.f32.mrb[77].mxu1 }
 0x19c   : > { %v820_v4 = vadd.f32 %v819_v38, %v4325_v29  ;;  %v1173_v5 = vadd.f32 %v1172_v39, %v4327_v30  ;;  %v821_v6 = vpop.f32.mrb[78].mxu0  ;;  %v1174_v7 = vpop.f32.mrb[78].mxu1 }
 0x19d   : > { %v1453_v42 = vmax.f32 %v1171_v3, 0.0  ;;  %v822_v47 = vadd.f32 %v821_v6, %v4321_v27  ;;  %v1175_v48 = vadd.f32 %v1174_v7, %v4323_v28  ;;  %v823_v49 = vpop.f32.mrb[79].mxu0  ;;  %v1176_v18 = vpop.f32.mrb[79].mxu1  ;;  %v1451_v57 = vmax.f32 %v818_v1, 0.0 }
 0x19e   : > { %v1454_v19 = vmax.f32 %v1173_v5, 0.0  ;;  %v824_v52 = vadd.f32 %v823_v49, %v4325_v29  ;;  %v1177_v53 = vadd.f32 %v1176_v18, %v4327_v30  ;;  %v1452_v31 = vmax.f32 %v820_v4, 0.0 }
 0x19f   : > { %v1455_v58 = vmax.f32 %v822_v47, 0.0  ;;  %v1457_v26 = vmax.f32 %v1175_v48, 0.0  ;;  %2091 = vmatmul.mubr.bf16.gmra.mrb[184].mxu0 %v4623_v40  ;;  %2380 = vmatmul.mubr.bf16.gmra.mrb[184].mxu1 %v4625_v41 }
 0x1a0   : > { %v1456_v59 = vmax.f32 %v824_v52, 0.0  ;;  %v1458_v0 = vmax.f32 %v1177_v53, 0.0  ;;  %2098 = vmatprep.mubr.bf16.mxu0 %v4647_v43  ;;  %2387 = vmatprep.mubr.bf16.mxu1 %v4649_v44 }
 0x1a1   : > { %v4723_v32 = vpack.c.bf16 %v1455_v58, %v1451_v57  ;;  %v4725_v33 = vpack.c.bf16 %v1457_v26, %v1453_v42 }
 0x1a2   : > { %v4727_v34 = vpack.c.bf16 %v1456_v59, %v1452_v31  ;;  %v4729_v35 = vpack.c.bf16 %v1458_v0, %v1454_v19  ;;  %v827_v8 = vpop.f32.mrb[80].mxu0  ;;  %v1180_v9 = vpop.f32.mrb[80].mxu1 }
 0x1a3   : > { %v828_v40 = vadd.f32 %v827_v8, %v4321_v27  ;;  %v1181_v41 = vadd.f32 %v1180_v9, %v4323_v28  ;;  %v829_v10 = vpop.f32.mrb[81].mxu0  ;;  %v1182_v11 = vpop.f32.mrb[81].mxu1 }
 0x1a4   : > { %v830_v43 = vadd.f32 %v829_v10, %v4325_v29  ;;  %v1183_v44 = vadd.f32 %v1182_v11, %v4327_v30  ;;  %v831_v45 = vpop.f32.mrb[82].mxu0  ;;  %v1184_v46 = vpop.f32.mrb[82].mxu1 }
 0x1a5   : > { %v1461_v14 = vmax.f32 %v1181_v41, 0.0  ;;  %v832_v15 = vadd.f32 %v831_v45, %v4321_v27  ;;  %v1185_v20 = vadd.f32 %v1184_v46, %v4323_v28  ;;  %v833_v21 = vpop.f32.mrb[83].mxu0  ;;  %v1186_v55 = vpop.f32.mrb[83].mxu1  ;;  %v1459_v36 = vmax.f32 %v828_v40, 0.0 }
 0x1a6   : > { %v1462_v56 = vmax.f32 %v1183_v44, 0.0  ;;  %v834_v24 = vadd.f32 %v833_v21, %v4325_v29  ;;  %v1187_v25 = vadd.f32 %v1186_v55, %v4327_v30  ;;  %v1460_v3 = vmax.f32 %v830_v43, 0.0 }
 0x1a7   : > { %v1463_v37 = vmax.f32 %v832_v15, 0.0  ;;  %v1465_v1 = vmax.f32 %v1185_v20, 0.0  ;;  %2099 = vmatmul.mubr.bf16.gmra.mrb[188].mxu0 %v4643_v12  ;;  %2388 = vmatmul.mubr.bf16.gmra.mrb[188].mxu1 %v4645_v13 }
 0x1a8   : > { %v1464_v38 = vmax.f32 %v834_v24, 0.0  ;;  %v1466_v39 = vmax.f32 %v1187_v25, 0.0  ;;  %2106 = vmatprep.mubr.bf16.mxu0 %v4667_v16  ;;  %2395 = vmatprep.mubr.bf16.mxu1 %v4669_v17 }
 0x1a9   : > { %v4743_v4 = vpack.c.bf16 %v1463_v37, %v1459_v36  ;;  %v4745_v5 = vpack.c.bf16 %v1465_v1, %v1461_v14 }
 0x1aa   : > { %v4747_v6 = vpack.c.bf16 %v1464_v38, %v1460_v3  ;;  %v4749_v7 = vpack.c.bf16 %v1466_v39, %v1462_v56  ;;  %v837_v42 = vpop.f32.mrb[84].mxu0  ;;  %v1190_v47 = vpop.f32.mrb[84].mxu1 }
 0x1ab   : > { %v838_v12 = vadd.f32 %v837_v42, %v4321_v27  ;;  %v1191_v13 = vadd.f32 %v1190_v47, %v4323_v28  ;;  %v839_v48 = vpop.f32.mrb[85].mxu0  ;;  %v1192_v49 = vpop.f32.mrb[85].mxu1 }
 0x1ac   : > { %v840_v16 = vadd.f32 %v839_v48, %v4325_v29  ;;  %v1193_v17 = vadd.f32 %v1192_v49, %v4327_v30  ;;  %v841_v18 = vpop.f32.mrb[86].mxu0  ;;  %v1194_v19 = vpop.f32.mrb[86].mxu1 }
 0x1ad   : > { %v1469_v52 = vmax.f32 %v1191_v13, 0.0  ;;  %v842_v53 = vadd.f32 %v841_v18, %v4321_v27  ;;  %v1195_v57 = vadd.f32 %v1194_v19, %v4323_v28  ;;  %v843_v58 = vpop.f32.mrb[87].mxu0  ;;  %v1196_v26 = vpop.f32.mrb[87].mxu1  ;;  %v1467_v8 = vmax.f32 %v838_v12, 0.0 }
 0x1ae   : > { %v1470_v31 = vmax.f32 %v1193_v17, 0.0  ;;  %v844_v59 = vadd.f32 %v843_v58, %v4325_v29  ;;  %v1197_v0 = vadd.f32 %v1196_v26, %v4327_v30  ;;  %v1468_v41 = vmax.f32 %v840_v16, 0.0 }
 0x1af   : > { %v1471_v9 = vmax.f32 %v842_v53, 0.0  ;;  %v1473_v40 = vmax.f32 %v1195_v57, 0.0  ;;  %2107 = vmatmul.mubr.bf16.gmra.mrb[192].mxu0 %v4663_v50  ;;  %2396 = vmatmul.mubr.bf16.gmra.mrb[192].mxu1 %v4665_v51 }
 0x1b0   : > { %v1472_v10 = vmax.f32 %v844_v59, 0.0  ;;  %v1474_v11 = vmax.f32 %v1197_v0, 0.0  ;;  %2114 = vmatprep.mubr.bf16.mxu0 %v4687_v2  ;;  %2403 = vmatprep.mubr.bf16.mxu1 %v4689_v54 }
 0x1b1   : > { %v4763_v43 = vpack.c.bf16 %v1471_v9, %v1467_v8  ;;  %v4765_v44 = vpack.c.bf16 %v1473_v40, %v1469_v52 }
 0x1b2   : > { %v4767_v45 = vpack.c.bf16 %v1472_v10, %v1468_v41  ;;  %v4769_v46 = vpack.c.bf16 %v1474_v11, %v1470_v31  ;;  %v847_v14 = vpop.f32.mrb[88].mxu0  ;;  %v1200_v15 = vpop.f32.mrb[88].mxu1 }
 0x1b3   : > { %v848_v50 = vadd.f32 %v847_v14, %v4321_v27  ;;  %v1201_v51 = vadd.f32 %v1200_v15, %v4323_v28  ;;  %v849_v20 = vpop.f32.mrb[89].mxu0  ;;  %v1202_v21 = vpop.f32.mrb[89].mxu1 }
 0x1b4   : > { %v850_v2 = vadd.f32 %v849_v20, %v4325_v29  ;;  %v1203_v54 = vadd.f32 %v1202_v21, %v4327_v30  ;;  %v851_v55 = vpop.f32.mrb[90].mxu0  ;;  %v1204_v56 = vpop.f32.mrb[90].mxu1 }
 0x1b5   : > { %v1477_v24 = vmax.f32 %v1201_v51, 0.0  ;;  %v852_v25 = vadd.f32 %v851_v55, %v4321_v27  ;;  %v1205_v36 = vadd.f32 %v1204_v56, %v4323_v28  ;;  %v853_v37 = vpop.f32.mrb[91].mxu0  ;;  %v1206_v1 = vpop.f32.mrb[91].mxu1  ;;  %v1475_v42 = vmax.f32 %v848_v50, 0.0 }
 0x1b6   : > { %v1478_v3 = vmax.f32 %v1203_v54, 0.0  ;;  %v854_v38 = vadd.f32 %v853_v37, %v4325_v29  ;;  %v1207_v39 = vadd.f32 %v1206_v1, %v4327_v30  ;;  %v1476_v13 = vmax.f32 %v850_v2, 0.0 }
 0x1b7   : > { %v1479_v47 = vmax.f32 %v852_v25, 0.0  ;;  %v1481_v12 = vmax.f32 %v1205_v36, 0.0  ;;  %2115 = vmatmul.mubr.bf16.gmra.mrb[196].mxu0 %v4683_v22  ;;  %2404 = vmatmul.mubr.bf16.gmra.mrb[196].mxu1 %v4685_v23 }
 0x1b8   : > { %v1480_v48 = vmax.f32 %v854_v38, 0.0  ;;  %v1482_v49 = vmax.f32 %v1207_v39, 0.0  ;;  %2122 = vmatprep.mubr.bf16.mxu0 %v4707_v62  ;;  %2411 = vmatprep.mubr.bf16.mxu1 %v4709_v63 }
 0x1b9   : > { %v4783_v16 = vpack.c.bf16 %v1479_v47, %v1475_v42  ;;  %v4785_v17 = vpack.c.bf16 %v1481_v12, %v1477_v24 }
 0x1ba   : > { %v4787_v18 = vpack.c.bf16 %v1480_v48, %v1476_v13  ;;  %v4789_v19 = vpack.c.bf16 %v1482_v49, %v1478_v3  ;;  %v857_v52 = vpop.f32.mrb[92].mxu0  ;;  %v1210_v53 = vpop.f32.mrb[92].mxu1 }
 0x1bb   : > { %v858_v22 = vadd.f32 %v857_v52, %v4321_v27  ;;  %v1211_v23 = vadd.f32 %v1210_v53, %v4323_v28  ;;  %v859_v57 = vpop.f32.mrb[93].mxu0  ;;  %v1212_v58 = vpop.f32.mrb[93].mxu1 }
 0x1bc   : > { %v860_v62 = vadd.f32 %v859_v57, %v4325_v29  ;;  %v1213_v63 = vadd.f32 %v1212_v58, %v4327_v30  ;;  %v861_v26 = vpop.f32.mrb[94].mxu0  ;;  %v1214_v31 = vpop.f32.mrb[94].mxu1 }
 0x1bd   : > { %v1485_v59 = vmax.f32 %v1211_v23, 0.0  ;;  %v862_v0 = vadd.f32 %v861_v26, %v4321_v27  ;;  %v1215_v8 = vadd.f32 %v1214_v31, %v4323_v28  ;;  %v863_v9 = vpop.f32.mrb[95].mxu0  ;;  %v1216_v40 = vpop.f32.mrb[95].mxu1  ;;  %v1483_v14 = vmax.f32 %v858_v22, 0.0 }
 0x1be   : > { %v1486_v41 = vmax.f32 %v1213_v63, 0.0  ;;  %v864_v10 = vadd.f32 %v863_v9, %v4325_v29  ;;  %v1217_v11 = vadd.f32 %v1216_v40, %v4327_v30  ;;  %v1484_v51 = vmax.f32 %v860_v62, 0.0 }
 0x1bf   : > { %v1487_v15 = vmax.f32 %v862_v0, 0.0  ;;  %v1489_v50 = vmax.f32 %v1215_v8, 0.0  ;;  %2123 = vmatmul.mubr.bf16.gmra.mrb[200].mxu0 %v4703_v60  ;;  %2412 = vmatmul.mubr.bf16.gmra.mrb[200].mxu1 %v4705_v61 }
 0x1c0   : > { %v1488_v20 = vmax.f32 %v864_v10, 0.0  ;;  %v1490_v21 = vmax.f32 %v1217_v11, 0.0  ;;  %2130 = vmatprep.mubr.bf16.mxu0 %v4727_v34  ;;  %2419 = vmatprep.mubr.bf16.mxu1 %v4729_v35 }
 0x1c1   : > { %v4803_v2 = vpack.c.bf16 %v1487_v15, %v1483_v14  ;;  %v4805_v54 = vpack.c.bf16 %v1489_v50, %v1485_v59 }
 0x1c2   : > { %v4807_v55 = vpack.c.bf16 %v1488_v20, %v1484_v51  ;;  %v4809_v56 = vpack.c.bf16 %v1490_v21, %v1486_v41  ;;  %v867_v24 = vpop.f32.mrb[96].mxu0  ;;  %v1220_v25 = vpop.f32.mrb[96].mxu1 }
 0x1c3   : > { %v868_v60 = vadd.f32 %v867_v24, %v4321_v27  ;;  %v1221_v61 = vadd.f32 %v1220_v25, %v4323_v28  ;;  %v869_v36 = vpop.f32.mrb[97].mxu0  ;;  %v1222_v37 = vpop.f32.mrb[97].mxu1 }
 0x1c4   : > { %v870_v34 = vadd.f32 %v869_v36, %v4325_v29  ;;  %v1223_v35 = vadd.f32 %v1222_v37, %v4327_v30  ;;  %v871_v1 = vpop.f32.mrb[98].mxu0  ;;  %v1224_v3 = vpop.f32.mrb[98].mxu1 }
 0x1c5   : > { %v1493_v38 = vmax.f32 %v1221_v61, 0.0  ;;  %v872_v39 = vadd.f32 %v871_v1, %v4321_v27  ;;  %v1225_v42 = vadd.f32 %v1224_v3, %v4323_v28  ;;  %v873_v47 = vpop.f32.mrb[99].mxu0  ;;  %v1226_v12 = vpop.f32.mrb[99].mxu1  ;;  %v1491_v52 = vmax.f32 %v868_v60, 0.0 }
 0x1c6   : > { %v1494_v13 = vmax.f32 %v1223_v35, 0.0  ;;  %v874_v48 = vadd.f32 %v873_v47, %v4325_v29  ;;  %v1227_v49 = vadd.f32 %v1226_v12, %v4327_v30  ;;  %v1492_v23 = vmax.f32 %v870_v34, 0.0 }
 0x1c7   : > { %v1495_v53 = vmax.f32 %v872_v39, 0.0  ;;  %v1497_v22 = vmax.f32 %v1225_v42, 0.0  ;;  %2131 = vmatmul.mubr.bf16.gmra.mrb[204].mxu0 %v4723_v32  ;;  %2420 = vmatmul.mubr.bf16.gmra.mrb[204].mxu1 %v4725_v33 }
 0x1c8   : > { %v1496_v57 = vmax.f32 %v874_v48, 0.0  ;;  %v1498_v58 = vmax.f32 %v1227_v49, 0.0  ;;  %2138 = vmatprep.mubr.bf16.mxu0 %v4747_v6  ;;  %2427 = vmatprep.mubr.bf16.mxu1 %v4749_v7 }
 0x1c9   : > { %v4823_v62 = vpack.c.bf16 %v1495_v53, %v1491_v52  ;;  %v4825_v63 = vpack.c.bf16 %v1497_v22, %v1493_v38 }
 0x1ca   : > { %v4827_v26 = vpack.c.bf16 %v1496_v57, %v1492_v23  ;;  %v4829_v31 = vpack.c.bf16 %v1498_v58, %v1494_v13  ;;  %v877_v59 = vpop.f32.mrb[100].mxu0  ;;  %v1230_v0 = vpop.f32.mrb[100].mxu1 }
 0x1cb   : > { %v878_v32 = vadd.f32 %v877_v59, %v4321_v27  ;;  %v1231_v33 = vadd.f32 %v1230_v0, %v4323_v28  ;;  %v879_v8 = vpop.f32.mrb[101].mxu0  ;;  %v1232_v9 = vpop.f32.mrb[101].mxu1 }
 0x1cc   : > { %v880_v6 = vadd.f32 %v879_v8, %v4325_v29  ;;  %v1233_v7 = vadd.f32 %v1232_v9, %v4327_v30  ;;  %v881_v40 = vpop.f32.mrb[102].mxu0  ;;  %v1234_v41 = vpop.f32.mrb[102].mxu1 }
 0x1cd   : > { %v1501_v10 = vmax.f32 %v1231_v33, 0.0  ;;  %v882_v11 = vadd.f32 %v881_v40, %v4321_v27  ;;  %v1235_v14 = vadd.f32 %v1234_v41, %v4323_v28  ;;  %v883_v15 = vpop.f32.mrb[103].mxu0  ;;  %v1236_v50 = vpop.f32.mrb[103].mxu1  ;;  %v1499_v24 = vmax.f32 %v878_v32, 0.0 }
 0x1ce   : > { %v1502_v51 = vmax.f32 %v1233_v7, 0.0  ;;  %v884_v20 = vadd.f32 %v883_v15, %v4325_v29  ;;  %v1237_v21 = vadd.f32 %v1236_v50, %v4327_v30  ;;  %v1500_v61 = vmax.f32 %v880_v6, 0.0 }
 0x1cf   : > { %v1503_v25 = vmax.f32 %v882_v11, 0.0  ;;  %v1505_v60 = vmax.f32 %v1235_v14, 0.0  ;;  %2139 = vmatmul.mubr.bf16.gmra.mrb[208].mxu0 %v4743_v4  ;;  %2428 = vmatmul.mubr.bf16.gmra.mrb[208].mxu1 %v4745_v5 }
 0x1d0   : > { %v1504_v36 = vmax.f32 %v884_v20, 0.0  ;;  %v1506_v37 = vmax.f32 %v1237_v21, 0.0  ;;  %2146 = vmatprep.mubr.bf16.mxu0 %v4767_v45  ;;  %2435 = vmatprep.mubr.bf16.mxu1 %v4769_v46 }
 0x1d1   : > { %v4843_v34 = vpack.c.bf16 %v1503_v25, %v1499_v24  ;;  %v4845_v35 = vpack.c.bf16 %v1505_v60, %v1501_v10 }
 0x1d2   : > { %v4847_v1 = vpack.c.bf16 %v1504_v36, %v1500_v61  ;;  %v4849_v3 = vpack.c.bf16 %v1506_v37, %v1502_v51  ;;  %v887_v38 = vpop.f32.mrb[104].mxu0  ;;  %v1240_v39 = vpop.f32.mrb[104].mxu1 }
 0x1d3   : > { %v888_v4 = vadd.f32 %v887_v38, %v4321_v27  ;;  %v1241_v5 = vadd.f32 %v1240_v39, %v4323_v28  ;;  %v889_v42 = vpop.f32.mrb[105].mxu0  ;;  %v1242_v47 = vpop.f32.mrb[105].mxu1 }
 0x1d4   : > { %v890_v45 = vadd.f32 %v889_v42, %v4325_v29  ;;  %v1243_v46 = vadd.f32 %v1242_v47, %v4327_v30  ;;  %v891_v12 = vpop.f32.mrb[106].mxu0  ;;  %v1244_v13 = vpop.f32.mrb[106].mxu1 }
 0x1d5   : > { %v1509_v48 = vmax.f32 %v1241_v5, 0.0  ;;  %v892_v49 = vadd.f32 %v891_v12, %v4321_v27  ;;  %v1245_v52 = vadd.f32 %v1244_v13, %v4323_v28  ;;  %v893_v53 = vpop.f32.mrb[107].mxu0  ;;  %v1246_v22 = vpop.f32.mrb[107].mxu1  ;;  %v1507_v59 = vmax.f32 %v888_v4, 0.0 }
 0x1d6   : > { %v1510_v23 = vmax.f32 %v1243_v46, 0.0  ;;  %v894_v57 = vadd.f32 %v893_v53, %v4325_v29  ;;  %v1247_v58 = vadd.f32 %v1246_v22, %v4327_v30  ;;  %v1508_v33 = vmax.f32 %v890_v45, 0.0 }
 0x1d7   : > { %v1511_v0 = vmax.f32 %v892_v49, 0.0  ;;  %v1513_v32 = vmax.f32 %v1245_v52, 0.0  ;;  %2147 = vmatmul.mubr.bf16.gmra.mrb[212].mxu0 %v4763_v43  ;;  %2436 = vmatmul.mubr.bf16.gmra.mrb[212].mxu1 %v4765_v44 }
 0x1d8   : > { %v1512_v8 = vmax.f32 %v894_v57, 0.0  ;;  %v1514_v9 = vmax.f32 %v1247_v58, 0.0  ;;  %2154 = vmatprep.mubr.bf16.mxu0 %v4787_v18  ;;  %2443 = vmatprep.mubr.bf16.mxu1 %v4789_v19 }
 0x1d9   : > { %v4863_v6 = vpack.c.bf16 %v1511_v0, %v1507_v59  ;;  %v4865_v7 = vpack.c.bf16 %v1513_v32, %v1509_v48 }
 0x1da   : > { %v4867_v40 = vpack.c.bf16 %v1512_v8, %v1508_v33  ;;  %v4869_v41 = vpack.c.bf16 %v1514_v9, %v1510_v23  ;;  %v897_v10 = vpop.f32.mrb[108].mxu0  ;;  %v1250_v11 = vpop.f32.mrb[108].mxu1 }
 0x1db   : > { %v898_v43 = vadd.f32 %v897_v10, %v4321_v27  ;;  %v1251_v44 = vadd.f32 %v1250_v11, %v4323_v28  ;;  %v899_v14 = vpop.f32.mrb[109].mxu0  ;;  %v1252_v15 = vpop.f32.mrb[109].mxu1 }
 0x1dc   : > { %v900_v18 = vadd.f32 %v899_v14, %v4325_v29  ;;  %v1253_v19 = vadd.f32 %v1252_v15, %v4327_v30  ;;  %v901_v50 = vpop.f32.mrb[110].mxu0  ;;  %v1254_v51 = vpop.f32.mrb[110].mxu1 }
 0x1dd   : > { %v1517_v20 = vmax.f32 %v1251_v44, 0.0  ;;  %v902_v21 = vadd.f32 %v901_v50, %v4321_v27  ;;  %v1255_v24 = vadd.f32 %v1254_v51, %v4323_v28  ;;  %v903_v25 = vpop.f32.mrb[111].mxu0  ;;  %v1256_v60 = vpop.f32.mrb[111].mxu1  ;;  %v1515_v38 = vmax.f32 %v898_v43, 0.0 }
 0x1de   : > { %v1518_v61 = vmax.f32 %v1253_v19, 0.0  ;;  %v904_v36 = vadd.f32 %v903_v25, %v4325_v29  ;;  %v1257_v37 = vadd.f32 %v1256_v60, %v4327_v30  ;;  %v1516_v5 = vmax.f32 %v900_v18, 0.0 }
 0x1df   : > { %v1519_v39 = vmax.f32 %v902_v21, 0.0  ;;  %v1521_v4 = vmax.f32 %v1255_v24, 0.0  ;;  %2155 = vmatmul.mubr.bf16.gmra.mrb[216].mxu0 %v4783_v16  ;;  %2444 = vmatmul.mubr.bf16.gmra.mrb[216].mxu1 %v4785_v17 }
 0x1e0   : > { %v1520_v42 = vmax.f32 %v904_v36, 0.0  ;;  %v1522_v47 = vmax.f32 %v1257_v37, 0.0  ;;  %2162 = vmatprep.mubr.bf16.mxu0 %v4807_v55  ;;  %2451 = vmatprep.mubr.bf16.mxu1 %v4809_v56 }
 0x1e1   : > { %v4883_v45 = vpack.c.bf16 %v1519_v39, %v1515_v38  ;;  %v4885_v46 = vpack.c.bf16 %v1521_v4, %v1517_v20 }
 0x1e2   : > { %v4887_v12 = vpack.c.bf16 %v1520_v42, %v1516_v5  ;;  %v4889_v13 = vpack.c.bf16 %v1522_v47, %v1518_v61  ;;  %v907_v48 = vpop.f32.mrb[112].mxu0  ;;  %v1260_v49 = vpop.f32.mrb[112].mxu1 }
 0x1e3   : > { %v908_v16 = vadd.f32 %v907_v48, %v4321_v27  ;;  %v1261_v17 = vadd.f32 %v1260_v49, %v4323_v28  ;;  %v909_v52 = vpop.f32.mrb[113].mxu0  ;;  %v1262_v53 = vpop.f32.mrb[113].mxu1 }
 0x1e4   : > { %v910_v55 = vadd.f32 %v909_v52, %v4325_v29  ;;  %v1263_v56 = vadd.f32 %v1262_v53, %v4327_v30  ;;  %v911_v22 = vpop.f32.mrb[114].mxu0  ;;  %v1264_v23 = vpop.f32.mrb[114].mxu1 }
 0x1e5   : > { %v1525_v57 = vmax.f32 %v1261_v17, 0.0  ;;  %v912_v58 = vadd.f32 %v911_v22, %v4321_v27  ;;  %v1265_v59 = vadd.f32 %v1264_v23, %v4323_v28  ;;  %v913_v0 = vpop.f32.mrb[115].mxu0  ;;  %v1266_v32 = vpop.f32.mrb[115].mxu1  ;;  %v1523_v10 = vmax.f32 %v908_v16, 0.0 }
 0x1e6   : > { %v1526_v33 = vmax.f32 %v1263_v56, 0.0  ;;  %v914_v8 = vadd.f32 %v913_v0, %v4325_v29  ;;  %v1267_v9 = vadd.f32 %v1266_v32, %v4327_v30  ;;  %v1524_v44 = vmax.f32 %v910_v55, 0.0 }
 0x1e7   : > { %v1527_v11 = vmax.f32 %v912_v58, 0.0  ;;  %v1529_v43 = vmax.f32 %v1265_v59, 0.0  ;;  %2163 = vmatmul.mubr.bf16.gmra.mrb[220].mxu0 %v4803_v2  ;;  %2452 = vmatmul.mubr.bf16.gmra.mrb[220].mxu1 %v4805_v54 }
 0x1e8   : > { %v1528_v14 = vmax.f32 %v914_v8, 0.0  ;;  %v1530_v15 = vmax.f32 %v1267_v9, 0.0  ;;  %2170 = vmatprep.mubr.bf16.mxu0 %v4827_v26  ;;  %2459 = vmatprep.mubr.bf16.mxu1 %v4829_v31 }
 0x1e9   : > { %v4903_v18 = vpack.c.bf16 %v1527_v11, %v1523_v10  ;;  %v4905_v19 = vpack.c.bf16 %v1529_v43, %v1525_v57 }
 0x1ea   : > { %v4907_v50 = vpack.c.bf16 %v1528_v14, %v1524_v44  ;;  %v4909_v51 = vpack.c.bf16 %v1530_v15, %v1526_v33  ;;  %v917_v20 = vpop.f32.mrb[116].mxu0  ;;  %v1270_v21 = vpop.f32.mrb[116].mxu1 }
 0x1eb   : > { %v918_v2 = vadd.f32 %v917_v20, %v4321_v27  ;;  %v1271_v54 = vadd.f32 %v1270_v21, %v4323_v28  ;;  %v919_v24 = vpop.f32.mrb[117].mxu0  ;;  %v1272_v25 = vpop.f32.mrb[117].mxu1 }
 0x1ec   : > { %v920_v26 = vadd.f32 %v919_v24, %v4325_v29  ;;  %v1273_v31 = vadd.f32 %v1272_v25, %v4327_v30  ;;  %v921_v60 = vpop.f32.mrb[118].mxu0  ;;  %v1274_v61 = vpop.f32.mrb[118].mxu1 }
 0x1ed   : > { %v1533_v36 = vmax.f32 %v1271_v54, 0.0  ;;  %v922_v37 = vadd.f32 %v921_v60, %v4321_v27  ;;  %v1275_v38 = vadd.f32 %v1274_v61, %v4323_v28  ;;  %v923_v39 = vpop.f32.mrb[119].mxu0  ;;  %v1276_v4 = vpop.f32.mrb[119].mxu1  ;;  %v1531_v48 = vmax.f32 %v918_v2, 0.0 }
 0x1ee   : > { %v1534_v5 = vmax.f32 %v1273_v31, 0.0  ;;  %v924_v42 = vadd.f32 %v923_v39, %v4325_v29  ;;  %v1277_v47 = vadd.f32 %v1276_v4, %v4327_v30  ;;  %v1532_v17 = vmax.f32 %v920_v26, 0.0 }
 0x1ef   : > { %v1535_v49 = vmax.f32 %v922_v37, 0.0  ;;  %v1537_v16 = vmax.f32 %v1275_v38, 0.0  ;;  %2171 = vmatmul.mubr.bf16.gmra.mrb[224].mxu0 %v4823_v62  ;;  %2460 = vmatmul.mubr.bf16.gmra.mrb[224].mxu1 %v4825_v63 }
 0x1f0   : > { %v1536_v52 = vmax.f32 %v924_v42, 0.0  ;;  %v1538_v53 = vmax.f32 %v1277_v47, 0.0  ;;  %2178 = vmatprep.mubr.bf16.mxu0 %v4847_v1  ;;  %2467 = vmatprep.mubr.bf16.mxu1 %v4849_v3 }
 0x1f1   : > { %v4923_v55 = vpack.c.bf16 %v1535_v49, %v1531_v48  ;;  %v4925_v56 = vpack.c.bf16 %v1537_v16, %v1533_v36 }
 0x1f2   : > { %v4927_v22 = vpack.c.bf16 %v1536_v52, %v1532_v17  ;;  %v4929_v23 = vpack.c.bf16 %v1538_v53, %v1534_v5  ;;  %v927_v57 = vpop.f32.mrb[120].mxu0  ;;  %v1280_v58 = vpop.f32.mrb[120].mxu1 }
 0x1f3   : > { %v928_v62 = vadd.f32 %v927_v57, %v4321_v27  ;;  %v1281_v63 = vadd.f32 %v1280_v58, %v4323_v28  ;;  %v929_v59 = vpop.f32.mrb[121].mxu0  ;;  %v1282_v0 = vpop.f32.mrb[121].mxu1 }
 0x1f4   : > { %v930_v1 = vadd.f32 %v929_v59, %v4325_v29  ;;  %v1283_v3 = vadd.f32 %v1282_v0, %v4327_v30  ;;  %v931_v32 = vpop.f32.mrb[122].mxu0  ;;  %v1284_v33 = vpop.f32.mrb[122].mxu1 }
 0x1f5   : > { %v1541_v8 = vmax.f32 %v1281_v63, 0.0  ;;  %v932_v9 = vadd.f32 %v931_v32, %v4321_v27  ;;  %v1285_v10 = vadd.f32 %v1284_v33, %v4323_v28  ;;  %v933_v11 = vpop.f32.mrb[123].mxu0  ;;  %v1286_v43 = vpop.f32.mrb[123].mxu1  ;;  %v1539_v20 = vmax.f32 %v928_v62, 0.0 }
 0x1f6   : > { %v1542_v44 = vmax.f32 %v1283_v3, 0.0  ;;  %v934_v14 = vadd.f32 %v933_v11, %v4325_v29  ;;  %v1287_v15 = vadd.f32 %v1286_v43, %v4327_v30  ;;  %v1540_v54 = vmax.f32 %v930_v1, 0.0 }
 0x1f7   : > { %v1543_v21 = vmax.f32 %v932_v9, 0.0  ;;  %v1545_v2 = vmax.f32 %v1285_v10, 0.0  ;;  %2179 = vmatmul.mubr.bf16.gmra.mrb[228].mxu0 %v4843_v34  ;;  %2468 = vmatmul.mubr.bf16.gmra.mrb[228].mxu1 %v4845_v35 }
 0x1f8   : > { %v1544_v24 = vmax.f32 %v934_v14, 0.0  ;;  %v1546_v25 = vmax.f32 %v1287_v15, 0.0  ;;  %2186 = vmatprep.mubr.bf16.mxu0 %v4867_v40  ;;  %2475 = vmatprep.mubr.bf16.mxu1 %v4869_v41 }
 0x1f9   : > { %v4943_v26 = vpack.c.bf16 %v1543_v21, %v1539_v20  ;;  %v4945_v31 = vpack.c.bf16 %v1545_v2, %v1541_v8 }
 0x1fa   : > { %v4947_v60 = vpack.c.bf16 %v1544_v24, %v1540_v54  ;;  %v4949_v61 = vpack.c.bf16 %v1546_v25, %v1542_v44  ;;  %v937_v36 = vpop.f32.mrb[124].mxu0  ;;  %v1290_v37 = vpop.f32.mrb[124].mxu1  ;;  %v3850_v44 = vld [vmem:[%s4076_s26] sm:$0xff]  ;;  %v3851_v24 = vld [vmem:[%s4076_s26 + $0x8] sm:$0xff] }
 0x1fb   : > { %v938_v34 = vadd.f32 %v937_v36, %v4321_v27  ;;  %v1291_v35 = vadd.f32 %v1290_v37, %v4323_v28  ;;  %v939_v38 = vpop.f32.mrb[125].mxu0  ;;  %v1292_v39 = vpop.f32.mrb[125].mxu1 }
 0x1fc   : > { %v940_v40 = vadd.f32 %v939_v38, %v4325_v29  ;;  %v1293_v41 = vadd.f32 %v1292_v39, %v4327_v30  ;;  %v941_v4 = vpop.f32.mrb[126].mxu0  ;;  %v1294_v5 = vpop.f32.mrb[126].mxu1 }
 0x1fd   : > { %v1549_v42 = vmax.f32 %v1291_v35, 0.0  ;;  %v942_v47 = vadd.f32 %v941_v4, %v4321_v27  ;;  %v1295_v48 = vadd.f32 %v1294_v5, %v4323_v28  ;;  %v943_v49 = vpop.f32.mrb[127].mxu0  ;;  %v1296_v16 = vpop.f32.mrb[127].mxu1  ;;  %v1547_v57 = vmax.f32 %v938_v34, 0.0  ;;  %v4966_v27 = vld [vmem:[%s5929_s4] ss:$0 sm:$0xff] }
 0x1fe   : > { %v1550_v17 = vmax.f32 %v1293_v41, 0.0  ;;  %v944_v52 = vadd.f32 %v943_v49, %v4325_v29  ;;  %v1297_v53 = vadd.f32 %v1296_v16, %v4327_v30  ;;  %v1548_v63 = vmax.f32 %v940_v40, 0.0  ;;  %v3852_v35 = vld [vmem:[%s4076_s26 + $0x10] sm:$0xff] }
 0x1ff   : > { %v1551_v58 = vmax.f32 %v942_v47, 0.0  ;;  %v1553_v62 = vmax.f32 %v1295_v48, 0.0  ;;  %2187 = vmatmul.mubr.bf16.gmra.mrb[232].mxu0 %v4863_v6  ;;  %2476 = vmatmul.mubr.bf16.gmra.mrb[232].mxu1 %v4865_v7 }
 0x200   : > { %v1552_v59 = vmax.f32 %v944_v52, 0.0  ;;  %v1554_v0 = vmax.f32 %v1297_v53, 0.0  ;;  %2194 = vmatprep.mubr.bf16.mxu0 %v4887_v12  ;;  %2483 = vmatprep.mubr.bf16.mxu1 %v4889_v13  ;;  %v3855_v53 = vld [vmem:[%s4076_s26 + $0x28] sm:$0xff] }
 0x201   : > { %v4968_v28 = vpack.c.bf16 %v1551_v58, %v1547_v57  ;;  %v4970_v29 = vpack.c.bf16 %v1553_v62, %v1549_v42  ;;  %v3853_v42 = vld [vmem:[%s4076_s26 + $0x18] sm:$0xff] }
 0x202   : > { %v4972_v30 = vpack.c.bf16 %v1552_v59, %v1548_v63  ;;  %v4974_v6 = vpack.c.bf16 %v1554_v0, %v1550_v17  ;;  %v1980_v7 = vpop.f32.mrb[128].mxu0  ;;  %v2269_v1 = vpop.f32.mrb[128].mxu1  ;;  %v3854_v17 = vld [vmem:[%s4076_s26 + $0x20] sm:$0xff] }
 0x203   : > { %v1981_v12 = vadd.f32 %v4966_v27, %v1980_v7  ;;  %v1982_v3 = vpop.f32.mrb[129].mxu0  ;;  %v2271_v13 = vpop.f32.mrb[129].mxu1 }
 0x204   : > { %v1983_v32 = vpop.f32.mrb[130].mxu0  ;;  %v2272_v33 = vpop.f32.mrb[130].mxu1  ;;  %v3856_v3 = vld [vmem:[%s4076_s26 + $0x30] sm:$0xff] }
 0x205   : > { %v2270_v8 = vadd.f32 %v2269_v1, %v1981_v12  ;;  %v1984_v9 = vadd.f32 %v4966_v27, %v1983_v32  ;;  %v1985_v10 = vpop.f32.mrb[131].mxu0  ;;  %v2274_v11 = vpop.f32.mrb[131].mxu1  ;;  %v3857_v32 = vld [vmem:[%s4076_s26 + $0x38] sm:$0xff] }
 0x207   : > { %v2273_v43 = vadd.f32 %v2272_v33, %v1984_v9  ;;  %2195 = vmatmul.mubr.bf16.gmra.mrb[236].mxu0 %v4883_v45  ;;  %2484 = vmatmul.mubr.bf16.gmra.mrb[236].mxu1 %v4885_v46  ;;  %v4981_v14 = vadd.f32 %v3850_v44, %v2270_v8 }
 0x208   : > { %2202 = vmatprep.mubr.bf16.mxu0 %v4907_v50  ;;  %2491 = vmatprep.mubr.bf16.mxu1 %v4909_v51 }
 0x209   : > { %2588 = vadd.xlane.f32.xlu0 %v4981_v14  ;;  %v4988_v45 = vadd.f32 %v3851_v24, %v2273_v43 }
 0x20a   : > { %v1988_v15 = vpop.f32.mrb[132].mxu0  ;;  %v2277_v20 = vpop.f32.mrb[132].mxu1 }
 0x20b   : > { %v1989_v21 = vadd.f32 %v4966_v27, %v1988_v15  ;;  %v1990_v2 = vpop.f32.mrb[133].mxu0  ;;  %v2279_v54 = vpop.f32.mrb[133].mxu1 }
 0x20c   : > { %v1991_v46 = vpop.f32.mrb[134].mxu0  ;;  %v2280_v25 = vpop.f32.mrb[134].mxu1  ;;  %v3859_v54 = vld [vmem:[%s4076_s26 + $0x48] sm:$0xff] }
 0x20d   : > { %v2278_v36 = vadd.f32 %v2277_v20, %v1989_v21  ;;  %v1992_v37 = vadd.f32 %v4966_v27, %v1991_v46  ;;  %v1993_v50 = vpop.f32.mrb[135].mxu0  ;;  %v2282_v51 = vpop.f32.mrb[135].mxu1  ;;  %2590 = vadd.xlane.f32.xlu0 %v4988_v45  ;;  %v3858_v21 = vld [vmem:[%s4076_s26 + $0x40] sm:$0xff] }
 0x20f   : > { %v2281_v34 = vadd.f32 %v2280_v25, %v1992_v37  ;;  %2203 = vmatmul.mubr.bf16.gmra.mrb[240].mxu0 %v4903_v18  ;;  %2492 = vmatmul.mubr.bf16.gmra.mrb[240].mxu1 %v4905_v19  ;;  %v4995_v38 = vadd.f32 %v3852_v35, %v2278_v36 }
 0x210   : > { %2210 = vmatprep.mubr.bf16.mxu0 %v4927_v22  ;;  %2499 = vmatprep.mubr.bf16.mxu1 %v4929_v23 }
 0x211   : > { %2592 = vadd.xlane.f32.xlu1 %v4995_v38  ;;  %v5002_v18 = vadd.f32 %v3853_v42, %v2281_v34 }
 0x212   : > { %v1996_v39 = vpop.f32.mrb[136].mxu0  ;;  %v2285_v40 = vpop.f32.mrb[136].mxu1 }
 0x213   : > { %v1997_v41 = vadd.f32 %v4966_v27, %v1996_v39  ;;  %v1998_v4 = vpop.f32.mrb[137].mxu0  ;;  %v2287_v5 = vpop.f32.mrb[137].mxu1 }
 0x214   : > { %v1999_v19 = vpop.f32.mrb[138].mxu0  ;;  %v2288_v47 = vpop.f32.mrb[138].mxu1  ;;  %v3861_v5 = vld [vmem:[%s4076_s26 + $0x58] sm:$0xff] }
 0x215   : > { %v2286_v48 = vadd.f32 %v2285_v40, %v1997_v41  ;;  %v2000_v22 = vadd.f32 %v4966_v27, %v1999_v19  ;;  %v2001_v49 = vpop.f32.mrb[139].mxu0  ;;  %v2290_v23 = vpop.f32.mrb[139].mxu1  ;;  %2594 = vadd.xlane.f32.xlu1 %v5002_v18  ;;  %v3860_v41 = vld [vmem:[%s4076_s26 + $0x50] sm:$0xff] }
 0x217   : > { %v2289_v16 = vadd.f32 %v2288_v47, %v2000_v22  ;;  %2211 = vmatmul.mubr.bf16.gmra.mrb[244].mxu0 %v4923_v55  ;;  %2500 = vmatmul.mubr.bf16.gmra.mrb[244].mxu1 %v4925_v56  ;;  %v5009_v52 = vadd.f32 %v3854_v17, %v2286_v48 }
 0x218   : > { %2218 = vmatprep.mubr.bf16.mxu0 %v4947_v60  ;;  %2507 = vmatprep.mubr.bf16.mxu1 %v4949_v61 }
 0x219   : > { %2596 = vadd.xlane.f32.xlu0 %v5009_v52  ;;  %v5015_v57 = vadd.f32 %v3855_v53, %v2289_v16 }
 0x21a   : > { %v2004_v58 = vpop.f32.mrb[140].mxu0  ;;  %v2293_v62 = vpop.f32.mrb[140].mxu1 }
 0x21b   : > { %v2005_v63 = vadd.f32 %v4966_v27, %v2004_v58  ;;  %v2006_v55 = vpop.f32.mrb[141].mxu0  ;;  %v2295_v59 = vpop.f32.mrb[141].mxu1  ;;  %2598 = vadd.xlane.f32.xlu1 %v5015_v57 }
 0x21c   : > { %v2007_v56 = vpop.f32.mrb[142].mxu0  ;;  %v2296_v0 = vpop.f32.mrb[142].mxu1  ;;  %v3862_v55 = vld [vmem:[%s4076_s26 + $0x60] sm:$0xff] }
 0x21d   : > { %v2294_v60 = vadd.f32 %v2293_v62, %v2005_v63  ;;  %v2008_v61 = vadd.f32 %v4966_v27, %v2007_v56  ;;  %v2009_v7 = vpop.f32.mrb[143].mxu0  ;;  %v2298_v1 = vpop.f32.mrb[143].mxu1  ;;  %v3863_v56 = vld [vmem:[%s4076_s26 + $0x68] sm:$0xff] }
 0x21f   : > { %v2297_v12 = vadd.f32 %v2296_v0, %v2008_v61  ;;  %2219 = vmatmul.mubr.bf16.gmra.mrb[248].mxu0 %v4943_v26  ;;  %2508 = vmatmul.mubr.bf16.gmra.mrb[248].mxu1 %v4945_v31  ;;  %v5023_v13 = vadd.f32 %v3856_v3, %v2294_v60 }
 0x220   : > { %2226 = vmatprep.mubr.bf16.mxu0 %v4972_v30  ;;  %2515 = vmatprep.mubr.bf16.mxu1 %v4974_v6 }
 0x221   : > { %2600 = vadd.xlane.f32.xlu0 %v5023_v13  ;;  %v5029_v33 = vadd.f32 %v3857_v32, %v2297_v12 }
 0x222   : > { %v2012_v8 = vpop.f32.mrb[144].mxu0  ;;  %v2301_v9 = vpop.f32.mrb[144].mxu1 }
 0x223   : > { %v2013_v10 = vadd.f32 %v4966_v27, %v2012_v8  ;;  %v2014_v26 = vpop.f32.mrb[145].mxu0  ;;  %v2303_v31 = vpop.f32.mrb[145].mxu1  ;;  %2602 = vadd.xlane.f32.xlu1 %v5029_v33 }
 0x224   : > { %v2015_v11 = vpop.f32.mrb[146].mxu0  ;;  %v2304_v43 = vpop.f32.mrb[146].mxu1 }
 0x225   : > { %v2302_v30 = vadd.f32 %v2301_v9, %v2013_v10  ;;  %v2016_v6 = vadd.f32 %v4966_v27, %v2015_v11  ;;  %v2017_v44 = vpop.f32.mrb[147].mxu0  ;;  %v2306_v15 = vpop.f32.mrb[147].mxu1  ;;  %v3864_v11 = vld [vmem:[%s4076_s26 + $0x70] sm:$0xff] }
 0x227   : > { %v2305_v20 = vadd.f32 %v2304_v43, %v2016_v6  ;;  %2227 = vmatmul.mubr.bf16.gmra.mrb[252].mxu0 %v4968_v28  ;;  %2516 = vmatmul.mubr.bf16.gmra.mrb[252].mxu1 %v4970_v29  ;;  %v5037_v2 = vadd.f32 %v3858_v21, %v2302_v30  ;;  %v3865_v30 = vld [vmem:[%s4076_s26 + $0x78] sm:$0xff] }
 0x229   : > { %2604 = vadd.xlane.f32.xlu0 %v5037_v2  ;;  %v5041_v24 = vadd.f32 %v3859_v54, %v2305_v20 }
 0x22a   : > { %v2020_v46 = vpop.f32.mrb[148].mxu0  ;;  %v2309_v25 = vpop.f32.mrb[148].mxu1 }
 0x22b   : > { %v2021_v36 = vadd.f32 %v4966_v27, %v2020_v46  ;;  %v2022_v37 = vpop.f32.mrb[149].mxu0  ;;  %v2311_v50 = vpop.f32.mrb[149].mxu1  ;;  %2606 = vadd.xlane.f32.xlu1 %v5041_v24 }
 0x22c   : > { %v2023_v28 = vpop.f32.mrb[150].mxu0  ;;  %v2312_v29 = vpop.f32.mrb[150].mxu1 }
 0x22d   : > { %v2310_v51 = vadd.f32 %v2309_v25, %v2021_v36  ;;  %v2024_v34 = vadd.f32 %v4966_v27, %v2023_v28  ;;  %v2025_v35 = vpop.f32.mrb[151].mxu0  ;;  %v2314_v39 = vpop.f32.mrb[151].mxu1 }
 0x22e   : > { %v3867_v35 = vld [vmem:[%s4076_s26 + $0x88] sm:$0xff] }
 0x22f   : > { %v2313_v40 = vadd.f32 %v2312_v29, %v2024_v34  ;;  %v5047_v4 = vadd.f32 %v3860_v41, %v2310_v51  ;;  %v3866_v51 = vld [vmem:[%s4076_s26 + $0x80] sm:$0xff] }
 0x231   : > { %2608 = vadd.xlane.f32.xlu0 %v5047_v4  ;;  %v5051_v42 = vadd.f32 %v3861_v5, %v2313_v40 }
 0x232   : > { %v2028_v19 = vpop.f32.mrb[152].mxu0  ;;  %v2317_v47 = vpop.f32.mrb[152].mxu1 }
 0x233   : > { %v2029_v48 = vadd.f32 %v4966_v27, %v2028_v19  ;;  %v2030_v22 = vpop.f32.mrb[153].mxu0  ;;  %v2319_v49 = vpop.f32.mrb[153].mxu1  ;;  %2610 = vadd.xlane.f32.xlu1 %v5051_v42 }
 0x234   : > { %v2031_v23 = vpop.f32.mrb[154].mxu0  ;;  %v2320_v16 = vpop.f32.mrb[154].mxu1 }
 0x235   : > { %v2318_v17 = vadd.f32 %v2317_v47, %v2029_v48  ;;  %v2032_v53 = vadd.f32 %v4966_v27, %v2031_v23  ;;  %v2033_v58 = vpop.f32.mrb[155].mxu0  ;;  %v2322_v62 = vpop.f32.mrb[155].mxu1 }
 0x236   : > { %v3868_v58 = vld [vmem:[%s4076_s26 + $0x90] sm:$0xff] }
 0x237   : > { %v2321_v63 = vadd.f32 %v2320_v16, %v2032_v53  ;;  %v5057_v59 = vadd.f32 %v3862_v55, %v2318_v17 }
 0x239   : > { %2612 = vadd.xlane.f32.xlu0 %v5057_v59  ;;  %v5061_v0 = vadd.f32 %v3863_v56, %v2321_v63  ;;  %v3869_v63 = vld [vmem:[%s4076_s26 + $0x98] sm:$0xff] }
 0x23a   : > { %v2036_v60 = vpop.f32.mrb[156].mxu0  ;;  %v2325_v61 = vpop.f32.mrb[156].mxu1 }
 0x23b   : > { %v2037_v7 = vadd.f32 %v4966_v27, %v2036_v60  ;;  %v2038_v1 = vpop.f32.mrb[157].mxu0  ;;  %v2327_v12 = vpop.f32.mrb[157].mxu1  ;;  %2614 = vadd.xlane.f32.xlu1 %v5061_v0 }
 0x23c   : > { %v2039_v3 = vpop.f32.mrb[158].mxu0  ;;  %v2328_v32 = vpop.f32.mrb[158].mxu1 }
 0x23d   : > { %v2326_v8 = vadd.f32 %v2325_v61, %v2037_v7  ;;  %v2040_v9 = vadd.f32 %v4966_v27, %v2039_v3  ;;  %v2041_v10 = vpop.f32.mrb[159].mxu0  ;;  %v2330_v26 = vpop.f32.mrb[159].mxu1 }
 0x23f   : > { %v2329_v31 = vadd.f32 %v2328_v32, %v2040_v9  ;;  %v5067_v43 = vadd.f32 %v3864_v11, %v2326_v8 }
 0x241   : > { %2616 = vadd.xlane.f32.xlu0 %v5067_v43  ;;  %v5071_v6 = vadd.f32 %v3865_v30, %v2329_v31  ;;  %v3870_v31 = vld [vmem:[%s4076_s26 + $0xa0] sm:$0xff]  ;;  %v3871_v30 = vld [vmem:[%s4076_s26 + $0xa8] sm:$0xff] }
 0x242   : > { %v2044_v44 = vpop.f32.mrb[160].mxu0  ;;  %v2333_v15 = vpop.f32.mrb[160].mxu1 }
 0x243   : > { %v2045_v20 = vadd.f32 %v4966_v27, %v2044_v44  ;;  %v2046_v21 = vpop.f32.mrb[161].mxu0  ;;  %v2335_v54 = vpop.f32.mrb[161].mxu1  ;;  %2618 = vadd.xlane.f32.xlu1 %v5071_v6 }
 0x244   : > { %v2047_v46 = vpop.f32.mrb[162].mxu0  ;;  %v2336_v25 = vpop.f32.mrb[162].mxu1 }
 0x245   : > { %v2334_v36 = vadd.f32 %v2333_v15, %v2045_v20  ;;  %v2048_v37 = vadd.f32 %v4966_v27, %v2047_v46  ;;  %v2049_v50 = vpop.f32.mrb[163].mxu0  ;;  %v2338_v28 = vpop.f32.mrb[163].mxu1 }
 0x247   : > { %v2337_v29 = vadd.f32 %v2336_v25, %v2048_v37  ;;  %v5077_v34 = vadd.f32 %v3866_v51, %v2334_v36 }
 0x249   : > { %2620 = vadd.xlane.f32.xlu0 %v5077_v34  ;;  %v5081_v39 = vadd.f32 %v3867_v35, %v2337_v29  ;;  %v3872_v35 = vld [vmem:[%s4076_s26 + $0xb0] sm:$0xff] }
 0x24a   : > { %v2052_v40 = vpop.f32.mrb[164].mxu0  ;;  %v2341_v41 = vpop.f32.mrb[164].mxu1 }
 0x24b   : > { %v2053_v5 = vadd.f32 %v4966_v27, %v2052_v40  ;;  %v2054_v19 = vpop.f32.mrb[165].mxu0  ;;  %v2343_v47 = vpop.f32.mrb[165].mxu1  ;;  %2622 = vadd.xlane.f32.xlu1 %v5081_v39 }
 0x24c   : > { %v2055_v48 = vpop.f32.mrb[166].mxu0  ;;  %v2344_v22 = vpop.f32.mrb[166].mxu1 }
 0x24d   : > { %v2342_v49 = vadd.f32 %v2341_v41, %v2053_v5  ;;  %v2056_v23 = vadd.f32 %v4966_v27, %v2055_v48  ;;  %v2057_v16 = vpop.f32.mrb[167].mxu0  ;;  %v2346_v17 = vpop.f32.mrb[167].mxu1  ;;  %v3873_v41 = vld [vmem:[%s4076_s26 + $0xb8] sm:$0xff] }
 0x24f   : > { %v2345_v53 = vadd.f32 %v2344_v22, %v2056_v23  ;;  %v5087_v62 = vadd.f32 %v3868_v58, %v2342_v49 }
 0x251   : > { %2624 = vadd.xlane.f32.xlu0 %v5087_v62  ;;  %v5091_v55 = vadd.f32 %v3869_v63, %v2345_v53 }
 0x252   : > { %v2060_v56 = vpop.f32.mrb[168].mxu0  ;;  %v2349_v60 = vpop.f32.mrb[168].mxu1 }
 0x253   : > { %v2061_v61 = vadd.f32 %v4966_v27, %v2060_v56  ;;  %v2062_v7 = vpop.f32.mrb[169].mxu0  ;;  %v2351_v1 = vpop.f32.mrb[169].mxu1  ;;  %2626 = vadd.xlane.f32.xlu1 %v5091_v55 }
 0x254   : > { %v2063_v12 = vpop.f32.mrb[170].mxu0  ;;  %v2352_v3 = vpop.f32.mrb[170].mxu1  ;;  %v3875_v7 = vld [vmem:[%s4076_s26 + $0xc8] sm:$0xff] }
 0x255   : > { %v2350_v32 = vadd.f32 %v2349_v60, %v2061_v61  ;;  %v2064_v8 = vadd.f32 %v4966_v27, %v2063_v12  ;;  %v2065_v9 = vpop.f32.mrb[171].mxu0  ;;  %v2354_v10 = vpop.f32.mrb[171].mxu1  ;;  %v3874_v60 = vld [vmem:[%s4076_s26 + $0xc0] sm:$0xff] }
 0x257   : > { %v2353_v26 = vadd.f32 %v2352_v3, %v2064_v8  ;;  %v5097_v11 = vadd.f32 %v3870_v31, %v2350_v32 }
 0x259   : > { %2628 = vadd.xlane.f32.xlu0 %v5097_v11  ;;  %v5101_v44 = vadd.f32 %v3871_v30, %v2353_v26 }
 0x25a   : > { %v2068_v15 = vpop.f32.mrb[172].mxu0  ;;  %v2357_v20 = vpop.f32.mrb[172].mxu1 }
 0x25b   : > { %v2069_v21 = vadd.f32 %v4966_v27, %v2068_v15  ;;  %v2070_v54 = vpop.f32.mrb[173].mxu0  ;;  %v2359_v46 = vpop.f32.mrb[173].mxu1  ;;  %2630 = vadd.xlane.f32.xlu1 %v5101_v44 }
 0x25c   : > { %v2071_v25 = vpop.f32.mrb[174].mxu0  ;;  %v2360_v36 = vpop.f32.mrb[174].mxu1  ;;  %v3876_v54 = vld [vmem:[%s4076_s26 + $0xd0] sm:$0xff] }
 0x25d   : > { %v2358_v37 = vadd.f32 %v2357_v20, %v2069_v21  ;;  %v2072_v50 = vadd.f32 %v4966_v27, %v2071_v25  ;;  %v2073_v28 = vpop.f32.mrb[175].mxu0  ;;  %v2362_v29 = vpop.f32.mrb[175].mxu1  ;;  %v3877_v25 = vld [vmem:[%s4076_s26 + $0xd8] sm:$0xff] }
 0x25f   : > { %v2361_v51 = vadd.f32 %v2360_v36, %v2072_v50  ;;  %v5107_v40 = vadd.f32 %v3872_v35, %v2358_v37 }
 0x261   : > { %2632 = vadd.xlane.f32.xlu0 %v5107_v40  ;;  %v5111_v5 = vadd.f32 %v3873_v41, %v2361_v51 }
 0x262   : > { %v2076_v19 = vpop.f32.mrb[176].mxu0  ;;  %v2365_v47 = vpop.f32.mrb[176].mxu1 }
 0x263   : > { %v2077_v48 = vadd.f32 %v4966_v27, %v2076_v19  ;;  %v2078_v22 = vpop.f32.mrb[177].mxu0  ;;  %v2367_v49 = vpop.f32.mrb[177].mxu1  ;;  %2634 = vadd.xlane.f32.xlu1 %v5111_v5 }
 0x264   : > { %v2079_v23 = vpop.f32.mrb[178].mxu0  ;;  %v2368_v16 = vpop.f32.mrb[178].mxu1 }
 0x265   : > { %v2366_v17 = vadd.f32 %v2365_v47, %v2077_v48  ;;  %v2080_v53 = vadd.f32 %v4966_v27, %v2079_v23  ;;  %v2081_v58 = vpop.f32.mrb[179].mxu0  ;;  %v2370_v63 = vpop.f32.mrb[179].mxu1  ;;  %v3878_v23 = vld [vmem:[%s4076_s26 + $0xe0] sm:$0xff] }
 0x267   : > { %v2369_v56 = vadd.f32 %v2368_v16, %v2080_v53  ;;  %v5117_v61 = vadd.f32 %v3874_v60, %v2366_v17  ;;  %v3879_v17 = vld [vmem:[%s4076_s26 + $0xe8] sm:$0xff] }
 0x269   : > { %2636 = vadd.xlane.f32.xlu0 %v5117_v61  ;;  %v5121_v1 = vadd.f32 %v3875_v7, %v2369_v56 }
 0x26a   : > { %v2084_v12 = vpop.f32.mrb[180].mxu0  ;;  %v2373_v3 = vpop.f32.mrb[180].mxu1 }
 0x26b   : > { %v2085_v32 = vadd.f32 %v4966_v27, %v2084_v12  ;;  %v2086_v8 = vpop.f32.mrb[181].mxu0  ;;  %v2375_v9 = vpop.f32.mrb[181].mxu1  ;;  %2638 = vadd.xlane.f32.xlu1 %v5121_v1 }
 0x26c   : > { %v2087_v10 = vpop.f32.mrb[182].mxu0  ;;  %v2376_v26 = vpop.f32.mrb[182].mxu1 }
 0x26d   : > { %v2374_v31 = vadd.f32 %v2373_v3, %v2085_v32  ;;  %v2088_v30 = vadd.f32 %v4966_v27, %v2087_v10  ;;  %v2089_v15 = vpop.f32.mrb[183].mxu0  ;;  %v2378_v20 = vpop.f32.mrb[183].mxu1 }
 0x26e   : > { %v3881_v15 = vld [vmem:[%s4076_s26 + $0xf8] sm:$0xff] }
 0x26f   : > { %v2377_v21 = vadd.f32 %v2376_v26, %v2088_v30  ;;  %v5127_v46 = vadd.f32 %v3876_v54, %v2374_v31  ;;  %v3880_v31 = vld [vmem:[%s4076_s26 + $0xf0] sm:$0xff] }
 0x271   : > { %2640 = vadd.xlane.f32.xlu0 %v5127_v46  ;;  %v5131_v36 = vadd.f32 %v3877_v25, %v2377_v21 }
 0x272   : > { %v2092_v37 = vpop.f32.mrb[184].mxu0  ;;  %v2381_v50 = vpop.f32.mrb[184].mxu1 }
 0x273   : > { %v2093_v28 = vadd.f32 %v4966_v27, %v2092_v37  ;;  %v2094_v29 = vpop.f32.mrb[185].mxu0  ;;  %v2383_v51 = vpop.f32.mrb[185].mxu1  ;;  %2642 = vadd.xlane.f32.xlu1 %v5131_v36 }
 0x274   : > { %v2095_v35 = vpop.f32.mrb[186].mxu0  ;;  %v2384_v41 = vpop.f32.mrb[186].mxu1 }
 0x275   : > { %v2382_v19 = vadd.f32 %v2381_v50, %v2093_v28  ;;  %v2096_v47 = vadd.f32 %v4966_v27, %v2095_v35  ;;  %v2097_v48 = vpop.f32.mrb[187].mxu0  ;;  %v2386_v22 = vpop.f32.mrb[187].mxu1 }
 0x276   : > { %v3882_v48 = vld [vmem:[%s4076_s26 + $0x100] sm:$0xff] }
 0x277   : > { %v2385_v49 = vadd.f32 %v2384_v41, %v2096_v47  ;;  %v5137_v16 = vadd.f32 %v3878_v23, %v2382_v19 }
 0x279   : > { %2644 = vadd.xlane.f32.xlu0 %v5137_v16  ;;  %v5141_v53 = vadd.f32 %v3879_v17, %v2385_v49  ;;  %v3883_v49 = vld [vmem:[%s4076_s26 + $0x108] sm:$0xff] }
 0x27a   : > { %v2100_v58 = vpop.f32.mrb[188].mxu0  ;;  %v2389_v63 = vpop.f32.mrb[188].mxu1 }
 0x27b   : > { %v2101_v56 = vadd.f32 %v4966_v27, %v2100_v58  ;;  %v2102_v60 = vpop.f32.mrb[189].mxu0  ;;  %v2391_v7 = vpop.f32.mrb[189].mxu1  ;;  %2646 = vadd.xlane.f32.xlu1 %v5141_v53 }
 0x27c   : > { %v2103_v12 = vpop.f32.mrb[190].mxu0  ;;  %v2392_v3 = vpop.f32.mrb[190].mxu1 }
 0x27d   : > { %v2390_v32 = vadd.f32 %v2389_v63, %v2101_v56  ;;  %v2104_v8 = vadd.f32 %v4966_v27, %v2103_v12  ;;  %v2105_v9 = vpop.f32.mrb[191].mxu0  ;;  %v2394_v10 = vpop.f32.mrb[191].mxu1 }
 0x27f   : > { %v2393_v26 = vadd.f32 %v2392_v3, %v2104_v8  ;;  %v5147_v30 = vadd.f32 %v3880_v31, %v2390_v32 }
 0x281   : > { %2648 = vadd.xlane.f32.xlu0 %v5147_v30  ;;  %v5151_v20 = vadd.f32 %v3881_v15, %v2393_v26  ;;  %v3884_v26 = vld [vmem:[%s4076_s26 + $0x110] sm:$0xff]  ;;  %v3885_v15 = vld [vmem:[%s4076_s26 + $0x118] sm:$0xff] }
 0x282   : > { %v2108_v21 = vpop.f32.mrb[192].mxu0  ;;  %v2397_v54 = vpop.f32.mrb[192].mxu1 }
 0x283   : > { %v2109_v25 = vadd.f32 %v4966_v27, %v2108_v21  ;;  %v2110_v37 = vpop.f32.mrb[193].mxu0  ;;  %v2399_v50 = vpop.f32.mrb[193].mxu1  ;;  %2650 = vadd.xlane.f32.xlu1 %v5151_v20 }
 0x284   : > { %v2111_v28 = vpop.f32.mrb[194].mxu0  ;;  %v2400_v29 = vpop.f32.mrb[194].mxu1 }
 0x285   : > { %v2398_v51 = vadd.f32 %v2397_v54, %v2109_v25  ;;  %v2112_v35 = vadd.f32 %v4966_v27, %v2111_v28  ;;  %v2113_v41 = vpop.f32.mrb[195].mxu0  ;;  %v2402_v19 = vpop.f32.mrb[195].mxu1 }
 0x287   : > { %v2401_v47 = vadd.f32 %v2400_v29, %v2112_v35  ;;  %v5157_v22 = vadd.f32 %v3882_v48, %v2398_v51 }
 0x289   : > { %2652 = vadd.xlane.f32.xlu0 %v5157_v22  ;;  %v5161_v23 = vadd.f32 %v3883_v49, %v2401_v47 }
 0x28a   : > { %v2116_v17 = vpop.f32.mrb[196].mxu0  ;;  %v2405_v58 = vpop.f32.mrb[196].mxu1 }
 0x28b   : > { %v2117_v63 = vadd.f32 %v4966_v27, %v2116_v17  ;;  %v2118_v56 = vpop.f32.mrb[197].mxu0  ;;  %v2407_v60 = vpop.f32.mrb[197].mxu1  ;;  %2654 = vadd.xlane.f32.xlu1 %v5161_v23 }
 0x28c   : > { %v2119_v7 = vpop.f32.mrb[198].mxu0  ;;  %v2408_v12 = vpop.f32.mrb[198].mxu1  ;;  %v3887_v56 = vld [vmem:[%s4076_s26 + $0x128] sm:$0xff] }
 0x28d   : > { %v2406_v3 = vadd.f32 %v2405_v58, %v2117_v63  ;;  %v2120_v32 = vadd.f32 %v4966_v27, %v2119_v7  ;;  %v2121_v8 = vpop.f32.mrb[199].mxu0  ;;  %v2410_v9 = vpop.f32.mrb[199].mxu1  ;;  %v3886_v58 = vld [vmem:[%s4076_s26 + $0x120] sm:$0xff] }
 0x28f   : > { %v2409_v10 = vadd.f32 %v2408_v12, %v2120_v32  ;;  %v5167_v31 = vadd.f32 %v3884_v26, %v2406_v3 }
 0x291   : > { %2656 = vadd.xlane.f32.xlu0 %v5167_v31  ;;  %v5171_v21 = vadd.f32 %v3885_v15, %v2409_v10 }
 0x292   : > { %v2124_v54 = vpop.f32.mrb[200].mxu0  ;;  %v2413_v25 = vpop.f32.mrb[200].mxu1 }
 0x293   : > { %v2125_v37 = vadd.f32 %v4966_v27, %v2124_v54  ;;  %v2126_v50 = vpop.f32.mrb[201].mxu0  ;;  %v2415_v28 = vpop.f32.mrb[201].mxu1  ;;  %2658 = vadd.xlane.f32.xlu1 %v5171_v21 }
 0x294   : > { %v2127_v29 = vpop.f32.mrb[202].mxu0  ;;  %v2416_v51 = vpop.f32.mrb[202].mxu1 }
 0x295   : > { %v2414_v35 = vadd.f32 %v2413_v25, %v2125_v37  ;;  %v2128_v41 = vadd.f32 %v4966_v27, %v2127_v29  ;;  %v2129_v19 = vpop.f32.mrb[203].mxu0  ;;  %v2418_v47 = vpop.f32.mrb[203].mxu1 }
 0x296   : > { %v2589_v48 = vpop.xlane.xlu0 %2588  ;;  %v3888_v19 = vld [vmem:[%s4076_s26 + $0x130] sm:$0xff] }
 0x297   : > { %v2417_v49 = vadd.f32 %v2416_v51, %v2128_v41  ;;  %v2717_v17 = vmul.f32 0.0078125, %v2589_v48  ;;  %v5177_v63 = vadd.f32 %v3886_v58, %v2414_v35 }
 0x299   : > { %2660 = vadd.xlane.f32.xlu0 %v5177_v63  ;;  %v5181_v60 = vadd.f32 %v3887_v56, %v2417_v49  ;;  %v5184_v7 = vsub.f32 %v4981_v14, %v2717_v17 }
 0x29a   : > { %v2132_v12 = vpop.f32.mrb[204].mxu0  ;;  %v2421_v3 = vpop.f32.mrb[204].mxu1 }
 0x29b   : > { %v2133_v32 = vadd.f32 %v4966_v27, %v2132_v12  ;;  %v2591_v8 = vpop.xlane.xlu0 %2590  ;;  %v2134_v9 = vpop.f32.mrb[205].mxu0  ;;  %2662 = vadd.xlane.f32.xlu1 %v5181_v60  ;;  %v2845_v10 = vmul.f32 %v5184_v7, %v5184_v7 }
 0x29c   : > { %v2718_v26 = vmul.f32 0.0078125, %v2591_v8  ;;  %v2423_v15 = vpop.f32.mrb[205].mxu1  ;;  %v2135_v54 = vpop.f32.mrb[206].mxu0 }
 0x29d   : > { %v2422_v25 = vadd.f32 %v2421_v3, %v2133_v32  ;;  %v2136_v37 = vadd.f32 %v4966_v27, %v2135_v54  ;;  %v2424_v14 = vpop.f32.mrb[206].mxu1  ;;  %v2137_v50 = vpop.f32.mrb[207].mxu0  ;;  %2909 = vadd.xlane.f32.xlu0 %v2845_v10  ;;  %v3889_v10 = vld [vmem:[%s4076_s26 + $0x138] sm:$0xff] }
 0x29e   : > { %v2426_v28 = vpop.f32.mrb[207].mxu1  ;;  %v2593_v29 = vpop.xlane.xlu1 %2592  ;;  %v5192_v51 = vsub.f32 %v4988_v45, %v2718_v26 }
 0x29f   : > { %v2425_v35 = vadd.f32 %v2424_v14, %v2136_v37  ;;  %v2719_v41 = vmul.f32 0.0078125, %v2593_v29  ;;  %v5195_v47 = vadd.f32 %v3888_v19, %v2422_v25 }
 0x2a0   : > { %v2846_v48 = vmul.f32 %v5192_v51, %v5192_v51 }
 0x2a1   : > { %2664 = vadd.xlane.f32.xlu0 %v5195_v47  ;;  %v5201_v49 = vsub.f32 %v4995_v38, %v2719_v41  ;;  %v5207_v26 = vadd.f32 %v3889_v10, %v2425_v35  ;;  %v3890_v41 = vld [vmem:[%s4076_s26 + $0x140] sm:$0xff]  ;;  %v3891_v10 = vld [vmem:[%s4076_s26 + $0x148] sm:$0xff] }
 0x2a2   : > { %2911 = vadd.xlane.f32.xlu1 %v2846_v48  ;;  %v2140_v17 = vpop.f32.mrb[208].mxu0  ;;  %v2429_v58 = vpop.f32.mrb[208].mxu1 }
 0x2a3   : > { %v2141_v45 = vadd.f32 %v4966_v27, %v2140_v17  ;;  %v2595_v56 = vpop.xlane.xlu1 %2594  ;;  %v2142_v12 = vpop.f32.mrb[209].mxu0  ;;  %v2847_v3 = vmul.f32 %v5201_v49, %v5201_v49 }
 0x2a4   : > { %v2720_v32 = vmul.f32 0.0078125, %v2595_v56  ;;  %v2431_v8 = vpop.f32.mrb[209].mxu1  ;;  %v2143_v9 = vpop.f32.mrb[210].mxu0 }
 0x2a5   : > { %v2430_v15 = vadd.f32 %v2429_v58, %v2141_v45  ;;  %v2144_v38 = vadd.f32 %v4966_v27, %v2143_v9  ;;  %v2432_v54 = vpop.f32.mrb[210].mxu1  ;;  %v2145_v25 = vpop.f32.mrb[211].mxu0  ;;  %2913 = vadd.xlane.f32.xlu0 %v2847_v3 }
 0x2a6   : > { %v2434_v37 = vpop.f32.mrb[211].mxu1  ;;  %2666 = vadd.xlane.f32.xlu1 %v5207_v26  ;;  %v2597_v14 = vpop.xlane.xlu0 %2596  ;;  %v5212_v50 = vsub.f32 %v5002_v18, %v2720_v32 }
 0x2a7   : > { %v2433_v28 = vadd.f32 %v2432_v54, %v2144_v38  ;;  %v2721_v29 = vmul.f32 0.0078125, %v2597_v14  ;;  %v5215_v19 = vadd.f32 %v3890_v41, %v2430_v15 }
 0x2a8   : > { %v2599_v35 = vpop.xlane.xlu1 %2598  ;;  %v2848_v48 = vmul.f32 %v5212_v50, %v5212_v50 }
 0x2a9   : > { %v2722_v17 = vmul.f32 0.0078125, %v2599_v35  ;;  %2668 = vadd.xlane.f32.xlu0 %v5215_v19  ;;  %v5221_v58 = vsub.f32 %v5009_v52, %v2721_v29  ;;  %v5227_v15 = vadd.f32 %v3891_v10, %v2433_v28  ;;  %v3892_v35 = vld [vmem:[%s4076_s26 + $0x150] sm:$0xff] }
 0x2aa   : > { %2915 = vadd.xlane.f32.xlu1 %v2848_v48  ;;  %v2148_v45 = vpop.f32.mrb[212].mxu0  ;;  %v2437_v18 = vpop.f32.mrb[212].mxu1 }
 0x2ab   : > { %v2149_v56 = vadd.f32 %v4966_v27, %v2148_v45  ;;  %v2150_v12 = vpop.f32.mrb[213].mxu0  ;;  %v2439_v3 = vpop.f32.mrb[213].mxu1  ;;  %v2849_v32 = vmul.f32 %v5221_v58, %v5221_v58  ;;  %v5230_v38 = vsub.f32 %v5015_v57, %v2722_v17 }
 0x2ac   : > { %v2151_v8 = vpop.f32.mrb[214].mxu0  ;;  %v2440_v9 = vpop.f32.mrb[214].mxu1 }
 0x2ad   : > { %v2438_v52 = vadd.f32 %v2437_v18, %v2149_v56  ;;  %v2152_v54 = vadd.f32 %v4966_v27, %v2151_v8  ;;  %v2153_v25 = vpop.f32.mrb[215].mxu0  ;;  %v2442_v37 = vpop.f32.mrb[215].mxu1  ;;  %2917 = vadd.xlane.f32.xlu0 %v2849_v32  ;;  %v2850_v57 = vmul.f32 %v5230_v38, %v5230_v38 }
 0x2ae   : > { %2670 = vadd.xlane.f32.xlu1 %v5227_v15  ;;  %v2601_v14 = vpop.xlane.xlu0 %2600 }
 0x2af   : > { %v2441_v29 = vadd.f32 %v2440_v9, %v2152_v54  ;;  %v2723_v41 = vmul.f32 0.0078125, %v2601_v14  ;;  %v5235_v48 = vadd.f32 %v3892_v35, %v2438_v52  ;;  %v3893_v52 = vld [vmem:[%s4076_s26 + $0x158] sm:$0xff] }
 0x2b0   : > { %v2603_v28 = vpop.xlane.xlu1 %2602 }
 0x2b1   : > { %v2724_v17 = vmul.f32 0.0078125, %v2603_v28  ;;  %2672 = vadd.xlane.f32.xlu0 %v5235_v48  ;;  %v5241_v45 = vsub.f32 %v5023_v13, %v2723_v41  ;;  %v5247_v54 = vadd.f32 %v3893_v52, %v2441_v29 }
 0x2b2   : > { %2919 = vadd.xlane.f32.xlu1 %v2850_v57  ;;  %v2156_v18 = vpop.f32.mrb[216].mxu0  ;;  %v2445_v56 = vpop.f32.mrb[216].mxu1 }
 0x2b3   : > { %v2157_v12 = vadd.f32 %v4966_v27, %v2156_v18  ;;  %v2158_v3 = vpop.f32.mrb[217].mxu0  ;;  %v2447_v32 = vpop.f32.mrb[217].mxu1  ;;  %v2851_v8 = vmul.f32 %v5241_v45, %v5241_v45  ;;  %v5250_v25 = vsub.f32 %v5029_v33, %v2724_v17  ;;  %v3894_v18 = vld [vmem:[%s4076_s26 + $0x160] sm:$0xff] }
 0x2b4   : > { %v2159_v9 = vpop.f32.mrb[218].mxu0  ;;  %v2448_v10 = vpop.f32.mrb[218].mxu1 }
 0x2b5   : > { %v2446_v13 = vadd.f32 %v2445_v56, %v2157_v12  ;;  %v2160_v37 = vadd.f32 %v4966_v27, %v2159_v9  ;;  %v2161_v14 = vpop.f32.mrb[219].mxu0  ;;  %v2450_v41 = vpop.f32.mrb[219].mxu1  ;;  %2921 = vadd.xlane.f32.xlu0 %v2851_v8  ;;  %v2852_v33 = vmul.f32 %v5250_v25, %v5250_v25 }
 0x2b6   : > { %2674 = vadd.xlane.f32.xlu1 %v5247_v54  ;;  %v2605_v35 = vpop.xlane.xlu0 %2604  ;;  %v3895_v14 = vld [vmem:[%s4076_s26 + $0x168] sm:$0xff] }
 0x2b7   : > { %v2449_v28 = vadd.f32 %v2448_v10, %v2160_v37  ;;  %v2725_v57 = vmul.f32 0.0078125, %v2605_v35  ;;  %v5255_v3 = vadd.f32 %v3894_v18, %v2446_v13 }
 0x2b8   : > { %v2607_v29 = vpop.xlane.xlu1 %2606 }
 0x2b9   : > { %v2726_v17 = vmul.f32 0.0078125, %v2607_v29  ;;  %2676 = vadd.xlane.f32.xlu0 %v5255_v3  ;;  %v5261_v56 = vsub.f32 %v5037_v2, %v2725_v57  ;;  %v5267_v41 = vadd.f32 %v3895_v14, %v2449_v28 }
 0x2ba   : > { %2923 = vadd.xlane.f32.xlu1 %v2852_v33  ;;  %v2164_v12 = vpop.f32.mrb[220].mxu0  ;;  %v2453_v32 = vpop.f32.mrb[220].mxu1 }
 0x2bb   : > { %5951 = vst [vmem:[#allocation2_spill] sm:$0xff] %v5261_v56  ;;  %v2165_v8 = vadd.f32 %v4966_v27, %v2164_v12  ;;  %v2166_v9 = vpop.f32.mrb[221].mxu0  ;;  %v2455_v10 = vpop.f32.mrb[221].mxu1  ;;  %v2853_v52 = vmul.f32 %v5261_v56, %v5261_v56  ;;  %v5270_v35 = vsub.f32 %v5041_v24, %v2726_v17 }
 0x2bc   : > { %v2167_v13 = vpop.f32.mrb[222].mxu0  ;;  %v2456_v37 = vpop.f32.mrb[222].mxu1  ;;  %v3896_v10 = vld [vmem:[%s4076_s26 + $0x170] sm:$0xff] }
 0x2bd   : > { %5952 = vst [vmem:[#allocation3_spill] sm:$0xff] %v5270_v35  ;;  %v2454_v2 = vadd.f32 %v2453_v32, %v2165_v8  ;;  %v2168_v57 = vadd.f32 %v4966_v27, %v2167_v13  ;;  %v2169_v18 = vpop.f32.mrb[223].mxu0  ;;  %v2458_v29 = vpop.f32.mrb[223].mxu1  ;;  %2925 = vadd.xlane.f32.xlu0 %v2853_v52  ;;  %v2854_v24 = vmul.f32 %v5270_v35, %v5270_v35 }
 0x2be   : > { %2678 = vadd.xlane.f32.xlu1 %v5267_v41  ;;  %v2609_v33 = vpop.xlane.xlu0 %2608  ;;  %v3897_v29 = vld [vmem:[%s4076_s26 + $0x178] sm:$0xff] }
 0x2bf   : > { %v2457_v12 = vadd.f32 %v2456_v37, %v2168_v57  ;;  %v2727_v9 = vmul.f32 0.0078125, %v2609_v33  ;;  %v5275_v56 = vadd.f32 %v3896_v10, %v2454_v2 }
 0x2c0   : > { %v2611_v28 = vpop.xlane.xlu1 %2610 }
 0x2c1   : > { %v2728_v17 = vmul.f32 0.0078125, %v2611_v28  ;;  %2680 = vadd.xlane.f32.xlu0 %v5275_v56  ;;  %v5281_v32 = vsub.f32 %v5047_v4, %v2727_v9  ;;  %v5287_v33 = vadd.f32 %v3897_v29, %v2457_v12 }
 0x2c2   : > { %2927 = vadd.xlane.f32.xlu1 %v2854_v24  ;;  %v2172_v8 = vpop.f32.mrb[224].mxu0  ;;  %v2461_v52 = vpop.f32.mrb[224].mxu1 }
 0x2c3   : > { %5953 = vst [vmem:[#allocation4_spill] sm:$0xff] %v5281_v32  ;;  %v2173_v13 = vadd.f32 %v4966_v27, %v2172_v8  ;;  %v2174_v37 = vpop.f32.mrb[225].mxu0  ;;  %v2463_v14 = vpop.f32.mrb[225].mxu1  ;;  %v2855_v2 = vmul.f32 %v5281_v32, %v5281_v32  ;;  %v5290_v10 = vsub.f32 %v5051_v42, %v2728_v17  ;;  %v3898_v32 = vld [vmem:[%s4076_s26 + $0x180] sm:$0xff] }
 0x2c4   : > { %v2175_v57 = vpop.f32.mrb[226].mxu0  ;;  %v2464_v18 = vpop.f32.mrb[226].mxu1 }
 0x2c5   : > { %5954 = vst [vmem:[#allocation5_spill] sm:$0xff] %v5290_v10  ;;  %v2462_v4 = vadd.f32 %v2461_v52, %v2173_v13  ;;  %v2176_v9 = vadd.f32 %v4966_v27, %v2175_v57  ;;  %v2177_v28 = vpop.f32.mrb[227].mxu0  ;;  %v2466_v24 = vpop.f32.mrb[227].mxu1  ;;  %2929 = vadd.xlane.f32.xlu0 %v2855_v2  ;;  %v2856_v42 = vmul.f32 %v5290_v10, %v5290_v10 }
 0x2c6   : > { %2682 = vadd.xlane.f32.xlu1 %v5287_v33  ;;  %v2613_v8 = vpop.xlane.xlu0 %2612  ;;  %v3899_v28 = vld [vmem:[%s4076_s26 + $0x188] sm:$0xff] }
 0x2c7   : > { %v2465_v37 = vadd.f32 %v2464_v18, %v2176_v9  ;;  %v2729_v14 = vmul.f32 0.0078125, %v2613_v8  ;;  %v5295_v35 = vadd.f32 %v3898_v32, %v2462_v4 }
 0x2c8   : > { %v2615_v12 = vpop.xlane.xlu1 %2614 }
 0x2c9   : > { %v2730_v17 = vmul.f32 0.0078125, %v2615_v12  ;;  %2684 = vadd.xlane.f32.xlu0 %v5295_v35  ;;  %v5301_v52 = vsub.f32 %v5057_v59, %v2729_v14  ;;  %v5307_v24 = vadd.f32 %v3899_v28, %v2465_v37 }
 0x2ca   : > { %2931 = vadd.xlane.f32.xlu1 %v2856_v42  ;;  %v2180_v13 = vpop.f32.mrb[228].mxu0  ;;  %v2469_v2 = vpop.f32.mrb[228].mxu1 }
 0x2cb   : > { %5955 = vst [vmem:[#allocation6_spill] sm:$0xff] %v5301_v52  ;;  %v2181_v57 = vadd.f32 %v4966_v27, %v2180_v13  ;;  %v2182_v18 = vpop.f32.mrb[229].mxu0  ;;  %v2471_v29 = vpop.f32.mrb[229].mxu1  ;;  %v2857_v32 = vmul.f32 %v5301_v52, %v5301_v52  ;;  %v5310_v8 = vsub.f32 %v5061_v0, %v2730_v17  ;;  %v3900_v52 = vld [vmem:[%s4076_s26 + $0x190] sm:$0xff] }
 0x2cc   : > { %v2183_v4 = vpop.f32.mrb[230].mxu0  ;;  %v2472_v9 = vpop.f32.mrb[230].mxu1 }
 0x2cd   : > { %5956 = vst [vmem:[#allocation7_spill] sm:$0xff] %v5310_v8  ;;  %v2470_v59 = vadd.f32 %v2469_v2, %v2181_v57  ;;  %v2184_v14 = vadd.f32 %v4966_v27, %v2183_v4  ;;  %v2185_v12 = vpop.f32.mrb[231].mxu0  ;;  %v2474_v42 = vpop.f32.mrb[231].mxu1  ;;  %2933 = vadd.xlane.f32.xlu0 %v2857_v32  ;;  %v2858_v0 = vmul.f32 %v5310_v8, %v5310_v8  ;;  %v5326_v32 = vld [vmem:[%s5929_s4] ss:$0 sm:$0xff] }
 0x2ce   : > { %2686 = vadd.xlane.f32.xlu1 %v5307_v24  ;;  %v2617_v13 = vpop.xlane.xlu0 %2616 }
 0x2cf   : > { %v2473_v18 = vadd.f32 %v2472_v9, %v2184_v14  ;;  %v2731_v29 = vmul.f32 0.0078125, %v2617_v13  ;;  %v5315_v10 = vadd.f32 %v3900_v52, %v2470_v59 }
 0x2d0   : > { %v2619_v37 = vpop.xlane.xlu1 %2618 }
 0x2d1   : > { %v2732_v17 = vmul.f32 0.0078125, %v2619_v37  ;;  %2688 = vadd.xlane.f32.xlu0 %v5315_v10  ;;  %v5321_v27 = vsub.f32 %v5067_v43, %v2731_v29  ;;  %v3902_v43 = vld [vmem:[%s4076_s26 + $0x198] sm:$0xff] }
 0x2d2   : > { %2935 = vadd.xlane.f32.xlu1 %v2858_v0  ;;  %v2188_v2 = vpop.f32.mrb[232].mxu0  ;;  %v2477_v57 = vpop.f32.mrb[232].mxu1  ;;  %v5332_v12 = vadd.f32 %v3902_v43, %v2473_v18 }
 0x2d3   : > { %5957 = vst [vmem:[#allocation8_spill] sm:$0xff] %v5321_v27  ;;  %v2189_v52 = vadd.f32 %v5326_v32, %v2188_v2  ;;  %v2190_v4 = vpop.f32.mrb[233].mxu0  ;;  %v2479_v9 = vpop.f32.mrb[233].mxu1  ;;  %v2859_v28 = vmul.f32 %v5321_v27, %v5321_v27  ;;  %v5335_v42 = vsub.f32 %v5071_v6, %v2732_v17  ;;  %v3903_v27 = vld [vmem:[%s4076_s26 + $0x1a0] sm:$0xff] }
 0x2d4   : > { %v2191_v59 = vpop.f32.mrb[234].mxu0  ;;  %v2480_v14 = vpop.f32.mrb[234].mxu1 }
 0x2d5   : > { %5958 = vst [vmem:[#allocation9_spill] sm:$0xff] %v5335_v42  ;;  %v2478_v13 = vadd.f32 %v2477_v57, %v2189_v52  ;;  %v2192_v29 = vadd.f32 %v5326_v32, %v2191_v59  ;;  %v2193_v37 = vpop.f32.mrb[235].mxu0  ;;  %v2482_v0 = vpop.f32.mrb[235].mxu1  ;;  %2937 = vadd.xlane.f32.xlu0 %v2859_v28  ;;  %v2860_v6 = vmul.f32 %v5335_v42, %v5335_v42 }
 0x2d6   : > { %2690 = vadd.xlane.f32.xlu1 %v5332_v12  ;;  %v2621_v2 = vpop.xlane.xlu0 %2620  ;;  %v3904_v37 = vld [vmem:[%s4076_s26 + $0x1a8] sm:$0xff] }
 0x2d7   : > { %v2481_v4 = vadd.f32 %v2480_v14, %v2192_v29  ;;  %v2733_v9 = vmul.f32 0.0078125, %v2621_v2  ;;  %v5340_v8 = vadd.f32 %v3903_v27, %v2478_v13 }
 0x2d8   : > { %v2623_v18 = vpop.xlane.xlu1 %2622 }
 0x2d9   : > { %v2734_v17 = vmul.f32 0.0078125, %v2623_v18  ;;  %2692 = vadd.xlane.f32.xlu0 %v5340_v8  ;;  %v5346_v57 = vsub.f32 %v5077_v34, %v2733_v9  ;;  %v5352_v0 = vadd.f32 %v3904_v37, %v2481_v4 }
 0x2da   : > { %2939 = vadd.xlane.f32.xlu1 %v2860_v6  ;;  %v2196_v52 = vpop.f32.mrb[236].mxu0  ;;  %v2485_v28 = vpop.f32.mrb[236].mxu1 }
 0x2db   : > { %5959 = vst [vmem:[#allocation10_spill] sm:$0xff] %v5346_v57  ;;  %v2197_v59 = vadd.f32 %v5326_v32, %v2196_v52  ;;  %v2198_v14 = vpop.f32.mrb[237].mxu0  ;;  %v2487_v43 = vpop.f32.mrb[237].mxu1  ;;  %v2861_v27 = vmul.f32 %v5346_v57, %v5346_v57  ;;  %v5355_v2 = vsub.f32 %v5081_v39, %v2734_v17  ;;  %v3905_v57 = vld [vmem:[%s4076_s26 + $0x1b0] sm:$0xff] }
 0x2dc   : > { %v2199_v13 = vpop.f32.mrb[238].mxu0  ;;  %v2488_v29 = vpop.f32.mrb[238].mxu1 }
 0x2dd   : > { %5960 = vst [vmem:[#allocation11_spill] sm:$0xff] %v5355_v2  ;;  %v2486_v34 = vadd.f32 %v2485_v28, %v2197_v59  ;;  %v2200_v9 = vadd.f32 %v5326_v32, %v2199_v13  ;;  %v2201_v18 = vpop.f32.mrb[239].mxu0  ;;  %v2490_v6 = vpop.f32.mrb[239].mxu1  ;;  %2941 = vadd.xlane.f32.xlu0 %v2861_v27  ;;  %v2862_v39 = vmul.f32 %v5355_v2, %v5355_v2 }
 0x2de   : > { %2694 = vadd.xlane.f32.xlu1 %v5352_v0  ;;  %v2625_v52 = vpop.xlane.xlu0 %2624  ;;  %v3906_v18 = vld [vmem:[%s4076_s26 + $0x1b8] sm:$0xff] }
 0x2df   : > { %v2489_v14 = vadd.f32 %v2488_v29, %v2200_v9  ;;  %v2735_v43 = vmul.f32 0.0078125, %v2625_v52  ;;  %v5360_v42 = vadd.f32 %v3905_v57, %v2486_v34 }
 0x2e0   : > { %v2627_v4 = vpop.xlane.xlu1 %2626 }
 0x2e1   : > { %v2736_v17 = vmul.f32 0.0078125, %v2627_v4  ;;  %2696 = vadd.xlane.f32.xlu0 %v5360_v42  ;;  %v5366_v28 = vsub.f32 %v5087_v62, %v2735_v43  ;;  %v5372_v6 = vadd.f32 %v3906_v18, %v2489_v14 }
 0x2e2   : > { %2943 = vadd.xlane.f32.xlu1 %v2862_v39  ;;  %v2204_v59 = vpop.f32.mrb[240].mxu0  ;;  %v2493_v27 = vpop.f32.mrb[240].mxu1 }
 0x2e3   : > { %5961 = vst [vmem:[#allocation12_spill] sm:$0xff] %v5366_v28  ;;  %v2205_v13 = vadd.f32 %v5326_v32, %v2204_v59  ;;  %v2206_v29 = vpop.f32.mrb[241].mxu0  ;;  %v2495_v37 = vpop.f32.mrb[241].mxu1  ;;  %v2863_v57 = vmul.f32 %v5366_v28, %v5366_v28  ;;  %v5375_v52 = vsub.f32 %v5091_v55, %v2736_v17  ;;  %v3907_v28 = vld [vmem:[%s4076_s26 + $0x1c0] sm:$0xff] }
 0x2e4   : > { %v2207_v34 = vpop.f32.mrb[242].mxu0  ;;  %v2496_v9 = vpop.f32.mrb[242].mxu1 }
 0x2e5   : > { %5962 = vst [vmem:[#allocation13_spill] sm:$0xff] %v5375_v52  ;;  %v2494_v62 = vadd.f32 %v2493_v27, %v2205_v13  ;;  %v2208_v43 = vadd.f32 %v5326_v32, %v2207_v34  ;;  %v2209_v4 = vpop.f32.mrb[243].mxu0  ;;  %v2498_v39 = vpop.f32.mrb[243].mxu1  ;;  %2945 = vadd.xlane.f32.xlu0 %v2863_v57  ;;  %v2864_v55 = vmul.f32 %v5375_v52, %v5375_v52 }
 0x2e6   : > { %2698 = vadd.xlane.f32.xlu1 %v5372_v6  ;;  %v2629_v59 = vpop.xlane.xlu0 %2628  ;;  %v3908_v4 = vld [vmem:[%s4076_s26 + $0x1c8] sm:$0xff] }
 0x2e7   : > { %v2497_v29 = vadd.f32 %v2496_v9, %v2208_v43  ;;  %v2737_v37 = vmul.f32 0.0078125, %v2629_v59  ;;  %v5380_v2 = vadd.f32 %v3907_v28, %v2494_v62 }
 0x2e8   : > { %v2631_v14 = vpop.xlane.xlu1 %2630 }
 0x2e9   : > { %v2738_v17 = vmul.f32 0.0078125, %v2631_v14  ;;  %2700 = vadd.xlane.f32.xlu0 %v5380_v2  ;;  %v5386_v27 = vsub.f32 %v5097_v11, %v2737_v37  ;;  %v5392_v39 = vadd.f32 %v3908_v4, %v2497_v29 }
 0x2ea   : > { %2947 = vadd.xlane.f32.xlu1 %v2864_v55  ;;  %v2212_v13 = vpop.f32.mrb[244].mxu0  ;;  %v2501_v57 = vpop.f32.mrb[244].mxu1 }
 0x2eb   : > { %5963 = vst [vmem:[#allocation14_spill] sm:$0xff] %v5386_v27  ;;  %v2213_v34 = vadd.f32 %v5326_v32, %v2212_v13  ;;  %v2214_v9 = vpop.f32.mrb[245].mxu0  ;;  %v2503_v18 = vpop.f32.mrb[245].mxu1  ;;  %v2865_v28 = vmul.f32 %v5386_v27, %v5386_v27  ;;  %v5395_v59 = vsub.f32 %v5101_v44, %v2738_v17  ;;  %v3909_v27 = vld [vmem:[%s4076_s26 + $0x1d0] sm:$0xff] }
 0x2ec   : > { %v2215_v62 = vpop.f32.mrb[246].mxu0  ;;  %v2504_v43 = vpop.f32.mrb[246].mxu1 }
 0x2ed   : > { %5964 = vst [vmem:[#allocation15_spill] sm:$0xff] %v5395_v59  ;;  %v2502_v11 = vadd.f32 %v2501_v57, %v2213_v34  ;;  %v2216_v37 = vadd.f32 %v5326_v32, %v2215_v62  ;;  %v2217_v14 = vpop.f32.mrb[247].mxu0  ;;  %v2506_v55 = vpop.f32.mrb[247].mxu1  ;;  %2949 = vadd.xlane.f32.xlu0 %v2865_v28  ;;  %v2866_v44 = vmul.f32 %v5395_v59, %v5395_v59 }
 0x2ee   : > { %2702 = vadd.xlane.f32.xlu1 %v5392_v39  ;;  %v2633_v13 = vpop.xlane.xlu0 %2632  ;;  %v3910_v14 = vld [vmem:[%s4076_s26 + $0x1d8] sm:$0xff] }
 0x2ef   : > { %v2505_v9 = vadd.f32 %v2504_v43, %v2216_v37  ;;  %v2739_v18 = vmul.f32 0.0078125, %v2633_v13  ;;  %v5400_v52 = vadd.f32 %v3909_v27, %v2502_v11 }
 0x2f0   : > { %v2635_v29 = vpop.xlane.xlu1 %2634 }
 0x2f1   : > { %v2740_v17 = vmul.f32 0.0078125, %v2635_v29  ;;  %2704 = vadd.xlane.f32.xlu0 %v5400_v52  ;;  %v5406_v57 = vsub.f32 %v5107_v40, %v2739_v18  ;;  %v5412_v55 = vadd.f32 %v3910_v14, %v2505_v9 }
 0x2f2   : > { %2951 = vadd.xlane.f32.xlu1 %v2866_v44  ;;  %v2220_v34 = vpop.f32.mrb[248].mxu0  ;;  %v2509_v28 = vpop.f32.mrb[248].mxu1 }
 0x2f3   : > { %5965 = vst [vmem:[#allocation16_spill] sm:$0xff] %v5406_v57  ;;  %v2221_v62 = vadd.f32 %v5326_v32, %v2220_v34  ;;  %v2222_v43 = vpop.f32.mrb[249].mxu0  ;;  %v2511_v4 = vpop.f32.mrb[249].mxu1  ;;  %v2867_v27 = vmul.f32 %v5406_v57, %v5406_v57  ;;  %5966 = vst [vmem:[#allocation17_spill] sm:$0xff] %v5412_v55  ;;  %v5415_v13 = vsub.f32 %v5111_v5, %v2740_v17 }
 0x2f4   : > { %v2223_v11 = vpop.f32.mrb[250].mxu0  ;;  %v2512_v37 = vpop.f32.mrb[250].mxu1  ;;  %v3911_v43 = vld [vmem:[%s4076_s26 + $0x1e0] sm:$0xff] }
 0x2f5   : > { %5967 = vst [vmem:[#allocation18_spill] sm:$0xff] %v5415_v13  ;;  %v2510_v40 = vadd.f32 %v2509_v28, %v2221_v62  ;;  %v2224_v18 = vadd.f32 %v5326_v32, %v2223_v11  ;;  %v2225_v29 = vpop.f32.mrb[251].mxu0  ;;  %v2514_v44 = vpop.f32.mrb[251].mxu1  ;;  %2953 = vadd.xlane.f32.xlu0 %v2867_v27  ;;  %v2868_v9 = vmul.f32 %v5415_v13, %v5415_v13 }
 0x2f6   : > { %2706 = vadd.xlane.f32.xlu1 %v5412_v55  ;;  %v2637_v57 = vpop.xlane.xlu0 %2636  ;;  %v3913_v55 = vld [vmem:[%s4076_s26 + $0x1f0] sm:$0xff] }
 0x2f7   : > { %v2513_v34 = vadd.f32 %v2512_v37, %v2224_v18  ;;  %v5420_v4 = vadd.f32 %v3911_v43, %v2510_v40  ;;  %v2741_v28 = vmul.f32 0.0078125, %v2637_v57  ;;  %v3912_v40 = vld [vmem:[%s4076_s26 + $0x1e8] sm:$0xff] }
 0x2f8   : > { %v2639_v14 = vpop.xlane.xlu1 %2638 }
 0x2f9   : > { %5968 = vst [vmem:[#allocation19_spill] sm:$0xff] %v5420_v4  ;;  %2708 = vadd.xlane.f32.xlu0 %v5420_v4  ;;  %v5427_v29 = vadd.f32 %v3912_v40, %v2513_v34  ;;  %v2742_v44 = vmul.f32 0.0078125, %v2639_v14  ;;  %v3914_v14 = vld [vmem:[%s4076_s26 + $0x1f8] sm:$0xff] }
 0x2fa   : > { %2955 = vadd.xlane.f32.xlu1 %v2868_v9  ;;  %v2228_v5 = vpop.f32.mrb[252].mxu0  ;;  %v2517_v17 = vpop.f32.mrb[252].mxu1 }
 0x2fb   : > { %v2229_v62 = vadd.f32 %v5326_v32, %v2228_v5  ;;  %v2230_v27 = vpop.f32.mrb[253].mxu0  ;;  %v2519_v11 = vpop.f32.mrb[253].mxu1 }
 0x2fc   : > { %v2231_v37 = vpop.f32.mrb[254].mxu0  ;;  %v2520_v18 = vpop.f32.mrb[254].mxu1  ;;  %v5435_v11 = vsub.f32 %v5117_v61, %v2741_v28 }
 0x2fd   : > { %v2518_v43 = vadd.f32 %v2517_v17, %v2229_v62  ;;  %v2232_v13 = vadd.f32 %v5326_v32, %v2231_v37  ;;  %v2233_v59 = vpop.f32.mrb[255].mxu0  ;;  %v2522_v9 = vpop.f32.mrb[255].mxu1  ;;  %v5442_v32 = vsub.f32 %v5121_v1, %v2742_v44 }
 0x2fe   : > { %2710 = vadd.xlane.f32.xlu1 %v5427_v29  ;;  %v2641_v57 = vpop.xlane.xlu0 %2640  ;;  %v2869_v59 = vmul.f32 %v5435_v11, %v5435_v11 }
 0x2ff   : > { %v2521_v4 = vadd.f32 %v2520_v18, %v2232_v13  ;;  %v2743_v5 = vmul.f32 0.0078125, %v2641_v57  ;;  %v5432_v27 = vadd.f32 %v3913_v55, %v2518_v43  ;;  %v2870_v61 = vmul.f32 %v5442_v32, %v5442_v32 }
 0x300   : > { %v2643_v34 = vpop.xlane.xlu1 %2642 }
 0x301   : > { %v2744_v40 = vmul.f32 0.0078125, %v2643_v34  ;;  %2712 = vadd.xlane.f32.xlu0 %v5432_v27  ;;  %v5439_v17 = vadd.f32 %v3914_v14, %v2521_v4  ;;  %v5448_v55 = vsub.f32 %v5127_v46, %v2743_v5 }
 0x303   : > { %2714 = vadd.xlane.f32.xlu1 %v5439_v17  ;;  %v5453_v13 = vsub.f32 %v5131_v36, %v2744_v40  ;;  %v2871_v1 = vmul.f32 %v5448_v55, %v5448_v55 }
 0x305   : > { %2957 = vadd.xlane.f32.xlu0 %v2869_v59  ;;  %v2872_v46 = vmul.f32 %v5453_v13, %v5453_v13 }
 0x306   : > { %v2645_v4 = vpop.xlane.xlu0 %2644 }
 0x307   : > { %v2745_v28 = vmul.f32 0.0078125, %v2645_v4  ;;  %2959 = vadd.xlane.f32.xlu1 %v2870_v61 }
 0x308   : > { %v2647_v62 = vpop.xlane.xlu1 %2646 }
 0x309   : > { %v2746_v37 = vmul.f32 0.0078125, %v2647_v62  ;;  %2961 = vadd.xlane.f32.xlu0 %v2871_v1  ;;  %v5460_v18 = vsub.f32 %v5137_v16, %v2745_v28 }
 0x30b   : > { %2963 = vadd.xlane.f32.xlu1 %v2872_v46  ;;  %v2873_v36 = vmul.f32 %v5460_v18, %v5460_v18  ;;  %v5465_v44 = vsub.f32 %v5141_v53, %v2746_v37 }
 0x30d   : > { %2965 = vadd.xlane.f32.xlu0 %v2873_v36  ;;  %v2874_v43 = vmul.f32 %v5465_v44, %v5465_v44 }
 0x30e   : > { %v2649_v9 = vpop.xlane.xlu0 %2648 }
 0x30f   : > { %v2747_v57 = vmul.f32 0.0078125, %v2649_v9  ;;  %2967 = vadd.xlane.f32.xlu1 %v2874_v43 }
 0x310   : > { %v2651_v5 = vpop.xlane.xlu1 %2650 }
 0x311   : > { %v5470_v34 = vsub.f32 %v5147_v30, %v2747_v57  ;;  %v2748_v16 = vmul.f32 0.0078125, %v2651_v5 }
 0x313   : > { %v5473_v40 = vsub.f32 %v5151_v20, %v2748_v16  ;;  %v2875_v14 = vmul.f32 %v5470_v34, %v5470_v34 }
 0x315   : > { %2969 = vadd.xlane.f32.xlu0 %v2875_v14  ;;  %v2876_v53 = vmul.f32 %v5473_v40, %v5473_v40 }
 0x316   : > { %v2653_v59 = vpop.xlane.xlu0 %2652 }
 0x317   : > { %v2749_v61 = vmul.f32 0.0078125, %v2653_v59  ;;  %2971 = vadd.xlane.f32.xlu1 %v2876_v53 }
 0x318   : > { %v2655_v4 = vpop.xlane.xlu1 %2654 }
 0x319   : > { %v5480_v28 = vsub.f32 %v5157_v22, %v2749_v61  ;;  %v2750_v30 = vmul.f32 0.0078125, %v2655_v4 }
 0x31b   : > { %v5483_v1 = vsub.f32 %v5161_v23, %v2750_v30  ;;  %v2877_v20 = vmul.f32 %v5480_v28, %v5480_v28 }
 0x31d   : > { %2973 = vadd.xlane.f32.xlu0 %v2877_v20  ;;  %v2878_v62 = vmul.f32 %v5483_v1, %v5483_v1 }
 0x31e   : > { %v2657_v37 = vpop.xlane.xlu0 %2656 }
 0x31f   : > { %v2751_v46 = vmul.f32 0.0078125, %v2657_v37  ;;  %2975 = vadd.xlane.f32.xlu1 %v2878_v62 }
 0x320   : > { %v2659_v36 = vpop.xlane.xlu1 %2658 }
 0x321   : > { %v5490_v43 = vsub.f32 %v5167_v31, %v2751_v46  ;;  %v2752_v22 = vmul.f32 0.0078125, %v2659_v36 }
 0x323   : > { %v5493_v9 = vsub.f32 %v5171_v21, %v2752_v22  ;;  %v2879_v23 = vmul.f32 %v5490_v43, %v5490_v43 }
 0x325   : > { %2977 = vadd.xlane.f32.xlu0 %v2879_v23  ;;  %v2880_v57 = vmul.f32 %v5493_v9, %v5493_v9 }
 0x326   : > { %v2661_v5 = vpop.xlane.xlu0 %2660 }
 0x327   : > { %v2753_v16 = vmul.f32 0.0078125, %v2661_v5  ;;  %2979 = vadd.xlane.f32.xlu1 %v2880_v57 }
 0x328   : > { %v2663_v14 = vpop.xlane.xlu1 %2662 }
 0x329   : > { %v5500_v53 = vsub.f32 %v5177_v63, %v2753_v16  ;;  %v2754_v31 = vmul.f32 0.0078125, %v2663_v14 }
 0x32a   : > { %v2910_v59 = vpop.xlane.xlu0 %2909 }
 0x32b   : > { %v5503_v61 = vsub.f32 %v5181_v60, %v2754_v31  ;;  %v3037_v21 = vmul.f32 0.0078125, %v2910_v59  ;;  %v2881_v4 = vmul.f32 %v5500_v53, %v5500_v53 }
 0x32d   : > { %v3101_v30 = vadd.f32 1e-05, %v3037_v21  ;;  %2981 = vadd.xlane.f32.xlu0 %v2881_v4  ;;  %v2882_v20 = vmul.f32 %v5503_v61, %v5503_v61 }
 0x32e   : > { %v2665_v62 = vpop.xlane.xlu0 %2664 }
 0x32f   : > { %3722 = vrsqrt.f32 %v3101_v30  ;;  %v2912_v37 = vpop.xlane.xlu1 %2911  ;;  %v2755_v46 = vmul.f32 0.0078125, %v2665_v62  ;;  %2983 = vadd.xlane.f32.xlu1 %v2882_v20  ;;  %v5522_v62 = vld [vmem:[%s5930_s5] ss:$0 sm:$0xff] }
 0x330   : > { %v3038_v63 = vmul.f32 0.0078125, %v2912_v37 }
 0x331   : > { %v5510_v36 = vsub.f32 %v5195_v47, %v2755_v46 }
 0x332   : > { %v3102_v60 = vadd.f32 1e-05, %v3038_v63  ;;  %v2914_v22 = vpop.xlane.xlu0 %2913 }
 0x333   : > { %v2667_v23 = vpop.xlane.xlu1 %2666  ;;  %v3039_v57 = vmul.f32 0.0078125, %v2914_v22  ;;  %v2883_v5 = vmul.f32 %v5510_v36, %v5510_v36 }
 0x334   : > { %3724 = vrsqrt.f32 %v3102_v60  ;;  %v2756_v16 = vmul.f32 0.0078125, %v2667_v23  ;;  %v5531_v60 = vld [vmem:[%s5931_s6] ss:$0 sm:$0xff] }
 0x335   : > { %v3103_v14 = vadd.f32 1e-05, %v3039_v57  ;;  %2985 = vadd.xlane.f32.xlu0 %v2883_v5 }
 0x336   : > { %v5515_v31 = vsub.f32 %v5207_v26, %v2756_v16  ;;  %v2669_v59 = vpop.xlane.xlu0 %2668 }
 0x337   : > { %3726 = vrsqrt.f32 %v3103_v14  ;;  %v2916_v21 = vpop.xlane.xlu1 %2915  ;;  %v2757_v4 = vmul.f32 0.0078125, %v2669_v59 }
 0x338   : > { %v3040_v47 = vmul.f32 0.0078125, %v2916_v21  ;;  %v2884_v30 = vmul.f32 %v5515_v31, %v5515_v31 }
 0x339   : > { %v3723_v20 = vpop.eup %3722  ;;  %v5525_v37 = vsub.f32 %v5215_v19, %v2757_v4 }
 0x33a   : > { %v3229_v26 = vmul.f32 %v3723_v20, %v5184_v7  ;;  %v3104_v46 = vadd.f32 1e-05, %v3040_v47  ;;  %2987 = vadd.xlane.f32.xlu1 %v2884_v30  ;;  %v2918_v63 = vpop.xlane.xlu0 %2917 }
 0x33b   : > { %v2671_v22 = vpop.xlane.xlu1 %2670  ;;  %v3041_v23 = vmul.f32 0.0078125, %v2918_v63  ;;  %v2885_v57 = vmul.f32 %v5525_v37, %v5525_v37 }
 0x33c   : > { %v3300_v5 = vmul.f32 %v5522_v62, %v3229_v26  ;;  %3728 = vrsqrt.f32 %v3104_v46  ;;  %v2758_v19 = vmul.f32 0.0078125, %v2671_v22 }
 0x33d   : > { %v3105_v7 = vadd.f32 1e-05, %v3041_v23  ;;  %2989 = vadd.xlane.f32.xlu0 %v2885_v57 }
 0x33e   : > { %v3725_v16 = vpop.eup %3724  ;;  %v3371_v14 = vadd.f32 %v5531_v60, %v3300_v5  ;;  %v5545_v59 = vsub.f32 %v5227_v15, %v2758_v19  ;;  %v2673_v21 = vpop.xlane.xlu0 %2672 }
 0x33f   : > { %v3230_v4 = vmul.f32 %v3725_v16, %v5192_v51  ;;  %3730 = vrsqrt.f32 %v3105_v7  ;;  %v2920_v47 = vpop.xlane.xlu1 %2919  ;;  %v2759_v30 = vmul.f32 0.0078125, %v2673_v21 }
 0x340   : > { %3435 = vst [vmem:[%s5541_s30] sm:$0xff] %v3371_v14  ;;  %v3042_v20 = vmul.f32 0.0078125, %v2920_v47  ;;  %v2886_v26 = vmul.f32 %v5545_v59, %v5545_v59 }
 0x341   : > { %v3727_v46 = vpop.eup %3726  ;;  %v3301_v63 = vmul.f32 %v5522_v62, %v3230_v4  ;;  %v5553_v22 = vsub.f32 %v5235_v48, %v2759_v30 }
 0x342   : > { %v3231_v15 = vmul.f32 %v3727_v46, %v5201_v49  ;;  %v3106_v23 = vadd.f32 1e-05, %v3042_v20  ;;  %2991 = vadd.xlane.f32.xlu1 %v2886_v26  ;;  %v2922_v51 = vpop.xlane.xlu0 %2921 }
 0x343   : > { %v3372_v57 = vadd.f32 %v5531_v60, %v3301_v63  ;;  %v2675_v5 = vpop.xlane.xlu1 %2674  ;;  %v3043_v19 = vmul.f32 0.0078125, %v2922_v51  ;;  %v2887_v7 = vmul.f32 %v5553_v22, %v5553_v22 }
 0x344   : > { %v3302_v16 = vmul.f32 %v5522_v62, %v3231_v15  ;;  %3732 = vrsqrt.f32 %v3106_v23  ;;  %v2760_v14 = vmul.f32 0.0078125, %v2675_v5 }
 0x345   : > { %3436 = vst [vmem:[%s5541_s30 + $0x8] sm:$0xff] %v3372_v57  ;;  %v3107_v48 = vadd.f32 1e-05, %v3043_v19  ;;  %2993 = vadd.xlane.f32.xlu0 %v2887_v7 }
 0x346   : > { %v3729_v21 = vpop.eup %3728  ;;  %v3373_v49 = vadd.f32 %v5531_v60, %v3302_v16  ;;  %v5563_v4 = vsub.f32 %v5247_v54, %v2760_v14  ;;  %v2677_v47 = vpop.xlane.xlu0 %2676 }
 0x347   : > { %v3232_v30 = vmul.f32 %v3729_v21, %v5212_v50  ;;  %3734 = vrsqrt.f32 %v3107_v48  ;;  %v2924_v20 = vpop.xlane.xlu1 %2923  ;;  %v2761_v26 = vmul.f32 0.0078125, %v2677_v47 }
 0x348   : > { %3437 = vst [vmem:[%s5541_s30 + $0x10] sm:$0xff] %v3373_v49  ;;  %v3044_v46 = vmul.f32 0.0078125, %v2924_v20  ;;  %v2888_v63 = vmul.f32 %v5563_v4, %v5563_v4 }
 0x349   : > { %v3731_v15 = vpop.eup %3730  ;;  %v3303_v23 = vmul.f32 %v5522_v62, %v3232_v30  ;;  %v5571_v51 = vsub.f32 %v5255_v3, %v2761_v26 }
 0x34a   : > { %v3233_v54 = vmul.f32 %v3731_v15, %v5221_v58  ;;  %v3108_v57 = vadd.f32 1e-05, %v3044_v46  ;;  %2995 = vadd.xlane.f32.xlu1 %v2888_v63  ;;  %v2926_v50 = vpop.xlane.xlu0 %2925 }
 0x34b   : > { %v3374_v5 = vadd.f32 %v5531_v60, %v3303_v23  ;;  %v2679_v19 = vpop.xlane.xlu1 %2678  ;;  %v3045_v7 = vmul.f32 0.0078125, %v2926_v50  ;;  %v2889_v16 = vmul.f32 %v5571_v51, %v5571_v51 }
 0x34c   : > { %v3304_v14 = vmul.f32 %v5522_v62, %v3233_v54  ;;  %3736 = vrsqrt.f32 %v3108_v57  ;;  %v2762_v48 = vmul.f32 0.0078125, %v2679_v19 }
 0x34d   : > { %3438 = vst [vmem:[%s5541_s30 + $0x18] sm:$0xff] %v3374_v5  ;;  %v3109_v3 = vadd.f32 1e-05, %v3045_v7  ;;  %2997 = vadd.xlane.f32.xlu0 %v2889_v16 }
 0x34e   : > { %v3733_v21 = vpop.eup %3732  ;;  %v3375_v58 = vadd.f32 %v5531_v60, %v3304_v14  ;;  %v5581_v49 = vsub.f32 %v5267_v41, %v2762_v48  ;;  %v2681_v47 = vpop.xlane.xlu0 %2680 }
 0x34f   : > { %v3234_v30 = vmul.f32 %v3733_v21, %v5230_v38  ;;  %3738 = vrsqrt.f32 %v3109_v3  ;;  %v2928_v20 = vpop.xlane.xlu1 %2927  ;;  %v2763_v26 = vmul.f32 0.0078125, %v2681_v47 }
 0x350   : > { %3439 = vst [vmem:[%s5541_s30 + $0x20] sm:$0xff] %v3375_v58  ;;  %v3046_v46 = vmul.f32 0.0078125, %v2928_v20  ;;  %v2890_v63 = vmul.f32 %v5581_v49, %v5581_v49 }
 0x351   : > { %v3735_v15 = vpop.eup %3734  ;;  %v3305_v23 = vmul.f32 %v5522_v62, %v3234_v30  ;;  %v5589_v54 = vsub.f32 %v5275_v56, %v2763_v26 }
 0x352   : > { %v3235_v41 = vmul.f32 %v3735_v15, %v5241_v45  ;;  %v3110_v57 = vadd.f32 1e-05, %v3046_v46  ;;  %2999 = vadd.xlane.f32.xlu1 %v2890_v63  ;;  %v2930_v38 = vpop.xlane.xlu0 %2929 }
 0x353   : > { %v3376_v50 = vadd.f32 %v5531_v60, %v3305_v23  ;;  %v2683_v5 = vpop.xlane.xlu1 %2682  ;;  %v3047_v19 = vmul.f32 0.0078125, %v2930_v38  ;;  %v2891_v7 = vmul.f32 %v5589_v54, %v5589_v54 }
 0x354   : > { %v3306_v16 = vmul.f32 %v5522_v62, %v3235_v41  ;;  %3740 = vrsqrt.f32 %v3110_v57  ;;  %v2764_v14 = vmul.f32 0.0078125, %v2683_v5 }
 0x355   : > { %3440 = vst [vmem:[%s5541_s30 + $0x28] sm:$0xff] %v3376_v50  ;;  %v3111_v56 = vadd.f32 1e-05, %v3047_v19  ;;  %3001 = vadd.xlane.f32.xlu0 %v2891_v7 }
 0x356   : > { %v3737_v48 = vpop.eup %3736  ;;  %v3377_v45 = vadd.f32 %v5531_v60, %v3306_v16  ;;  %v5599_v3 = vsub.f32 %v5287_v33, %v2764_v14  ;;  %v2685_v21 = vpop.xlane.xlu0 %2684  ;;  %v5969_v33 = vld [vmem:[#allocation2_spill] sm:$0xff] }
 0x357   : > { %v3236_v58 = vmul.f32 %v3737_v48, %v5250_v25  ;;  %3742 = vrsqrt.f32 %v3111_v56  ;;  %v2932_v47 = vpop.xlane.xlu1 %2931  ;;  %v2765_v30 = vmul.f32 0.0078125, %v2685_v21 }
 0x358   : > { %3441 = vst [vmem:[%s5541_s30 + $0x30] sm:$0xff] %v3377_v45  ;;  %v3048_v20 = vmul.f32 0.0078125, %v2932_v47  ;;  %v2892_v26 = vmul.f32 %v5599_v3, %v5599_v3  ;;  %v5970_v45 = vld [vmem:[#allocation3_spill] sm:$0xff] }
 0x359   : > { %v3739_v46 = vpop.eup %3738  ;;  %v3307_v63 = vmul.f32 %v5522_v62, %v3236_v58  ;;  %v5607_v15 = vsub.f32 %v5295_v35, %v2765_v30 }
 0x35a   : > { %v3237_v23 = vmul.f32 %v3739_v46, %v5969_v33  ;;  %v3112_v41 = vadd.f32 1e-05, %v3048_v20  ;;  %3003 = vadd.xlane.f32.xlu1 %v2892_v26  ;;  %v2934_v25 = vpop.xlane.xlu0 %2933 }
 0x35b   : > { %v3378_v57 = vadd.f32 %v5531_v60, %v3307_v63  ;;  %v2687_v38 = vpop.xlane.xlu1 %2686  ;;  %v3049_v50 = vmul.f32 0.0078125, %v2934_v25  ;;  %v2893_v5 = vmul.f32 %v5607_v15, %v5607_v15 }
 0x35c   : > { %v3308_v19 = vmul.f32 %v5522_v62, %v3237_v23  ;;  %3744 = vrsqrt.f32 %v3112_v41  ;;  %v2766_v7 = vmul.f32 0.0078125, %v2687_v38 }
 0x35d   : > { %3442 = vst [vmem:[%s5541_s30 + $0x38] sm:$0xff] %v3378_v57  ;;  %v3113_v35 = vadd.f32 1e-05, %v3049_v50  ;;  %3005 = vadd.xlane.f32.xlu0 %v2893_v5 }
 0x35e   : > { %v3741_v16 = vpop.eup %3740  ;;  %v3379_v14 = vadd.f32 %v5531_v60, %v3308_v19  ;;  %v5617_v56 = vsub.f32 %v5307_v24, %v2766_v7  ;;  %v2689_v48 = vpop.xlane.xlu0 %2688  ;;  %v5971_v24 = vld [vmem:[#allocation4_spill] sm:$0xff] }
 0x35f   : > { %v3238_v21 = vmul.f32 %v3741_v16, %v5970_v45  ;;  %3746 = vrsqrt.f32 %v3113_v35  ;;  %v2936_v58 = vpop.xlane.xlu1 %2935  ;;  %v2767_v47 = vmul.f32 0.0078125, %v2689_v48  ;;  %v5972_v48 = vld [vmem:[#allocation5_spill] sm:$0xff] }
 0x360   : > { %3443 = vst [vmem:[%s5541_s30 + $0x40] sm:$0xff] %v3379_v14  ;;  %v3050_v30 = vmul.f32 0.0078125, %v2936_v58  ;;  %v2894_v20 = vmul.f32 %v5617_v56, %v5617_v56 }
 0x361   : > { %v3743_v26 = vpop.eup %3742  ;;  %v3309_v46 = vmul.f32 %v5522_v62, %v3238_v21  ;;  %v5625_v63 = vsub.f32 %v5315_v10, %v2767_v47 }
 0x362   : > { %v3239_v33 = vmul.f32 %v3743_v26, %v5971_v24  ;;  %v3114_v23 = vadd.f32 1e-05, %v3050_v30  ;;  %3007 = vadd.xlane.f32.xlu1 %v2894_v20  ;;  %v2938_v41 = vpop.xlane.xlu0 %2937 }
 0x363   : > { %v3380_v25 = vadd.f32 %v5531_v60, %v3309_v46  ;;  %v2691_v57 = vpop.xlane.xlu1 %2690  ;;  %v3051_v38 = vmul.f32 0.0078125, %v2938_v41  ;;  %v2895_v50 = vmul.f32 %v5625_v63, %v5625_v63 }
 0x364   : > { %v3310_v5 = vmul.f32 %v5522_v62, %v3239_v33  ;;  %3748 = vrsqrt.f32 %v3114_v23  ;;  %v2768_v19 = vmul.f32 0.0078125, %v2691_v57 }
 0x365   : > { %3444 = vst [vmem:[%s5541_s30 + $0x48] sm:$0xff] %v3380_v25  ;;  %v3115_v10 = vadd.f32 1e-05, %v3051_v38  ;;  %3009 = vadd.xlane.f32.xlu0 %v2895_v50 }
 0x366   : > { %v3745_v7 = vpop.eup %3744  ;;  %v3381_v35 = vadd.f32 %v5531_v60, %v3310_v5  ;;  %v5635_v16 = vsub.f32 %v5332_v12, %v2768_v19  ;;  %v2693_v14 = vpop.xlane.xlu0 %2692  ;;  %v5973_v12 = vld [vmem:[#allocation6_spill] sm:$0xff] }
 0x367   : > { %v3240_v45 = vmul.f32 %v3745_v7, %v5972_v48  ;;  %3750 = vrsqrt.f32 %v3115_v10  ;;  %v2940_v21 = vpop.xlane.xlu1 %2939  ;;  %v2769_v58 = vmul.f32 0.0078125, %v2693_v14  ;;  %v5974_v14 = vld [vmem:[#allocation7_spill] sm:$0xff] }
 0x368   : > { %3445 = vst [vmem:[%s5541_s30 + $0x50] sm:$0xff] %v3381_v35  ;;  %v3052_v47 = vmul.f32 0.0078125, %v2940_v21  ;;  %v2896_v30 = vmul.f32 %v5635_v16, %v5635_v16 }
 0x369   : > { %v3747_v20 = vpop.eup %3746  ;;  %v3311_v26 = vmul.f32 %v5522_v62, %v3240_v45  ;;  %v5643_v46 = vsub.f32 %v5340_v8, %v2769_v58 }
 0x36a   : > { %v3241_v24 = vmul.f32 %v3747_v20, %v5973_v12  ;;  %v3116_v33 = vadd.f32 1e-05, %v3052_v47  ;;  %3011 = vadd.xlane.f32.xlu1 %v2896_v30  ;;  %v2942_v23 = vpop.xlane.xlu0 %2941 }
 0x36b   : > { %v3382_v41 = vadd.f32 %v5531_v60, %v3311_v26  ;;  %v2695_v25 = vpop.xlane.xlu1 %2694  ;;  %v3053_v57 = vmul.f32 0.0078125, %v2942_v23  ;;  %v2897_v38 = vmul.f32 %v5643_v46, %v5643_v46 }
 0x36c   : > { %v3312_v50 = vmul.f32 %v5522_v62, %v3241_v24  ;;  %3752 = vrsqrt.f32 %v3116_v33  ;;  %v2770_v5 = vmul.f32 0.0078125, %v2695_v25 }
 0x36d   : > { %3446 = vst [vmem:[%s5541_s30 + $0x58] sm:$0xff] %v3382_v41  ;;  %v3117_v8 = vadd.f32 1e-05, %v3053_v57  ;;  %3013 = vadd.xlane.f32.xlu0 %v2897_v38 }
 0x36e   : > { %v3749_v19 = vpop.eup %3748  ;;  %v3383_v10 = vadd.f32 %v5531_v60, %v3312_v50  ;;  %v5653_v7 = vsub.f32 %v5352_v0, %v2770_v5  ;;  %v2697_v35 = vpop.xlane.xlu0 %2696  ;;  %v5975_v0 = vld [vmem:[#allocation8_spill] sm:$0xff] }
 0x36f   : > { %v3242_v48 = vmul.f32 %v3749_v19, %v5974_v14  ;;  %3754 = vrsqrt.f32 %v3117_v8  ;;  %v2944_v45 = vpop.xlane.xlu1 %2943  ;;  %v2771_v21 = vmul.f32 0.0078125, %v2697_v35  ;;  %v5976_v35 = vld [vmem:[#allocation9_spill] sm:$0xff] }
 0x370   : > { %3447 = vst [vmem:[%s5541_s30 + $0x60] sm:$0xff] %v3383_v10  ;;  %v3054_v58 = vmul.f32 0.0078125, %v2944_v45  ;;  %v2898_v47 = vmul.f32 %v5653_v7, %v5653_v7 }
 0x371   : > { %v3751_v30 = vpop.eup %3750  ;;  %v3313_v20 = vmul.f32 %v5522_v62, %v3242_v48  ;;  %v5661_v26 = vsub.f32 %v5360_v42, %v2771_v21 }
 0x372   : > { %v3243_v12 = vmul.f32 %v3751_v30, %v5975_v0  ;;  %v3118_v24 = vadd.f32 1e-05, %v3054_v58  ;;  %3015 = vadd.xlane.f32.xlu1 %v2898_v47  ;;  %v2946_v33 = vpop.xlane.xlu0 %2945 }
 0x373   : > { %v3384_v23 = vadd.f32 %v5531_v60, %v3313_v20  ;;  %v2699_v41 = vpop.xlane.xlu1 %2698  ;;  %v3055_v25 = vmul.f32 0.0078125, %v2946_v33  ;;  %v2899_v57 = vmul.f32 %v5661_v26, %v5661_v26 }
 0x374   : > { %v3314_v38 = vmul.f32 %v5522_v62, %v3243_v12  ;;  %3756 = vrsqrt.f32 %v3118_v24  ;;  %v2772_v50 = vmul.f32 0.0078125, %v2699_v41 }
 0x375   : > { %3448 = vst [vmem:[%s5541_s30 + $0x68] sm:$0xff] %v3384_v23  ;;  %v3119_v42 = vadd.f32 1e-05, %v3055_v25  ;;  %3017 = vadd.xlane.f32.xlu0 %v2899_v57 }
 0x376   : > { %v3753_v5 = vpop.eup %3752  ;;  %v3385_v8 = vadd.f32 %v5531_v60, %v3314_v38  ;;  %v5671_v19 = vsub.f32 %v5372_v6, %v2772_v50  ;;  %v2701_v10 = vpop.xlane.xlu0 %2700  ;;  %v5977_v6 = vld [vmem:[#allocation10_spill] sm:$0xff] }
 0x377   : > { %v3244_v14 = vmul.f32 %v3753_v5, %v5976_v35  ;;  %3758 = vrsqrt.f32 %v3119_v42  ;;  %v2948_v48 = vpop.xlane.xlu1 %2947  ;;  %v2773_v45 = vmul.f32 0.0078125, %v2701_v10  ;;  %v5978_v10 = vld [vmem:[#allocation11_spill] sm:$0xff] }
 0x378   : > { %3449 = vst [vmem:[%s5541_s30 + $0x70] sm:$0xff] %v3385_v8  ;;  %v3056_v21 = vmul.f32 0.0078125, %v2948_v48  ;;  %v2900_v58 = vmul.f32 %v5671_v19, %v5671_v19 }
 0x379   : > { %v3755_v47 = vpop.eup %3754  ;;  %v3315_v30 = vmul.f32 %v5522_v62, %v3244_v14  ;;  %v5679_v20 = vsub.f32 %v5380_v2, %v2773_v45 }
 0x37a   : > { %v3245_v0 = vmul.f32 %v3755_v47, %v5977_v6  ;;  %v3120_v12 = vadd.f32 1e-05, %v3056_v21  ;;  %3019 = vadd.xlane.f32.xlu1 %v2900_v58  ;;  %v2950_v24 = vpop.xlane.xlu0 %2949 }
 0x37b   : > { %v3386_v33 = vadd.f32 %v5531_v60, %v3315_v30  ;;  %v2703_v23 = vpop.xlane.xlu1 %2702  ;;  %v3057_v41 = vmul.f32 0.0078125, %v2950_v24  ;;  %v2901_v25 = vmul.f32 %v5679_v20, %v5679_v20 }
 0x37c   : > { %v3316_v57 = vmul.f32 %v5522_v62, %v3245_v0  ;;  %3760 = vrsqrt.f32 %v3120_v12  ;;  %v2774_v38 = vmul.f32 0.0078125, %v2703_v23 }
 0x37d   : > { %3450 = vst [vmem:[%s5541_s30 + $0x78] sm:$0xff] %v3386_v33  ;;  %v3121_v2 = vadd.f32 1e-05, %v3057_v41  ;;  %3021 = vadd.xlane.f32.xlu0 %v2901_v25 }
 0x37e   : > { %v3757_v50 = vpop.eup %3756  ;;  %v3387_v42 = vadd.f32 %v5531_v60, %v3316_v57  ;;  %v5689_v5 = vsub.f32 %v5392_v39, %v2774_v38  ;;  %v2705_v8 = vpop.xlane.xlu0 %2704  ;;  %v5979_v39 = vld [vmem:[#allocation12_spill] sm:$0xff] }
 0x37f   : > { %v3246_v35 = vmul.f32 %v3757_v50, %v5978_v10  ;;  %3762 = vrsqrt.f32 %v3121_v2  ;;  %v2952_v14 = vpop.xlane.xlu1 %2951  ;;  %v2775_v48 = vmul.f32 0.0078125, %v2705_v8  ;;  %v5980_v50 = vld [vmem:[#allocation17_spill] sm:$0xff] }
 0x380   : > { %3451 = vst [vmem:[%s5541_s30 + $0x80] sm:$0xff] %v3387_v42  ;;  %v3058_v45 = vmul.f32 0.0078125, %v2952_v14  ;;  %v2902_v21 = vmul.f32 %v5689_v5, %v5689_v5  ;;  %v5981_v10 = vld [vmem:[#allocation13_spill] sm:$0xff] }
 0x381   : > { %v3759_v58 = vpop.eup %3758  ;;  %v3317_v47 = vmul.f32 %v5522_v62, %v3246_v35  ;;  %v5697_v30 = vsub.f32 %v5400_v52, %v2775_v48 }
 0x382   : > { %v3247_v6 = vmul.f32 %v3759_v58, %v5979_v39  ;;  %v3122_v0 = vadd.f32 1e-05, %v3058_v45  ;;  %3023 = vadd.xlane.f32.xlu1 %v2902_v21  ;;  %v2954_v12 = vpop.xlane.xlu0 %2953  ;;  %v5982_v39 = vld [vmem:[#allocation19_spill] sm:$0xff] }
 0x383   : > { %v3388_v24 = vadd.f32 %v5531_v60, %v3317_v47  ;;  %v2707_v33 = vpop.xlane.xlu1 %2706  ;;  %v3059_v23 = vmul.f32 0.0078125, %v2954_v12  ;;  %v2903_v41 = vmul.f32 %v5697_v30, %v5697_v30 }
 0x384   : > { %v3318_v25 = vmul.f32 %v5522_v62, %v3247_v6  ;;  %3764 = vrsqrt.f32 %v3122_v0  ;;  %v2776_v57 = vmul.f32 0.0078125, %v2707_v33  ;;  %v5983_v0 = vld [vmem:[#allocation14_spill] sm:$0xff] }
 0x385   : > { %3452 = vst [vmem:[%s5541_s30 + $0x88] sm:$0xff] %v3388_v24  ;;  %v3123_v52 = vadd.f32 1e-05, %v3059_v23  ;;  %3025 = vadd.xlane.f32.xlu0 %v2903_v41 }
 0x386   : > { %v3761_v38 = vpop.eup %3760  ;;  %v3389_v2 = vadd.f32 %v5531_v60, %v3318_v25  ;;  %v5707_v42 = vsub.f32 %v5980_v50, %v2776_v57  ;;  %v2709_v8 = vpop.xlane.xlu0 %2708 }
 0x387   : > { %v3248_v35 = vmul.f32 %v3761_v38, %v5981_v10  ;;  %3766 = vrsqrt.f32 %v3123_v52  ;;  %v2956_v14 = vpop.xlane.xlu1 %2955  ;;  %v2777_v48 = vmul.f32 0.0078125, %v2709_v8  ;;  %v5984_v8 = vld [vmem:[#allocation15_spill] sm:$0xff] }
 0x388   : > { %3453 = vst [vmem:[%s5541_s30 + $0x90] sm:$0xff] %v3389_v2  ;;  %v3060_v45 = vmul.f32 0.0078125, %v2956_v14  ;;  %v2904_v21 = vmul.f32 %v5707_v42, %v5707_v42 }
 0x389   : > { %v3763_v58 = vpop.eup %3762  ;;  %v3319_v47 = vmul.f32 %v5522_v62, %v3248_v35  ;;  %v5715_v6 = vsub.f32 %v5982_v39, %v2777_v48  ;;  %v5985_v39 = vld [vmem:[#allocation16_spill] sm:$0xff] }
 0x38a   : > { %v3249_v12 = vmul.f32 %v3763_v58, %v5983_v0  ;;  %v3124_v24 = vadd.f32 1e-05, %v3060_v45  ;;  %3027 = vadd.xlane.f32.xlu1 %v2904_v21 }
 0x38b   : > { %v3390_v33 = vadd.f32 %v5531_v60, %v3319_v47  ;;  %v2711_v23 = vpop.xlane.xlu1 %2710  ;;  %v2905_v41 = vmul.f32 %v5715_v6, %v5715_v6 }
 0x38c   : > { %v3320_v25 = vmul.f32 %v5522_v62, %v3249_v12  ;;  %3768 = vrsqrt.f32 %v3124_v24  ;;  %v2778_v57 = vmul.f32 0.0078125, %v2711_v23 }
 0x38d   : > { %3454 = vst [vmem:[%s5541_s30 + $0x98] sm:$0xff] %v3390_v33  ;;  %3029 = vadd.xlane.f32.xlu0 %v2905_v41 }
 0x38e   : > { %v3765_v52 = vpop.eup %3764  ;;  %v3391_v38 = vadd.f32 %v5531_v60, %v3320_v25  ;;  %v5725_v2 = vsub.f32 %v5427_v29, %v2778_v57  ;;  %v2713_v50 = vpop.xlane.xlu0 %2712 }
 0x38f   : > { %v3250_v10 = vmul.f32 %v3765_v52, %v5984_v8  ;;  %v2779_v35 = vmul.f32 0.0078125, %v2713_v50  ;;  %v5986_v8 = vld [vmem:[#allocation18_spill] sm:$0xff] }
 0x390   : > { %3455 = vst [vmem:[%s5541_s30 + $0xa0] sm:$0xff] %v3391_v38  ;;  %v2715_v14 = vpop.xlane.xlu1 %2714  ;;  %v2906_v48 = vmul.f32 %v5725_v2, %v5725_v2 }
 0x391   : > { %v3767_v45 = vpop.eup %3766  ;;  %v3321_v21 = vmul.f32 %v5522_v62, %v3250_v10  ;;  %v5733_v58 = vsub.f32 %v5432_v27, %v2779_v35  ;;  %v2780_v47 = vmul.f32 0.0078125, %v2715_v14 }
 0x392   : > { %v3251_v29 = vmul.f32 %v3767_v45, %v5985_v39  ;;  %3031 = vadd.xlane.f32.xlu1 %v2906_v48  ;;  %v2958_v0 = vpop.xlane.xlu0 %2957 }
 0x393   : > { %v3392_v12 = vadd.f32 %v5531_v60, %v3321_v21  ;;  %v5738_v24 = vsub.f32 %v5439_v17, %v2780_v47  ;;  %v3061_v33 = vmul.f32 0.0078125, %v2958_v0  ;;  %v2907_v23 = vmul.f32 %v5733_v58, %v5733_v58 }
 0x394   : > { %v3322_v41 = vmul.f32 %v5522_v62, %v3251_v29  ;;  %v2960_v25 = vpop.xlane.xlu1 %2959 }
 0x395   : > { %3456 = vst [vmem:[%s5541_s30 + $0xa8] sm:$0xff] %v3392_v12  ;;  %v3125_v27 = vadd.f32 1e-05, %v3061_v33  ;;  %v3062_v57 = vmul.f32 0.0078125, %v2960_v25  ;;  %3033 = vadd.xlane.f32.xlu0 %v2907_v23  ;;  %v2908_v52 = vmul.f32 %v5738_v24, %v5738_v24 }
 0x396   : > { %v3769_v38 = vpop.eup %3768  ;;  %v3393_v50 = vadd.f32 %v5531_v60, %v3322_v41  ;;  %v2962_v17 = vpop.xlane.xlu0 %2961 }
 0x397   : > { %v3252_v10 = vmul.f32 %v3769_v38, %v5986_v8  ;;  %3770 = vrsqrt.f32 %v3125_v27  ;;  %v3126_v35 = vadd.f32 1e-05, %v3062_v57  ;;  %v3063_v14 = vmul.f32 0.0078125, %v2962_v17  ;;  %3035 = vadd.xlane.f32.xlu1 %v2908_v52 }
 0x398   : > { %3457 = vst [vmem:[%s5541_s30 + $0xb0] sm:$0xff] %v3393_v50  ;;  %v2964_v48 = vpop.xlane.xlu1 %2963 }
 0x399   : > { %v3323_v45 = vmul.f32 %v5522_v62, %v3252_v10  ;;  %3772 = vrsqrt.f32 %v3126_v35  ;;  %v3127_v21 = vadd.f32 1e-05, %v3063_v14  ;;  %v3064_v47 = vmul.f32 0.0078125, %v2964_v48 }
 0x39a   : > { %v2966_v39 = vpop.xlane.xlu0 %2965 }
 0x39b   : > { %v3394_v29 = vadd.f32 %v5531_v60, %v3323_v45  ;;  %3774 = vrsqrt.f32 %v3127_v21  ;;  %v3128_v0 = vadd.f32 1e-05, %v3064_v47  ;;  %v3065_v12 = vmul.f32 0.0078125, %v2966_v39 }
 0x39c   : > { %v2968_v33 = vpop.xlane.xlu1 %2967 }
 0x39d   : > { %3458 = vst [vmem:[%s5541_s30 + $0xb8] sm:$0xff] %v3394_v29  ;;  %3776 = vrsqrt.f32 %v3128_v0  ;;  %v3129_v23 = vadd.f32 1e-05, %v3065_v12  ;;  %v3066_v41 = vmul.f32 0.0078125, %v2968_v33 }
 0x39f   : > { %3778 = vrsqrt.f32 %v3129_v23  ;;  %v3130_v25 = vadd.f32 1e-05, %v3066_v41 }
 0x3a1   : > { %v3771_v27 = vpop.eup %3770  ;;  %3780 = vrsqrt.f32 %v3130_v25 }
 0x3a2   : > { %v3253_v57 = vmul.f32 %v3771_v27, %v5435_v11  ;;  %v2970_v52 = vpop.xlane.xlu0 %2969 }
 0x3a3   : > { %v3773_v38 = vpop.eup %3772  ;;  %v3067_v50 = vmul.f32 0.0078125, %v2970_v52 }
 0x3a4   : > { %v3324_v17 = vmul.f32 %v5522_v62, %v3253_v57  ;;  %v3254_v8 = vmul.f32 %v3773_v38, %v5442_v32  ;;  %v2972_v10 = vpop.xlane.xlu1 %2971 }
 0x3a5   : > { %v3775_v35 = vpop.eup %3774  ;;  %v3131_v14 = vadd.f32 1e-05, %v3067_v50  ;;  %v3068_v48 = vmul.f32 0.0078125, %v2972_v10 }
 0x3a6   : > { %v3395_v45 = vadd.f32 %v5531_v60, %v3324_v17  ;;  %v3325_v21 = vmul.f32 %v5522_v62, %v3254_v8  ;;  %v3255_v47 = vmul.f32 %v3775_v35, %v5448_v55 }
 0x3a7   : > { %v3777_v11 = vpop.eup %3776  ;;  %3782 = vrsqrt.f32 %v3131_v14  ;;  %v3132_v39 = vadd.f32 1e-05, %v3068_v48 }
 0x3a8   : > { %3459 = vst [vmem:[%s5541_s30 + $0xc0] sm:$0xff] %v3395_v45  ;;  %v3396_v29 = vadd.f32 %v5531_v60, %v3325_v21  ;;  %v3326_v32 = vmul.f32 %v5522_v62, %v3255_v47  ;;  %v3256_v0 = vmul.f32 %v3777_v11, %v5453_v13 }
 0x3a9   : > { %v3779_v12 = vpop.eup %3778  ;;  %3784 = vrsqrt.f32 %v3132_v39 }
 0x3aa   : > { %3460 = vst [vmem:[%s5541_s30 + $0xc8] sm:$0xff] %v3396_v29  ;;  %v3397_v33 = vadd.f32 %v5531_v60, %v3326_v32  ;;  %v3327_v23 = vmul.f32 %v5522_v62, %v3256_v0  ;;  %v3257_v55 = vmul.f32 %v3779_v12, %v5460_v18  ;;  %v2974_v41 = vpop.xlane.xlu0 %2973 }
 0x3ab   : > { %v3781_v25 = vpop.eup %3780  ;;  %v3069_v27 = vmul.f32 0.0078125, %v2974_v41 }
 0x3ac   : > { %3461 = vst [vmem:[%s5541_s30 + $0xd0] sm:$0xff] %v3397_v33  ;;  %v3398_v57 = vadd.f32 %v5531_v60, %v3327_v23  ;;  %v3328_v13 = vmul.f32 %v5522_v62, %v3257_v55  ;;  %v3258_v52 = vmul.f32 %v3781_v25, %v5465_v44  ;;  %v2976_v38 = vpop.xlane.xlu1 %2975 }
 0x3ad   : > { %v3133_v50 = vadd.f32 1e-05, %v3069_v27  ;;  %v3070_v17 = vmul.f32 0.0078125, %v2976_v38 }
 0x3ae   : > { %3462 = vst [vmem:[%s5541_s30 + $0xd8] sm:$0xff] %v3398_v57  ;;  %v3399_v8 = vadd.f32 %v5531_v60, %v3328_v13  ;;  %v3329_v18 = vmul.f32 %v5522_v62, %v3258_v52 }
 0x3af   : > { %3786 = vrsqrt.f32 %v3133_v50  ;;  %v3134_v10 = vadd.f32 1e-05, %v3070_v17 }
 0x3b0   : > { %3463 = vst [vmem:[%s5541_s30 + $0xe0] sm:$0xff] %v3399_v8  ;;  %v3400_v35 = vadd.f32 %v5531_v60, %v3329_v18 }
 0x3b1   : > { %v3783_v14 = vpop.eup %3782  ;;  %3788 = vrsqrt.f32 %v3134_v10 }
 0x3b2   : > { %3464 = vst [vmem:[%s5541_s30 + $0xe8] sm:$0xff] %v3400_v35  ;;  %v3259_v48 = vmul.f32 %v3783_v14, %v5470_v34  ;;  %v2978_v44 = vpop.xlane.xlu0 %2977 }
 0x3b3   : > { %v3785_v45 = vpop.eup %3784  ;;  %v3071_v21 = vmul.f32 0.0078125, %v2978_v44 }
 0x3b4   : > { %v3330_v47 = vmul.f32 %v5522_v62, %v3259_v48  ;;  %v3260_v11 = vmul.f32 %v3785_v45, %v5473_v40  ;;  %v2980_v39 = vpop.xlane.xlu1 %2979 }
 0x3b5   : > { %v3135_v29 = vadd.f32 1e-05, %v3071_v21  ;;  %v3072_v32 = vmul.f32 0.0078125, %v2980_v39 }
 0x3b6   : > { %v3401_v0 = vadd.f32 %v5531_v60, %v3330_v47  ;;  %v3331_v12 = vmul.f32 %v5522_v62, %v3260_v11 }
 0x3b7   : > { %3790 = vrsqrt.f32 %v3135_v29  ;;  %v3136_v33 = vadd.f32 1e-05, %v3072_v32 }
 0x3b8   : > { %3465 = vst [vmem:[%s5541_s30 + $0xf0] sm:$0xff] %v3401_v0  ;;  %v3402_v34 = vadd.f32 %v5531_v60, %v3331_v12 }
 0x3b9   : > { %v3787_v23 = vpop.eup %3786  ;;  %3792 = vrsqrt.f32 %v3136_v33 }
 0x3ba   : > { %3466 = vst [vmem:[%s5541_s30 + $0xf8] sm:$0xff] %v3402_v34  ;;  %v3261_v55 = vmul.f32 %v3787_v23, %v5480_v28  ;;  %v2982_v41 = vpop.xlane.xlu0 %2981 }
 0x3bb   : > { %v3789_v40 = vpop.eup %3788  ;;  %v3073_v25 = vmul.f32 0.0078125, %v2982_v41 }
 0x3bc   : > { %v3332_v27 = vmul.f32 %v5522_v62, %v3261_v55  ;;  %v3262_v57 = vmul.f32 %v3789_v40, %v5483_v1  ;;  %v2984_v13 = vpop.xlane.xlu1 %2983 }
 0x3bd   : > { %v3137_v52 = vadd.f32 1e-05, %v3073_v25  ;;  %v3074_v38 = vmul.f32 0.0078125, %v2984_v13 }
 0x3be   : > { %v3403_v50 = vadd.f32 %v5531_v60, %v3332_v27  ;;  %v3333_v17 = vmul.f32 %v5522_v62, %v3262_v57 }
 0x3bf   : > { %3794 = vrsqrt.f32 %v3137_v52  ;;  %v3138_v8 = vadd.f32 1e-05, %v3074_v38 }
 0x3c0   : > { %3467 = vst [vmem:[%s5541_s30 + $0x100] sm:$0xff] %v3403_v50  ;;  %v3404_v28 = vadd.f32 %v5531_v60, %v3333_v17 }
 0x3c1   : > { %v3791_v18 = vpop.eup %3790  ;;  %3796 = vrsqrt.f32 %v3138_v8 }
 0x3c2   : > { %3468 = vst [vmem:[%s5541_s30 + $0x108] sm:$0xff] %v3404_v28  ;;  %v3263_v10 = vmul.f32 %v3791_v18, %v5490_v43  ;;  %v2986_v1 = vpop.xlane.xlu0 %2985 }
 0x3c3   : > { %v3793_v35 = vpop.eup %3792  ;;  %v3075_v14 = vmul.f32 0.0078125, %v2986_v1 }
 0x3c4   : > { %v3334_v48 = vmul.f32 %v5522_v62, %v3263_v10  ;;  %v3264_v44 = vmul.f32 %v3793_v35, %v5493_v9 }
 0x3c5   : > { %v3139_v45 = vadd.f32 1e-05, %v3075_v14 }
 0x3c6   : > { %v3405_v21 = vadd.f32 %v5531_v60, %v3334_v48  ;;  %v3335_v47 = vmul.f32 %v5522_v62, %v3264_v44 }
 0x3c7   : > { %3798 = vrsqrt.f32 %v3139_v45  ;;  %v2988_v11 = vpop.xlane.xlu1 %2987 }
 0x3c8   : > { %3469 = vst [vmem:[%s5541_s30 + $0x110] sm:$0xff] %v3405_v21  ;;  %v3406_v39 = vadd.f32 %v5531_v60, %v3335_v47  ;;  %v3076_v29 = vmul.f32 0.0078125, %v2988_v11 }
 0x3c9   : > { %v3795_v43 = vpop.eup %3794 }
 0x3ca   : > { %3470 = vst [vmem:[%s5541_s30 + $0x118] sm:$0xff] %v3406_v39  ;;  %v3265_v32 = vmul.f32 %v3795_v43, %v5500_v53  ;;  %v3140_v0 = vadd.f32 1e-05, %v3076_v29  ;;  %v2990_v12 = vpop.xlane.xlu0 %2989 }
 0x3cb   : > { %v3797_v9 = vpop.eup %3796  ;;  %v3077_v33 = vmul.f32 0.0078125, %v2990_v12 }
 0x3cc   : > { %v3336_v34 = vmul.f32 %v5522_v62, %v3265_v32  ;;  %v3266_v23 = vmul.f32 %v3797_v9, %v5503_v61  ;;  %3800 = vrsqrt.f32 %v3140_v0 }
 0x3cd   : > { %v3141_v55 = vadd.f32 1e-05, %v3077_v33 }
 0x3ce   : > { %v3407_v41 = vadd.f32 %v5531_v60, %v3336_v34  ;;  %v3337_v40 = vmul.f32 %v5522_v62, %v3266_v23 }
 0x3cf   : > { %3802 = vrsqrt.f32 %v3141_v55  ;;  %v2992_v25 = vpop.xlane.xlu1 %2991 }
 0x3d0   : > { %3471 = vst [vmem:[%s5541_s30 + $0x120] sm:$0xff] %v3407_v41  ;;  %v3408_v53 = vadd.f32 %v5531_v60, %v3337_v40  ;;  %v3078_v27 = vmul.f32 0.0078125, %v2992_v25 }
 0x3d1   : > { %v3799_v57 = vpop.eup %3798 }
 0x3d2   : > { %3472 = vst [vmem:[%s5541_s30 + $0x128] sm:$0xff] %v3408_v53  ;;  %v3267_v13 = vmul.f32 %v3799_v57, %v5510_v36  ;;  %v3142_v52 = vadd.f32 1e-05, %v3078_v27  ;;  %v2994_v38 = vpop.xlane.xlu0 %2993  ;;  %v5832_v57 = vld [vmem:[%s5930_s5] ss:$0 sm:$0xff] }
 0x3d3   : > { %v3079_v61 = vmul.f32 0.0078125, %v2994_v38 }
 0x3d4   : > { %v3338_v50 = vmul.f32 %v5522_v62, %v3267_v13  ;;  %3804 = vrsqrt.f32 %v3142_v52 }
 0x3d5   : > { %v3143_v17 = vadd.f32 1e-05, %v3079_v61 }
 0x3d6   : > { %v3801_v8 = vpop.eup %3800  ;;  %v3409_v28 = vadd.f32 %v5531_v60, %v3338_v50 }
 0x3d7   : > { %v3268_v18 = vmul.f32 %v3801_v8, %v5515_v31  ;;  %3806 = vrsqrt.f32 %v3143_v17  ;;  %v2996_v10 = vpop.xlane.xlu1 %2995 }
 0x3d8   : > { %3473 = vst [vmem:[%s5541_s30 + $0x130] sm:$0xff] %v3409_v28  ;;  %v3080_v1 = vmul.f32 0.0078125, %v2996_v10 }
 0x3d9   : > { %v3803_v35 = vpop.eup %3802  ;;  %v3339_v36 = vmul.f32 %v5522_v62, %v3268_v18 }
 0x3da   : > { %v3269_v14 = vmul.f32 %v3803_v35, %v5525_v37  ;;  %v3144_v48 = vadd.f32 1e-05, %v3080_v1  ;;  %v2998_v44 = vpop.xlane.xlu0 %2997 }
 0x3db   : > { %v3410_v45 = vadd.f32 %v5531_v60, %v3339_v36  ;;  %v3081_v21 = vmul.f32 0.0078125, %v2998_v44 }
 0x3dc   : > { %v3340_v47 = vmul.f32 %v5522_v62, %v3269_v14  ;;  %3808 = vrsqrt.f32 %v3144_v48 }
 0x3dd   : > { %3474 = vst [vmem:[%s5541_s30 + $0x138] sm:$0xff] %v3410_v45  ;;  %v3145_v31 = vadd.f32 1e-05, %v3081_v21 }
 0x3de   : > { %v3805_v11 = vpop.eup %3804  ;;  %v3411_v39 = vadd.f32 %v5531_v60, %v3340_v47 }
 0x3df   : > { %v3270_v29 = vmul.f32 %v3805_v11, %v5545_v59  ;;  %3810 = vrsqrt.f32 %v3145_v31  ;;  %v3000_v43 = vpop.xlane.xlu1 %2999 }
 0x3e0   : > { %3475 = vst [vmem:[%s5541_s30 + $0x140] sm:$0xff] %v3411_v39  ;;  %v3082_v37 = vmul.f32 0.0078125, %v3000_v43 }
 0x3e1   : > { %v3807_v32 = vpop.eup %3806  ;;  %v3341_v0 = vmul.f32 %v5522_v62, %v3270_v29 }
 0x3e2   : > { %v3271_v12 = vmul.f32 %v3807_v32, %v5553_v22  ;;  %v3146_v9 = vadd.f32 1e-05, %v3082_v37  ;;  %v3002_v33 = vpop.xlane.xlu0 %3001 }
 0x3e3   : > { %v3412_v34 = vadd.f32 %v5531_v60, %v3341_v0  ;;  %v3083_v23 = vmul.f32 0.0078125, %v3002_v33 }
 0x3e4   : > { %v3342_v55 = vmul.f32 %v5522_v62, %v3271_v12  ;;  %3812 = vrsqrt.f32 %v3146_v9 }
 0x3e5   : > { %3476 = vst [vmem:[%s5541_s30 + $0x148] sm:$0xff] %v3412_v34  ;;  %v3147_v59 = vadd.f32 1e-05, %v3083_v23 }
 0x3e6   : > { %v3809_v41 = vpop.eup %3808  ;;  %v3413_v40 = vadd.f32 %v5531_v60, %v3342_v55 }
 0x3e7   : > { %v3272_v25 = vmul.f32 %v3809_v41, %v5563_v4  ;;  %3814 = vrsqrt.f32 %v3147_v59  ;;  %v3004_v53 = vpop.xlane.xlu1 %3003  ;;  %v5839_v4 = vld [vmem:[%s5931_s6] ss:$0 sm:$0xff] }
 0x3e8   : > { %3477 = vst [vmem:[%s5541_s30 + $0x150] sm:$0xff] %v3413_v40  ;;  %v3084_v22 = vmul.f32 0.0078125, %v3004_v53 }
 0x3e9   : > { %v3811_v27 = vpop.eup %3810  ;;  %v3343_v62 = vmul.f32 %v5832_v57, %v3272_v25 }
 0x3ea   : > { %v3273_v13 = vmul.f32 %v3811_v27, %v5571_v51  ;;  %v3148_v52 = vadd.f32 1e-05, %v3084_v22  ;;  %v3006_v60 = vpop.xlane.xlu0 %3005 }
 0x3eb   : > { %v3414_v38 = vadd.f32 %v5839_v4, %v3343_v62  ;;  %v3085_v61 = vmul.f32 0.0078125, %v3006_v60 }
 0x3ec   : > { %v3344_v50 = vmul.f32 %v5832_v57, %v3273_v13  ;;  %3816 = vrsqrt.f32 %v3148_v52 }
 0x3ed   : > { %3478 = vst [vmem:[%s5541_s30 + $0x158] sm:$0xff] %v3414_v38  ;;  %v3149_v17 = vadd.f32 1e-05, %v3085_v61 }
 0x3ee   : > { %v3813_v8 = vpop.eup %3812  ;;  %v3415_v28 = vadd.f32 %v5839_v4, %v3344_v50 }
 0x3ef   : > { %v3274_v51 = vmul.f32 %v3813_v8, %v5581_v49  ;;  %3818 = vrsqrt.f32 %v3149_v17  ;;  %v3008_v18 = vpop.xlane.xlu1 %3007 }
 0x3f0   : > { %3479 = vst [vmem:[%s5541_s30 + $0x160] sm:$0xff] %v3415_v28  ;;  %v3086_v10 = vmul.f32 0.0078125, %v3008_v18 }
 0x3f1   : > { %v3815_v1 = vpop.eup %3814  ;;  %v3345_v35 = vmul.f32 %v5832_v57, %v3274_v51 }
 0x3f2   : > { %v3275_v36 = vmul.f32 %v3815_v1, %v5589_v54  ;;  %v3150_v14 = vadd.f32 1e-05, %v3086_v10  ;;  %v3010_v48 = vpop.xlane.xlu0 %3009 }
 0x3f3   : > { %v3416_v44 = vadd.f32 %v5839_v4, %v3345_v35  ;;  %v3087_v45 = vmul.f32 0.0078125, %v3010_v48 }
 0x3f4   : > { %v3346_v21 = vmul.f32 %v5832_v57, %v3275_v36  ;;  %3820 = vrsqrt.f32 %v3150_v14 }
 0x3f5   : > { %3480 = vst [vmem:[%s5541_s30 + $0x168] sm:$0xff] %v3416_v44  ;;  %v3151_v49 = vadd.f32 1e-05, %v3087_v45 }
 0x3f6   : > { %v3817_v47 = vpop.eup %3816  ;;  %v3417_v31 = vadd.f32 %v5839_v4, %v3346_v21 }
 0x3f7   : > { %v3276_v11 = vmul.f32 %v3817_v47, %v5599_v3  ;;  %3822 = vrsqrt.f32 %v3151_v49  ;;  %v3012_v39 = vpop.xlane.xlu1 %3011 }
 0x3f8   : > { %3481 = vst [vmem:[%s5541_s30 + $0x170] sm:$0xff] %v3417_v31  ;;  %v3088_v54 = vmul.f32 0.0078125, %v3012_v39 }
 0x3f9   : > { %v3819_v29 = vpop.eup %3818  ;;  %v3347_v43 = vmul.f32 %v5832_v57, %v3276_v11 }
 0x3fa   : > { %v3277_v37 = vmul.f32 %v3819_v29, %v5607_v15  ;;  %v3152_v32 = vadd.f32 1e-05, %v3088_v54  ;;  %v3014_v0 = vpop.xlane.xlu0 %3013 }
 0x3fb   : > { %v3418_v12 = vadd.f32 %v5839_v4, %v3347_v43  ;;  %v3089_v9 = vmul.f32 0.0078125, %v3014_v0 }
 0x3fc   : > { %v3348_v33 = vmul.f32 %v5832_v57, %v3277_v37  ;;  %3824 = vrsqrt.f32 %v3152_v32 }
 0x3fd   : > { %3482 = vst [vmem:[%s5541_s30 + $0x178] sm:$0xff] %v3418_v12  ;;  %v3153_v3 = vadd.f32 1e-05, %v3089_v9 }
 0x3fe   : > { %v3821_v34 = vpop.eup %3820  ;;  %v3419_v23 = vadd.f32 %v5839_v4, %v3348_v33 }
 0x3ff   : > { %v3278_v55 = vmul.f32 %v3821_v34, %v5617_v56  ;;  %3826 = vrsqrt.f32 %v3153_v3  ;;  %v3016_v59 = vpop.xlane.xlu1 %3015 }
 0x400   : > { %3483 = vst [vmem:[%s5541_s30 + $0x180] sm:$0xff] %v3419_v23  ;;  %v3090_v15 = vmul.f32 0.0078125, %v3016_v59 }
 0x401   : > { %v3823_v41 = vpop.eup %3822  ;;  %v3349_v40 = vmul.f32 %v5832_v57, %v3278_v55 }
 0x402   : > { %v3279_v25 = vmul.f32 %v3823_v41, %v5625_v63  ;;  %v3154_v53 = vadd.f32 1e-05, %v3090_v15  ;;  %v3018_v22 = vpop.xlane.xlu0 %3017 }
 0x403   : > { %v3420_v27 = vadd.f32 %v5839_v4, %v3349_v40  ;;  %v3091_v62 = vmul.f32 0.0078125, %v3018_v22 }
 0x404   : > { %v3350_v13 = vmul.f32 %v5832_v57, %v3279_v25  ;;  %3828 = vrsqrt.f32 %v3154_v53 }
 0x405   : > { %3484 = vst [vmem:[%s5541_s30 + $0x188] sm:$0xff] %v3420_v27  ;;  %v3155_v56 = vadd.f32 1e-05, %v3091_v62 }
 0x406   : > { %v3825_v52 = vpop.eup %3824  ;;  %v3421_v60 = vadd.f32 %v5839_v4, %v3350_v13 }
 0x407   : > { %v3280_v38 = vmul.f32 %v3825_v52, %v5635_v16  ;;  %3830 = vrsqrt.f32 %v3155_v56  ;;  %v3020_v61 = vpop.xlane.xlu1 %3019 }
 0x408   : > { %3485 = vst [vmem:[%s5541_s30 + $0x190] sm:$0xff] %v3421_v60  ;;  %v3092_v63 = vmul.f32 0.0078125, %v3020_v61 }
 0x409   : > { %v3827_v50 = vpop.eup %3826  ;;  %v3351_v17 = vmul.f32 %v5832_v57, %v3280_v38 }
 0x40a   : > { %v3281_v8 = vmul.f32 %v3827_v50, %v5643_v46  ;;  %v3156_v28 = vadd.f32 1e-05, %v3092_v63  ;;  %v3022_v51 = vpop.xlane.xlu0 %3021 }
 0x40b   : > { %v3422_v18 = vadd.f32 %v5839_v4, %v3351_v17  ;;  %v3093_v10 = vmul.f32 0.0078125, %v3022_v51 }
 0x40c   : > { %v3352_v1 = vmul.f32 %v5832_v57, %v3281_v8  ;;  %3832 = vrsqrt.f32 %v3156_v28 }
 0x40d   : > { %3486 = vst [vmem:[%s5541_s30 + $0x198] sm:$0xff] %v3422_v18  ;;  %v3157_v16 = vadd.f32 1e-05, %v3093_v10 }
 0x40e   : > { %v3829_v35 = vpop.eup %3828  ;;  %v3423_v36 = vadd.f32 %v5839_v4, %v3352_v1 }
 0x40f   : > { %v3282_v14 = vmul.f32 %v3829_v35, %v5653_v7  ;;  %3834 = vrsqrt.f32 %v3157_v16  ;;  %v3024_v48 = vpop.xlane.xlu1 %3023 }
 0x410   : > { %3487 = vst [vmem:[%s5541_s30 + $0x1a0] sm:$0xff] %v3423_v36  ;;  %v3094_v46 = vmul.f32 0.0078125, %v3024_v48 }
 0x411   : > { %v3831_v44 = vpop.eup %3830  ;;  %v3353_v45 = vmul.f32 %v5832_v57, %v3282_v14 }
 0x412   : > { %v3283_v21 = vmul.f32 %v3831_v44, %v5661_v26  ;;  %v3158_v49 = vadd.f32 1e-05, %v3094_v46  ;;  %v3026_v47 = vpop.xlane.xlu0 %3025 }
 0x413   : > { %v3424_v31 = vadd.f32 %v5839_v4, %v3353_v45  ;;  %v3095_v11 = vmul.f32 0.0078125, %v3026_v47 }
 0x414   : > { %v3354_v39 = vmul.f32 %v5832_v57, %v3283_v21  ;;  %3836 = vrsqrt.f32 %v3158_v49 }
 0x415   : > { %3488 = vst [vmem:[%s5541_s30 + $0x1a8] sm:$0xff] %v3424_v31  ;;  %v3159_v7 = vadd.f32 1e-05, %v3095_v11 }
 0x416   : > { %v3833_v54 = vpop.eup %3832  ;;  %v3425_v29 = vadd.f32 %v5839_v4, %v3354_v39 }
 0x417   : > { %v3284_v43 = vmul.f32 %v3833_v54, %v5671_v19  ;;  %3838 = vrsqrt.f32 %v3159_v7  ;;  %v3028_v37 = vpop.xlane.xlu1 %3027 }
 0x418   : > { %3489 = vst [vmem:[%s5541_s30 + $0x1b0] sm:$0xff] %v3425_v29  ;;  %v3096_v26 = vmul.f32 0.0078125, %v3028_v37 }
 0x419   : > { %v3835_v32 = vpop.eup %3834  ;;  %v3355_v0 = vmul.f32 %v5832_v57, %v3284_v43 }
 0x41a   : > { %v3285_v12 = vmul.f32 %v3835_v32, %v5679_v20  ;;  %v3160_v9 = vadd.f32 1e-05, %v3096_v26  ;;  %v3030_v33 = vpop.xlane.xlu0 %3029 }
 0x41b   : > { %v3426_v3 = vadd.f32 %v5839_v4, %v3355_v0  ;;  %v3097_v34 = vmul.f32 0.0078125, %v3030_v33 }
 0x41c   : > { %v3356_v23 = vmul.f32 %v5832_v57, %v3285_v12  ;;  %3840 = vrsqrt.f32 %v3160_v9 }
 0x41d   : > { %3490 = vst [vmem:[%s5541_s30 + $0x1b8] sm:$0xff] %v3426_v3  ;;  %v3161_v19 = vadd.f32 1e-05, %v3097_v34 }
 0x41e   : > { %v3837_v55 = vpop.eup %3836  ;;  %v3427_v59 = vadd.f32 %v5839_v4, %v3356_v23 }
 0x41f   : > { %v3286_v15 = vmul.f32 %v3837_v55, %v5689_v5  ;;  %3842 = vrsqrt.f32 %v3161_v19  ;;  %v3032_v41 = vpop.xlane.xlu1 %3031 }
 0x420   : > { %3491 = vst [vmem:[%s5541_s30 + $0x1c0] sm:$0xff] %v3427_v59  ;;  %v3098_v20 = vmul.f32 0.0078125, %v3032_v41 }
 0x421   : > { %v3839_v40 = vpop.eup %3838  ;;  %v3357_v25 = vmul.f32 %v5832_v57, %v3286_v15 }
 0x422   : > { %v3287_v53 = vmul.f32 %v3839_v40, %v5697_v30  ;;  %v3162_v22 = vadd.f32 1e-05, %v3098_v20  ;;  %v3034_v27 = vpop.xlane.xlu0 %3033 }
 0x423   : > { %v3428_v62 = vadd.f32 %v5839_v4, %v3357_v25  ;;  %v3099_v13 = vmul.f32 0.0078125, %v3034_v27 }
 0x424   : > { %v3358_v56 = vmul.f32 %v5832_v57, %v3287_v53  ;;  %3844 = vrsqrt.f32 %v3162_v22  ;;  %v3036_v52 = vpop.xlane.xlu1 %3035 }
 0x425   : > { %3492 = vst [vmem:[%s5541_s30 + $0x1c8] sm:$0xff] %v3428_v62  ;;  %v3163_v5 = vadd.f32 1e-05, %v3099_v13  ;;  %v3100_v60 = vmul.f32 0.0078125, %v3036_v52 }
 0x426   : > { %v3841_v38 = vpop.eup %3840  ;;  %v3429_v61 = vadd.f32 %v5839_v4, %v3358_v56 }
 0x427   : > { %v3288_v30 = vmul.f32 %v3841_v38, %v5707_v42  ;;  %3846 = vrsqrt.f32 %v3163_v5  ;;  %v3164_v63 = vadd.f32 1e-05, %v3100_v60 }
 0x428   : > { %3493 = vst [vmem:[%s5541_s30 + $0x1d0] sm:$0xff] %v3429_v61 }
 0x429   : > { %v3843_v50 = vpop.eup %3842  ;;  %v3359_v17 = vmul.f32 %v5832_v57, %v3288_v30  ;;  %3848 = vrsqrt.f32 %v3164_v63 }
 0x42a   : > { %v3289_v8 = vmul.f32 %v3843_v50, %v5715_v6 }
 0x42b   : > { %v3430_v28 = vadd.f32 %v5839_v4, %v3359_v17 }
 0x42c   : > { %v3360_v51 = vmul.f32 %v5832_v57, %v3289_v8 }
 0x42d   : > { %3494 = vst [vmem:[%s5541_s30 + $0x1d8] sm:$0xff] %v3430_v28 }
 0x42e   : > { %v3845_v18 = vpop.eup %3844  ;;  %v3431_v42 = vadd.f32 %v5839_v4, %v3360_v51 }
 0x42f   : > { %v3290_v10 = vmul.f32 %v3845_v18, %v5725_v2 }
 0x430   : > { %3495 = vst [vmem:[%s5541_s30 + $0x1e0] sm:$0xff] %v3431_v42 }
 0x431   : > { %v3847_v1 = vpop.eup %3846  ;;  %v3361_v16 = vmul.f32 %v5832_v57, %v3290_v10 }
 0x432   : > { %v3291_v35 = vmul.f32 %v3847_v1, %v5733_v58 }
 0x433   : > { %v3849_v36 = vpop.eup %3848  ;;  %v3432_v6 = vadd.f32 %v5839_v4, %v3361_v16 }
 0x434   : > { %v3362_v14 = vmul.f32 %v5832_v57, %v3291_v35  ;;  %v3292_v48 = vmul.f32 %v3849_v36, %v5738_v24 }
 0x435   : > { %3496 = vst [vmem:[%s5541_s30 + $0x1e8] sm:$0xff] %v3432_v6 }
 0x436   : > { %v3433_v46 = vadd.f32 %v5839_v4, %v3362_v14  ;;  %v3363_v44 = vmul.f32 %v5832_v57, %v3292_v48 }
 0x438   : > { %3497 = vst [vmem:[%s5541_s30 + $0x1f0] sm:$0xff] %v3433_v46  ;;  %v3434_v2 = vadd.f32 %v5839_v4, %v3363_v44 }
 0x43a   : > { %3498 = vst [vmem:[%s5541_s30 + $0x1f8] sm:$0xff] %v3434_v2 }
 0x43b PF: > { %s17_s24 = sadd.s32 1, %s3923_s24  }
 0x43c   : > { %p14_p4 = scmp.ge.s32.totalorder %s17_s24, 4  }
 0x43e   :  { %16 = sbr.rel (!%p14_p4) target bundleno = 1 (0x1), region = 78 }

</bundles_post_ra>
